<compile_context>
chip_gen: v7x
topology: tpu7x:2x2x1
jax: 0.10.0
libtpu: 0.0.40
codegen_flags: <defaults>
</compile_context>

<pallas_src>
import numpy as np
import jax
import jax.numpy as jnp
from jax import lax
from jax.experimental import pallas as pl
from jax.experimental.pallas import tpu as pltpu

KERNEL_LEN = 5   # must be odd so Conv1d(padding=K//2) preserves length
L = 64           # sequence length; mixer requires 3 * (L // 8) == 24
B = 2

# Row offsets inside the packed bf16 small-matrix slab.
# All multiples of 16 so slices are packed-tile aligned for bf16.
OFF_C1, OFF_C2, OFF_C3 = 0, 16, 48
OFF_F1, OFF_F2, OFF_F3 = 112, 496, 624
OFF_M1, OFF_M2 = 688, 704
SMALL_ROWS = 720


# --------------------------------- kernel ----------------------------------

def build_kernel(seq_len):
    K = KERNEL_LEN
    pad = K // 2

    def kernel(x_ref, gen_ref, wc1, wc2, wc3, wc4, wsm, bias,
               out_ref, s1, s2, s3):

        def brow(r, width):                       # (1, width) f32 bias row
            return bias[r:r + 1, :width]

        def dot(a, b):                            # single-pass bf16 MXU matmul
            return jnp.dot(a.astype(jnp.bfloat16), b.astype(jnp.bfloat16),
                           preferred_element_type=jnp.float32)

        def conv(h, w, b, slen):
            """'same' Conv1d over sequences stacked along the sublane axis.

            h: (m, Cin) with m = n_seq * slen (sequences contiguous in rows);
            w: (K*Cin, Cout) packed tap-major; b: (1, Cout).
            Taps are rolls of the whole slab with rows that would cross a
            sequence boundary zeroed (per-sequence zero padding), concatenated
            along lanes and fed to a single im2col matmul.  Cin == 1 stays on
            the VPU as outer products.
            """
            m, cin = h.shape
            cout = w.shape[-1]
            pos = lax.broadcasted_iota(jnp.int32, (m, 1), 0) & (slen - 1)

            def tap(t):
                d = t - pad
                if d == 0:
                    return h
                xt = pltpu.roll(h, (-d) % m, axis=0)
                valid = jnp.logical_and(pos + d >= 0, pos + d < slen)
                return jnp.where(valid, xt, 0.0)

            if cin == 1:                          # conv1: 5 outer products
                acc = jnp.zeros((m, cout), jnp.float32)
                for t in range(K):
                    acc = acc + tap(t) * w[t:t + 1, :].astype(jnp.float32)
                return acc + b
            x2 = jnp.concatenate([tap(t) for t in range(K)], axis=1)
            return dot(x2, w) + b                 # one MXU matmul per stage

        def maxpool(h, s_ref):
            # MaxPool1d(kernel=2, stride=2) along the row axis.
            m = h.shape[0]
            hmax = jnp.maximum(h, pltpu.roll(h, m - 1, axis=0))  # max(h[i],h[i+1])
            s_ref[...] = hmax
            return s_ref[pl.ds(0, m // 2, stride=2), :]          # keep even rows

        relu = lambda v: jnp.maximum(v, 0.0)

        # ---- shared residual conv backbone (3 signals stacked in rows) -----
        x = x_ref[0]                                             # (3*L, 1)
        h = maxpool(relu(conv(x, wc1[...], brow(0, 32), seq_len) + x), s1)
        h = maxpool(relu(conv(h, wc2[...], brow(1, 64), seq_len // 2)), s2)
        h = maxpool(relu(conv(h, wc3[...], brow(2, 128), seq_len // 4)), s3)
        h = relu(conv(h, wc4[...], brow(3, 256), seq_len // 8))  # (24, 256)

        # ---- constants MLP ---------------------------------------------------
        g = gen_ref[0]                                           # (1, 4)
        g = relu(dot(g, wsm[OFF_C1:OFF_C1 + 4, :32]) + brow(4, 32))
        g = relu(dot(g, wsm[OFF_C2:OFF_C2 + 32, :64]) + brow(5, 64))
        g = relu(dot(g, wsm[OFF_C3:OFF_C3 + 64, :128]) + brow(6, 128))

        # ---- mixer: Linear over the 24 stacked positions (biases = columns) -
        y = relu(dot(wsm[OFF_M1:OFF_M1 + 12, :24], h) + bias[16:28, 0:1])
        z = relu(dot(wsm[OFF_M2:OFF_M2 + 1, :12], y) + bias[28:29, 0:1])  # (1,256)

        # ---- fc head ---------------------------------------------------------
        f = jnp.concatenate([z, g], axis=1)                      # (1, 384)
        f = relu(dot(f, wsm[OFF_F1:OFF_F1 + 384, :128]) + brow(7, 128))
        f = relu(dot(f, wsm[OFF_F2:OFF_F2 + 128, :64]) + brow(8, 64))
        out_ref[0] = dot(f, wsm[OFF_F3:OFF_F3 + 64, :1]) + brow(9, 1)

    return kernel


# ------------------------------ wrapper / glue ------------------------------

def make_model(params_k, batch, seq_len):
    assert seq_len % 8 == 0 and (seq_len & (seq_len - 1)) == 0
    assert 3 * (seq_len // 8) == 24               # mixer expects 24 positions
    rows = 3 * seq_len

    data_specs = [
        pl.BlockSpec((1, rows, 1), lambda b: (b, 0, 0)),   # stacked signals
        pl.BlockSpec((1, 1, 4), lambda b: (b, 0, 0)),      # general constants
    ]
    param_specs = [pl.BlockSpec(p.shape, lambda b, n=p.ndim: (0,) * n)
                   for p in params_k]

    grid_spec = pltpu.PrefetchScalarGridSpec(
        num_scalar_prefetch=0,
        grid=(batch,),                            # one step per batch item
        in_specs=data_specs + param_specs,
        out_specs=pl.BlockSpec((1, 1, 1), lambda b: (b, 0, 0)),
        scratch_shapes=[pltpu.VMEM((rows, 32), jnp.float32),
                        pltpu.VMEM((rows // 2, 64), jnp.float32),
                        pltpu.VMEM((rows // 4, 128), jnp.float32)],
    )
    call = pl.pallas_call(
        build_kernel(seq_len),
        out_shape=jax.ShapeDtypeStruct((batch, 1, 1), jnp.float32),
        grid_spec=grid_spec,
        compiler_params=pltpu.CompilerParams(
            dimension_semantics=("parallel",)),   # v7x: batch items on both TCs
    )

    def forward(time, speed, hr, general):
        # time/speed/hr: (B, 1, L) NCL ; general: (B, 4)
        seqs = jnp.stack([time[:, 0, :], speed[:, 0, :], hr[:, 0, :]], axis=1)
        x = seqs.reshape(batch, rows, 1).astype(jnp.float32)
        g = general.reshape(batch, 1, 4).astype(jnp.float32)
        out = call(x, g, *params_k)
        return out.reshape(batch)                 # matches torch .squeeze(1)

    return forward


# ------------------------- deterministic parameters -------------------------

def init_params(key):
    K = KERNEL_LEN
    keys = iter(jax.random.split(key, 40))

    def u(shape, fan_in):
        bound = 1.0 / np.sqrt(fan_in)
        return jax.random.uniform(next(keys), shape, jnp.float32, -bound, bound)

    p = {}
    p['conv1_w'] = u((32, 1, K), 1 * K);      p['conv1_b'] = u((32,), 1 * K)
    p['conv2_w'] = u((64, 32, K), 32 * K);    p['conv2_b'] = u((64,), 32 * K)
    p['proj2_w'] = u((64, 32, 1), 32);        p['proj2_b'] = u((64,), 32)
    p['conv3_w'] = u((128, 64, K), 64 * K);   p['conv3_b'] = u((128,), 64 * K)
    p['proj3_w'] = u((128, 64, 1), 64);       p['proj3_b'] = u((128,), 64)
    p['conv4_w'] = u((256, 128, K), 128 * K); p['conv4_b'] = u((256,), 128 * K)
    p['proj4_w'] = u((256, 128, 1), 128);     p['proj4_b'] = u((256,), 128)
    p['c1_w'] = u((32, 4), 4);      p['c1_b'] = u((32,), 4)
    p['c2_w'] = u((64, 32), 32);    p['c2_b'] = u((64,), 32)
    p['c3_w'] = u((128, 64), 64);   p['c3_b'] = u((128,), 64)
    p['m1_w'] = u((12, 24), 24);    p['m1_b'] = u((12,), 24)
    p['m2_w'] = u((1, 12), 12);     p['m2_b'] = u((1,), 12)
    p['f1_w'] = u((128, 384), 384); p['f1_b'] = u((128,), 384)
    p['f2_w'] = u((64, 128), 128);  p['f2_b'] = u((64,), 128)
    p['f3_w'] = u((1, 64), 64);     p['f3_b'] = u((1,), 64)
    return p


def pack_kernel_params(p):
    K = KERNEL_LEN
    pad = K // 2

    def conv_pack(w, b, proj_w=None, proj_b=None):
        w = np.asarray(w, np.float32).copy()
        b = np.asarray(b, np.float32).copy()
        if proj_w is not None:                    # fold 1x1 proj into centre tap
            w[:, :, pad] += np.asarray(proj_w, np.float32)[:, :, 0]
            b += np.asarray(proj_b, np.float32)
        cout, cin, _ = w.shape
        wt = np.transpose(w, (2, 1, 0)).reshape(K * cin, cout)   # (K*Cin, Cout)
        return wt, b

    w1, b1 = conv_pack(p['conv1_w'], p['conv1_b'])
    w2, b2 = conv_pack(p['conv2_w'], p['conv2_b'], p['proj2_w'], p['proj2_b'])
    w3, b3 = conv_pack(p['conv3_w'], p['conv3_b'], p['proj3_w'], p['proj3_b'])
    w4, b4 = conv_pack(p['conv4_w'], p['conv4_b'], p['proj4_w'], p['proj4_b'])

    # f32 bias slab: one bias per row; mixer biases stored as columns.
    bias_slab = np.zeros((32, 256), np.float32)
    for r, b in enumerate([b1, b2, b3, b4, p['c1_b'], p['c2_b'], p['c3_b'],
                           p['f1_b'], p['f2_b'], p['f3_b']]):
        b = np.asarray(b, np.float32)
        bias_slab[r, :b.shape[0]] = b
    bias_slab[16:28, 0] = np.asarray(p['m1_b'], np.float32)
    bias_slab[28, 0] = np.asarray(p['m2_b'], np.float32)[0]

    # bf16 slab with every small matrix at 16-row-aligned offsets.
    slab = np.zeros((SMALL_ROWS, 128), np.float32)

    def put(r, m):
        m = np.asarray(m, np.float32)
        slab[r:r + m.shape[0], :m.shape[1]] = m

    put(OFF_C1, np.asarray(p['c1_w']).T)          # (4, 32)
    put(OFF_C2, np.asarray(p['c2_w']).T)          # (32, 64)
    put(OFF_C3, np.asarray(p['c3_w']).T)          # (64, 128)
    put(OFF_F1, np.asarray(p['f1_w']).T)          # (384, 128)
    put(OFF_F2, np.asarray(p['f2_w']).T)          # (128, 64)
    put(OFF_F3, np.asarray(p['f3_w']).T)          # (64, 1)
    put(OFF_M1, np.asarray(p['m1_w']))            # (12, 24)
    put(OFF_M2, np.asarray(p['m2_w']))            # (1, 12)

    bf = jnp.bfloat16
    return [jnp.asarray(w1, bf), jnp.asarray(w2, bf),
            jnp.asarray(w3, bf), jnp.asarray(w4, bf),
            jnp.asarray(slab, bf), jnp.asarray(bias_slab, jnp.float32)]


# ------------------------- pure-JAX reference model -------------------------

def reference(p, time, speed, hr, general):
    K = KERNEL_LEN
    pad = K // 2

    def conv(x, w, b, padw):
        y = lax.conv_general_dilated(
            x, w, window_strides=(1,), padding=[(padw, padw)],
            dimension_numbers=('NCH', 'OIH', 'NCH'))
        return y + b[None, :, None]

    def maxpool(x):
        bb, cc, ll = x.shape
        return jnp.max(x.reshape(bb, cc, ll // 2, 2), axis=-1)

    def relu(x):
        return jnp.maximum(x, 0.0)

    def lin(x, w, b):
        return jnp.dot(x, w.T) + b

    def backbone(x):
        h = maxpool(relu(conv(x, p['conv1_w'], p['conv1_b'], pad) + x))
        h = maxpool(relu(conv(h, p['conv2_w'], p['conv2_b'], pad)
                         + conv(h, p['proj2_w'], p['proj2_b'], 0)))
        h = maxpool(relu(conv(h, p['conv3_w'], p['conv3_b'], pad)
                         + conv(h, p['proj3_w'], p['proj3_b'], 0)))
        return relu(conv(h, p['conv4_w'], p['conv4_b'], pad)
                    + conv(h, p['proj4_w'], p['proj4_b'], 0))

    g = relu(lin(general, p['c1_w'], p['c1_b']))
    g = relu(lin(g, p['c2_w'], p['c2_b']))
    g = relu(lin(g, p['c3_w'], p['c3_b']))

    x = jnp.concatenate([backbone(time), backbone(speed), backbone(hr)], axis=2)
    x = relu(lin(x, p['m1_w'], p['m1_b']))
    x = relu(lin(x, p['m2_w'], p['m2_b'])).squeeze(-1)
    x = jnp.concatenate([x, g], axis=1)
    x = relu(lin(x, p['f1_w'], p['f1_b']))
    x = relu(lin(x, p['f2_w'], p['f2_b']))
    x = lin(x, p['f3_w'], p['f3_b'])
    return x.squeeze(1)


# ----------------------------------- main -----------------------------------

if __name__ == "__main__":
    key = jax.random.PRNGKey(0)
    kp, kt, ks, kh, kg = jax.random.split(key, 5)
    params = init_params(kp)

    time = jax.random.normal(kt, (B, 1, L), jnp.float32)
    speed = jax.random.normal(ks, (B, 1, L), jnp.float32)
    hr = jax.random.normal(kh, (B, 1, L), jnp.float32)
    general = jax.random.normal(kg, (B, 4), jnp.float32)

    kparams = pack_kernel_params(params)
    forward = make_model(kparams, B, L)

    out = jax.block_until_ready(forward(time, speed, hr, general))
    ref = jax.block_until_ready(reference(params, time, speed, hr, general))

    if not np.allclose(np.asarray(out), np.asarray(ref), rtol=2e-2, atol=2e-2):
        raise AssertionError(f"mismatch: pallas={out} ref={ref}")
    print("KERNEL_OK")
</pallas_src>

<mosaic_0001>
module attributes {stable_mosaic.version = 11 : i64} {
  func.func @kernel(%arg0: i32, %arg1: memref<1x192x1xf32, #tpu.memory_space<vmem>>, %arg2: memref<1x1x4xf32, #tpu.memory_space<vmem>>, %arg3: memref<5x32xbf16, #tpu.memory_space<vmem>>, %arg4: memref<160x64xbf16, #tpu.memory_space<vmem>>, %arg5: memref<320x128xbf16, #tpu.memory_space<vmem>>, %arg6: memref<640x256xbf16, #tpu.memory_space<vmem>>, %arg7: memref<720x128xbf16, #tpu.memory_space<vmem>>, %arg8: memref<32x256xf32, #tpu.memory_space<vmem>>, %arg9: memref<1x1x1xf32, #tpu.memory_space<vmem>>, %arg10: memref<192x32xf32, #tpu.memory_space<vmem>>, %arg11: memref<96x64xf32, #tpu.memory_space<vmem>>, %arg12: memref<48x128xf32, #tpu.memory_space<vmem>>) attributes {dimension_semantics = [#tpu.dimension_semantics<parallel>], iteration_bounds = array<i64: 2>, scalar_prefetch = 0 : i64, scratch_operands = 3 : i64, tpu.core_type = #tpu.core_type<tc>, window_params = [{transform_indices = @transform_0, window_bounds = array<i64: 1, 192, 1>}, {transform_indices = @transform_1, window_bounds = array<i64: 1, 1, 4>}, {pipeline_mode = #tpu.pipeline_mode<synchronous>, transform_indices = @transform_2, window_bounds = array<i64: 5, 32>}, {pipeline_mode = #tpu.pipeline_mode<synchronous>, transform_indices = @transform_3, window_bounds = array<i64: 160, 64>}, {pipeline_mode = #tpu.pipeline_mode<synchronous>, transform_indices = @transform_4, window_bounds = array<i64: 320, 128>}, {pipeline_mode = #tpu.pipeline_mode<synchronous>, transform_indices = @transform_5, window_bounds = array<i64: 640, 256>}, {pipeline_mode = #tpu.pipeline_mode<synchronous>, transform_indices = @transform_6, window_bounds = array<i64: 720, 128>}, {pipeline_mode = #tpu.pipeline_mode<synchronous>, transform_indices = @transform_7, window_bounds = array<i64: 32, 256>}, {transform_indices = @transform_8, window_bounds = array<i64: 1, 1, 1>}]} {
    %c0 = arith.constant 0 : index
    %c0_0 = arith.constant 0 : index
    %c0_1 = arith.constant 0 : index
    %0 = vector.load %arg1[%c0, %c0_0, %c0_1] : memref<1x192x1xf32, #tpu.memory_space<vmem>>, vector<1x192x1xf32>
    %1 = vector.shape_cast %0 : vector<1x192x1xf32> to vector<192x1xf32>
    %c0_2 = arith.constant 0 : index
    %c0_3 = arith.constant 0 : index
    %2 = vector.load %arg3[%c0_2, %c0_3] : memref<5x32xbf16, #tpu.memory_space<vmem>>, vector<5x32xbf16>
    %c0_4 = arith.constant 0 : index
    %c0_5 = arith.constant 0 : index
    %3 = vector.load %arg8[%c0_4, %c0_5] : memref<32x256xf32, #tpu.memory_space<vmem>>, vector<1x32xf32>
    %4 = tpu.iota {dimensions = array<i32: 0>} : vector<192x1xi32>
    %c63_i32 = arith.constant 63 : i32
    %5 = vector.broadcast %c63_i32 : i32 to vector<192x1xi32>
    %6 = arith.andi %4, %5 : vector<192x1xi32>
    %cst = arith.constant 0.000000e+00 : f32
    %7 = vector.broadcast %cst : f32 to vector<192x32xf32>
    %c2_i32 = arith.constant 2 : i32
    %8 = tpu.dynamic_rotate %1 by %c2_i32 dim 0 : vector<192x1xf32>, i32 -> vector<192x1xf32>
    %c-2_i32 = arith.constant -2 : i32
    %9 = vector.broadcast %c-2_i32 : i32 to vector<192x1xi32>
    %10 = arith.addi %6, %9 : vector<192x1xi32>
    %c0_i32 = arith.constant 0 : i32
    %11 = vector.broadcast %c0_i32 : i32 to vector<192x1xi32>
    %12 = arith.cmpi sge, %10, %11 : vector<192x1xi32>
    %c-2_i32_6 = arith.constant -2 : i32
    %13 = vector.broadcast %c-2_i32_6 : i32 to vector<192x1xi32>
    %14 = arith.addi %6, %13 : vector<192x1xi32>
    %c64_i32 = arith.constant 64 : i32
    %15 = vector.broadcast %c64_i32 : i32 to vector<192x1xi32>
    %16 = arith.cmpi slt, %14, %15 : vector<192x1xi32>
    %17 = arith.andi %12, %16 : vector<192x1xi1>
    %cst_7 = arith.constant 0.000000e+00 : f32
    %18 = vector.broadcast %cst_7 : f32 to vector<192x1xf32>
    %19 = arith.select %17, %8, %18 : vector<192x1xi1>, vector<192x1xf32>
    %20 = vector.extract_strided_slice %2 {offsets = [0, 0], sizes = [1, 32], strides = [1, 1]} : vector<5x32xbf16> to vector<1x32xbf16>
    %21 = arith.extf %20 : vector<1x32xbf16> to vector<1x32xf32>
    %22 = vector.broadcast %19 : vector<192x1xf32> to vector<192x32xf32>
    %23 = vector.broadcast %21 : vector<1x32xf32> to vector<192x32xf32>
    %24 = arith.mulf %22, %23 : vector<192x32xf32>
    %25 = arith.addf %7, %24 : vector<192x32xf32>
    %c1_i32 = arith.constant 1 : i32
    %26 = tpu.dynamic_rotate %1 by %c1_i32 dim 0 : vector<192x1xf32>, i32 -> vector<192x1xf32>
    %c-1_i32 = arith.constant -1 : i32
    %27 = vector.broadcast %c-1_i32 : i32 to vector<192x1xi32>
    %28 = arith.addi %6, %27 : vector<192x1xi32>
    %c0_i32_8 = arith.constant 0 : i32
    %29 = vector.broadcast %c0_i32_8 : i32 to vector<192x1xi32>
    %30 = arith.cmpi sge, %28, %29 : vector<192x1xi32>
    %c-1_i32_9 = arith.constant -1 : i32
    %31 = vector.broadcast %c-1_i32_9 : i32 to vector<192x1xi32>
    %32 = arith.addi %6, %31 : vector<192x1xi32>
    %c64_i32_10 = arith.constant 64 : i32
    %33 = vector.broadcast %c64_i32_10 : i32 to vector<192x1xi32>
    %34 = arith.cmpi slt, %32, %33 : vector<192x1xi32>
    %35 = arith.andi %30, %34 : vector<192x1xi1>
    %cst_11 = arith.constant 0.000000e+00 : f32
    %36 = vector.broadcast %cst_11 : f32 to vector<192x1xf32>
    %37 = arith.select %35, %26, %36 : vector<192x1xi1>, vector<192x1xf32>
    %38 = vector.extract_strided_slice %2 {offsets = [1, 0], sizes = [1, 32], strides = [1, 1]} : vector<5x32xbf16> to vector<1x32xbf16>
    %39 = arith.extf %38 : vector<1x32xbf16> to vector<1x32xf32>
    %40 = vector.broadcast %37 : vector<192x1xf32> to vector<192x32xf32>
    %41 = vector.broadcast %39 : vector<1x32xf32> to vector<192x32xf32>
    %42 = arith.mulf %40, %41 : vector<192x32xf32>
    %43 = arith.addf %25, %42 : vector<192x32xf32>
    %44 = vector.extract_strided_slice %2 {offsets = [2, 0], sizes = [1, 32], strides = [1, 1]} : vector<5x32xbf16> to vector<1x32xbf16>
    %45 = arith.extf %44 : vector<1x32xbf16> to vector<1x32xf32>
    %46 = vector.broadcast %1 : vector<192x1xf32> to vector<192x32xf32>
    %47 = vector.broadcast %45 : vector<1x32xf32> to vector<192x32xf32>
    %48 = arith.mulf %46, %47 : vector<192x32xf32>
    %49 = arith.addf %43, %48 : vector<192x32xf32>
    %c191_i32 = arith.constant 191 : i32
    %50 = tpu.dynamic_rotate %1 by %c191_i32 dim 0 : vector<192x1xf32>, i32 -> vector<192x1xf32>
    %c1_i32_12 = arith.constant 1 : i32
    %51 = vector.broadcast %c1_i32_12 : i32 to vector<192x1xi32>
    %52 = arith.addi %6, %51 : vector<192x1xi32>
    %c0_i32_13 = arith.constant 0 : i32
    %53 = vector.broadcast %c0_i32_13 : i32 to vector<192x1xi32>
    %54 = arith.cmpi sge, %52, %53 : vector<192x1xi32>
    %c1_i32_14 = arith.constant 1 : i32
    %55 = vector.broadcast %c1_i32_14 : i32 to vector<192x1xi32>
    %56 = arith.addi %6, %55 : vector<192x1xi32>
    %c64_i32_15 = arith.constant 64 : i32
    %57 = vector.broadcast %c64_i32_15 : i32 to vector<192x1xi32>
    %58 = arith.cmpi slt, %56, %57 : vector<192x1xi32>
    %59 = arith.andi %54, %58 : vector<192x1xi1>
    %cst_16 = arith.constant 0.000000e+00 : f32
    %60 = vector.broadcast %cst_16 : f32 to vector<192x1xf32>
    %61 = arith.select %59, %50, %60 : vector<192x1xi1>, vector<192x1xf32>
    %62 = vector.extract_strided_slice %2 {offsets = [3, 0], sizes = [1, 32], strides = [1, 1]} : vector<5x32xbf16> to vector<1x32xbf16>
    %63 = arith.extf %62 : vector<1x32xbf16> to vector<1x32xf32>
    %64 = vector.broadcast %61 : vector<192x1xf32> to vector<192x32xf32>
    %65 = vector.broadcast %63 : vector<1x32xf32> to vector<192x32xf32>
    %66 = arith.mulf %64, %65 : vector<192x32xf32>
    %67 = arith.addf %49, %66 : vector<192x32xf32>
    %c190_i32 = arith.constant 190 : i32
    %68 = tpu.dynamic_rotate %1 by %c190_i32 dim 0 : vector<192x1xf32>, i32 -> vector<192x1xf32>
    %c2_i32_17 = arith.constant 2 : i32
    %69 = vector.broadcast %c2_i32_17 : i32 to vector<192x1xi32>
    %70 = arith.addi %6, %69 : vector<192x1xi32>
    %c0_i32_18 = arith.constant 0 : i32
    %71 = vector.broadcast %c0_i32_18 : i32 to vector<192x1xi32>
    %72 = arith.cmpi sge, %70, %71 : vector<192x1xi32>
    %c2_i32_19 = arith.constant 2 : i32
    %73 = vector.broadcast %c2_i32_19 : i32 to vector<192x1xi32>
    %74 = arith.addi %6, %73 : vector<192x1xi32>
    %c64_i32_20 = arith.constant 64 : i32
    %75 = vector.broadcast %c64_i32_20 : i32 to vector<192x1xi32>
    %76 = arith.cmpi slt, %74, %75 : vector<192x1xi32>
    %77 = arith.andi %72, %76 : vector<192x1xi1>
    %cst_21 = arith.constant 0.000000e+00 : f32
    %78 = vector.broadcast %cst_21 : f32 to vector<192x1xf32>
    %79 = arith.select %77, %68, %78 : vector<192x1xi1>, vector<192x1xf32>
    %80 = vector.extract_strided_slice %2 {offsets = [4, 0], sizes = [1, 32], strides = [1, 1]} : vector<5x32xbf16> to vector<1x32xbf16>
    %81 = arith.extf %80 : vector<1x32xbf16> to vector<1x32xf32>
    %82 = vector.broadcast %79 : vector<192x1xf32> to vector<192x32xf32>
    %83 = vector.broadcast %81 : vector<1x32xf32> to vector<192x32xf32>
    %84 = arith.mulf %82, %83 : vector<192x32xf32>
    %85 = arith.addf %67, %84 : vector<192x32xf32>
    %86 = vector.broadcast %3 : vector<1x32xf32> to vector<192x32xf32>
    %87 = arith.addf %85, %86 : vector<192x32xf32>
    %88 = vector.broadcast %1 : vector<192x1xf32> to vector<192x32xf32>
    %89 = arith.addf %87, %88 : vector<192x32xf32>
    %cst_22 = arith.constant 0.000000e+00 : f32
    %90 = vector.broadcast %cst_22 : f32 to vector<192x32xf32>
    %91 = arith.maximumf %89, %90 : vector<192x32xf32>
    %c191_i32_23 = arith.constant 191 : i32
    %92 = tpu.dynamic_rotate %91 by %c191_i32_23 dim 0 : vector<192x32xf32>, i32 -> vector<192x32xf32>
    %93 = arith.maximumf %91, %92 : vector<192x32xf32>
    %c0_24 = arith.constant 0 : index
    %c0_25 = arith.constant 0 : index
    %94 = vector.load %arg10[%c0_24, %c0_25] : memref<192x32xf32, #tpu.memory_space<vmem>>, vector<192x32xf32>
    tpu.vector_store %arg10[%c0_24, %c0_25], %93 {strides = array<i32>} : memref<192x32xf32, #tpu.memory_space<vmem>>, vector<192x32xf32>,
    %c0_26 = arith.constant 0 : index
    %c0_27 = arith.constant 0 : index
    %95 = tpu.strided_load %arg10[%c0_26, %c0_27] {strides = array<i32: 2, 1>} : memref<192x32xf32, #tpu.memory_space<vmem>>, vector<96x32xf32>
    %c0_28 = arith.constant 0 : index
    %c0_29 = arith.constant 0 : index
    %96 = vector.load %arg4[%c0_28, %c0_29] : memref<160x64xbf16, #tpu.memory_space<vmem>>, vector<160x64xbf16>
    %c1 = arith.constant 1 : index
    %c0_30 = arith.constant 0 : index
    %97 = vector.load %arg8[%c1, %c0_30] : memref<32x256xf32, #tpu.memory_space<vmem>>, vector<1x64xf32>
    %98 = tpu.iota {dimensions = array<i32: 0>} : vector<96x1xi32>
    %c31_i32 = arith.constant 31 : i32
    %99 = vector.broadcast %c31_i32 : i32 to vector<96x1xi32>
    %100 = arith.andi %98, %99 : vector<96x1xi32>
    %c2_i32_31 = arith.constant 2 : i32
    %101 = tpu.dynamic_rotate %95 by %c2_i32_31 dim 0 : vector<96x32xf32>, i32 -> vector<96x32xf32>
    %c-2_i32_32 = arith.constant -2 : i32
    %102 = vector.broadcast %c-2_i32_32 : i32 to vector<96x1xi32>
    %103 = arith.addi %100, %102 : vector<96x1xi32>
    %c0_i32_33 = arith.constant 0 : i32
    %104 = vector.broadcast %c0_i32_33 : i32 to vector<96x1xi32>
    %105 = arith.cmpi sge, %103, %104 : vector<96x1xi32>
    %c-2_i32_34 = arith.constant -2 : i32
    %106 = vector.broadcast %c-2_i32_34 : i32 to vector<96x1xi32>
    %107 = arith.addi %100, %106 : vector<96x1xi32>
    %c32_i32 = arith.constant 32 : i32
    %108 = vector.broadcast %c32_i32 : i32 to vector<96x1xi32>
    %109 = arith.cmpi slt, %107, %108 : vector<96x1xi32>
    %110 = arith.andi %105, %109 : vector<96x1xi1>
    %cst_35 = arith.constant 0.000000e+00 : f32
    %111 = vector.shape_cast %110 : vector<96x1xi1> to vector<96x1xi1>
    %112 = vector.broadcast %111 : vector<96x1xi1> to vector<96x32xi1>
    %113 = vector.broadcast %cst_35 : f32 to vector<96x32xf32>
    %114 = arith.select %112, %101, %113 : vector<96x32xi1>, vector<96x32xf32>
    %c1_i32_36 = arith.constant 1 : i32
    %115 = tpu.dynamic_rotate %95 by %c1_i32_36 dim 0 : vector<96x32xf32>, i32 -> vector<96x32xf32>
    %c-1_i32_37 = arith.constant -1 : i32
    %116 = vector.broadcast %c-1_i32_37 : i32 to vector<96x1xi32>
    %117 = arith.addi %100, %116 : vector<96x1xi32>
    %c0_i32_38 = arith.constant 0 : i32
    %118 = vector.broadcast %c0_i32_38 : i32 to vector<96x1xi32>
    %119 = arith.cmpi sge, %117, %118 : vector<96x1xi32>
    %c-1_i32_39 = arith.constant -1 : i32
    %120 = vector.broadcast %c-1_i32_39 : i32 to vector<96x1xi32>
    %121 = arith.addi %100, %120 : vector<96x1xi32>
    %c32_i32_40 = arith.constant 32 : i32
    %122 = vector.broadcast %c32_i32_40 : i32 to vector<96x1xi32>
    %123 = arith.cmpi slt, %121, %122 : vector<96x1xi32>
    %124 = arith.andi %119, %123 : vector<96x1xi1>
    %cst_41 = arith.constant 0.000000e+00 : f32
    %125 = vector.shape_cast %124 : vector<96x1xi1> to vector<96x1xi1>
    %126 = vector.broadcast %125 : vector<96x1xi1> to vector<96x32xi1>
    %127 = vector.broadcast %cst_41 : f32 to vector<96x32xf32>
    %128 = arith.select %126, %115, %127 : vector<96x32xi1>, vector<96x32xf32>
    %c95_i32 = arith.constant 95 : i32
    %129 = tpu.dynamic_rotate %95 by %c95_i32 dim 0 : vector<96x32xf32>, i32 -> vector<96x32xf32>
    %c1_i32_42 = arith.constant 1 : i32
    %130 = vector.broadcast %c1_i32_42 : i32 to vector<96x1xi32>
    %131 = arith.addi %100, %130 : vector<96x1xi32>
    %c0_i32_43 = arith.constant 0 : i32
    %132 = vector.broadcast %c0_i32_43 : i32 to vector<96x1xi32>
    %133 = arith.cmpi sge, %131, %132 : vector<96x1xi32>
    %c1_i32_44 = arith.constant 1 : i32
    %134 = vector.broadcast %c1_i32_44 : i32 to vector<96x1xi32>
    %135 = arith.addi %100, %134 : vector<96x1xi32>
    %c32_i32_45 = arith.constant 32 : i32
    %136 = vector.broadcast %c32_i32_45 : i32 to vector<96x1xi32>
    %137 = arith.cmpi slt, %135, %136 : vector<96x1xi32>
    %138 = arith.andi %133, %137 : vector<96x1xi1>
    %cst_46 = arith.constant 0.000000e+00 : f32
    %139 = vector.shape_cast %138 : vector<96x1xi1> to vector<96x1xi1>
    %140 = vector.broadcast %139 : vector<96x1xi1> to vector<96x32xi1>
    %141 = vector.broadcast %cst_46 : f32 to vector<96x32xf32>
    %142 = arith.select %140, %129, %141 : vector<96x32xi1>, vector<96x32xf32>
    %c94_i32 = arith.constant 94 : i32
    %143 = tpu.dynamic_rotate %95 by %c94_i32 dim 0 : vector<96x32xf32>, i32 -> vector<96x32xf32>
    %c2_i32_47 = arith.constant 2 : i32
    %144 = vector.broadcast %c2_i32_47 : i32 to vector<96x1xi32>
    %145 = arith.addi %100, %144 : vector<96x1xi32>
    %c0_i32_48 = arith.constant 0 : i32
    %146 = vector.broadcast %c0_i32_48 : i32 to vector<96x1xi32>
    %147 = arith.cmpi sge, %145, %146 : vector<96x1xi32>
    %c2_i32_49 = arith.constant 2 : i32
    %148 = vector.broadcast %c2_i32_49 : i32 to vector<96x1xi32>
    %149 = arith.addi %100, %148 : vector<96x1xi32>
    %c32_i32_50 = arith.constant 32 : i32
    %150 = vector.broadcast %c32_i32_50 : i32 to vector<96x1xi32>
    %151 = arith.cmpi slt, %149, %150 : vector<96x1xi32>
    %152 = arith.andi %147, %151 : vector<96x1xi1>
    %cst_51 = arith.constant 0.000000e+00 : f32
    %153 = vector.shape_cast %152 : vector<96x1xi1> to vector<96x1xi1>
    %154 = vector.broadcast %153 : vector<96x1xi1> to vector<96x32xi1>
    %155 = vector.broadcast %cst_51 : f32 to vector<96x32xf32>
    %156 = arith.select %154, %143, %155 : vector<96x32xi1>, vector<96x32xf32>
    %157 = tpu.concatenate %114, %128, %95, %142, %156 in 1 : vector<96x32xf32>, vector<96x32xf32>, vector<96x32xf32>, vector<96x32xf32>, vector<96x32xf32> -> vector<96x160xf32>
    %158 = arith.truncf %157 : vector<96x160xf32> to vector<96x160xbf16>
    %cst_52 = arith.constant dense<0.000000e+00> : vector<96x64xf32>
    %159 = tpu.matmul %158, %96, %cst_52 {dimension_numbers = #tpu.dot_dimension_numbers<[1], [0], [0], [1], [0, 0, 1, 1], [], []>} : vector<96x160xbf16>, vector<160x64xbf16>, vector<96x64xf32> -> vector<96x64xf32>
    %160 = vector.broadcast %97 : vector<1x64xf32> to vector<96x64xf32>
    %161 = arith.addf %159, %160 : vector<96x64xf32>
    %cst_53 = arith.constant 0.000000e+00 : f32
    %162 = vector.broadcast %cst_53 : f32 to vector<96x64xf32>
    %163 = arith.maximumf %161, %162 : vector<96x64xf32>
    %c95_i32_54 = arith.constant 95 : i32
    %164 = tpu.dynamic_rotate %163 by %c95_i32_54 dim 0 : vector<96x64xf32>, i32 -> vector<96x64xf32>
    %165 = arith.maximumf %163, %164 : vector<96x64xf32>
    %c0_55 = arith.constant 0 : index
    %c0_56 = arith.constant 0 : index
    %166 = vector.load %arg11[%c0_55, %c0_56] : memref<96x64xf32, #tpu.memory_space<vmem>>, vector<96x64xf32>
    tpu.vector_store %arg11[%c0_55, %c0_56], %165 {strides = array<i32>} : memref<96x64xf32, #tpu.memory_space<vmem>>, vector<96x64xf32>,
    %c0_57 = arith.constant 0 : index
    %c0_58 = arith.constant 0 : index
    %167 = tpu.strided_load %arg11[%c0_57, %c0_58] {strides = array<i32: 2, 1>} : memref<96x64xf32, #tpu.memory_space<vmem>>, vector<48x64xf32>
    %c0_59 = arith.constant 0 : index
    %c0_60 = arith.constant 0 : index
    %168 = vector.load %arg5[%c0_59, %c0_60] : memref<320x128xbf16, #tpu.memory_space<vmem>>, vector<320x128xbf16>
    %c2 = arith.constant 2 : index
    %c0_61 = arith.constant 0 : index
    %169 = vector.load %arg8[%c2, %c0_61] : memref<32x256xf32, #tpu.memory_space<vmem>>, vector<1x128xf32>
    %170 = tpu.iota {dimensions = array<i32: 0>} : vector<48x1xi32>
    %c15_i32 = arith.constant 15 : i32
    %171 = vector.broadcast %c15_i32 : i32 to vector<48x1xi32>
    %172 = arith.andi %170, %171 : vector<48x1xi32>
    %c2_i32_62 = arith.constant 2 : i32
    %173 = tpu.dynamic_rotate %167 by %c2_i32_62 dim 0 : vector<48x64xf32>, i32 -> vector<48x64xf32>
    %c-2_i32_63 = arith.constant -2 : i32
    %174 = vector.broadcast %c-2_i32_63 : i32 to vector<48x1xi32>
    %175 = arith.addi %172, %174 : vector<48x1xi32>
    %c0_i32_64 = arith.constant 0 : i32
    %176 = vector.broadcast %c0_i32_64 : i32 to vector<48x1xi32>
    %177 = arith.cmpi sge, %175, %176 : vector<48x1xi32>
    %c-2_i32_65 = arith.constant -2 : i32
    %178 = vector.broadcast %c-2_i32_65 : i32 to vector<48x1xi32>
    %179 = arith.addi %172, %178 : vector<48x1xi32>
    %c16_i32 = arith.constant 16 : i32
    %180 = vector.broadcast %c16_i32 : i32 to vector<48x1xi32>
    %181 = arith.cmpi slt, %179, %180 : vector<48x1xi32>
    %182 = arith.andi %177, %181 : vector<48x1xi1>
    %cst_66 = arith.constant 0.000000e+00 : f32
    %183 = vector.shape_cast %182 : vector<48x1xi1> to vector<48x1xi1>
    %184 = vector.broadcast %183 : vector<48x1xi1> to vector<48x64xi1>
    %185 = vector.broadcast %cst_66 : f32 to vector<48x64xf32>
    %186 = arith.select %184, %173, %185 : vector<48x64xi1>, vector<48x64xf32>
    %c1_i32_67 = arith.constant 1 : i32
    %187 = tpu.dynamic_rotate %167 by %c1_i32_67 dim 0 : vector<48x64xf32>, i32 -> vector<48x64xf32>
    %c-1_i32_68 = arith.constant -1 : i32
    %188 = vector.broadcast %c-1_i32_68 : i32 to vector<48x1xi32>
    %189 = arith.addi %172, %188 : vector<48x1xi32>
    %c0_i32_69 = arith.constant 0 : i32
    %190 = vector.broadcast %c0_i32_69 : i32 to vector<48x1xi32>
    %191 = arith.cmpi sge, %189, %190 : vector<48x1xi32>
    %c-1_i32_70 = arith.constant -1 : i32
    %192 = vector.broadcast %c-1_i32_70 : i32 to vector<48x1xi32>
    %193 = arith.addi %172, %192 : vector<48x1xi32>
    %c16_i32_71 = arith.constant 16 : i32
    %194 = vector.broadcast %c16_i32_71 : i32 to vector<48x1xi32>
    %195 = arith.cmpi slt, %193, %194 : vector<48x1xi32>
    %196 = arith.andi %191, %195 : vector<48x1xi1>
    %cst_72 = arith.constant 0.000000e+00 : f32
    %197 = vector.shape_cast %196 : vector<48x1xi1> to vector<48x1xi1>
    %198 = vector.broadcast %197 : vector<48x1xi1> to vector<48x64xi1>
    %199 = vector.broadcast %cst_72 : f32 to vector<48x64xf32>
    %200 = arith.select %198, %187, %199 : vector<48x64xi1>, vector<48x64xf32>
    %c47_i32 = arith.constant 47 : i32
    %201 = tpu.dynamic_rotate %167 by %c47_i32 dim 0 : vector<48x64xf32>, i32 -> vector<48x64xf32>
    %c1_i32_73 = arith.constant 1 : i32
    %202 = vector.broadcast %c1_i32_73 : i32 to vector<48x1xi32>
    %203 = arith.addi %172, %202 : vector<48x1xi32>
    %c0_i32_74 = arith.constant 0 : i32
    %204 = vector.broadcast %c0_i32_74 : i32 to vector<48x1xi32>
    %205 = arith.cmpi sge, %203, %204 : vector<48x1xi32>
    %c1_i32_75 = arith.constant 1 : i32
    %206 = vector.broadcast %c1_i32_75 : i32 to vector<48x1xi32>
    %207 = arith.addi %172, %206 : vector<48x1xi32>
    %c16_i32_76 = arith.constant 16 : i32
    %208 = vector.broadcast %c16_i32_76 : i32 to vector<48x1xi32>
    %209 = arith.cmpi slt, %207, %208 : vector<48x1xi32>
    %210 = arith.andi %205, %209 : vector<48x1xi1>
    %cst_77 = arith.constant 0.000000e+00 : f32
    %211 = vector.shape_cast %210 : vector<48x1xi1> to vector<48x1xi1>
    %212 = vector.broadcast %211 : vector<48x1xi1> to vector<48x64xi1>
    %213 = vector.broadcast %cst_77 : f32 to vector<48x64xf32>
    %214 = arith.select %212, %201, %213 : vector<48x64xi1>, vector<48x64xf32>
    %c46_i32 = arith.constant 46 : i32
    %215 = tpu.dynamic_rotate %167 by %c46_i32 dim 0 : vector<48x64xf32>, i32 -> vector<48x64xf32>
    %c2_i32_78 = arith.constant 2 : i32
    %216 = vector.broadcast %c2_i32_78 : i32 to vector<48x1xi32>
    %217 = arith.addi %172, %216 : vector<48x1xi32>
    %c0_i32_79 = arith.constant 0 : i32
    %218 = vector.broadcast %c0_i32_79 : i32 to vector<48x1xi32>
    %219 = arith.cmpi sge, %217, %218 : vector<48x1xi32>
    %c2_i32_80 = arith.constant 2 : i32
    %220 = vector.broadcast %c2_i32_80 : i32 to vector<48x1xi32>
    %221 = arith.addi %172, %220 : vector<48x1xi32>
    %c16_i32_81 = arith.constant 16 : i32
    %222 = vector.broadcast %c16_i32_81 : i32 to vector<48x1xi32>
    %223 = arith.cmpi slt, %221, %222 : vector<48x1xi32>
    %224 = arith.andi %219, %223 : vector<48x1xi1>
    %cst_82 = arith.constant 0.000000e+00 : f32
    %225 = vector.shape_cast %224 : vector<48x1xi1> to vector<48x1xi1>
    %226 = vector.broadcast %225 : vector<48x1xi1> to vector<48x64xi1>
    %227 = vector.broadcast %cst_82 : f32 to vector<48x64xf32>
    %228 = arith.select %226, %215, %227 : vector<48x64xi1>, vector<48x64xf32>
    %229 = tpu.concatenate %186, %200, %167, %214, %228 in 1 : vector<48x64xf32>, vector<48x64xf32>, vector<48x64xf32>, vector<48x64xf32>, vector<48x64xf32> -> vector<48x320xf32>
    %230 = arith.truncf %229 : vector<48x320xf32> to vector<48x320xbf16>
    %cst_83 = arith.constant dense<0.000000e+00> : vector<48x128xf32>
    %231 = tpu.matmul %230, %168, %cst_83 {dimension_numbers = #tpu.dot_dimension_numbers<[1], [0], [0], [1], [0, 0, 1, 1], [], []>} : vector<48x320xbf16>, vector<320x128xbf16>, vector<48x128xf32> -> vector<48x128xf32>
    %232 = vector.broadcast %169 : vector<1x128xf32> to vector<48x128xf32>
    %233 = arith.addf %231, %232 : vector<48x128xf32>
    %cst_84 = arith.constant 0.000000e+00 : f32
    %234 = vector.broadcast %cst_84 : f32 to vector<48x128xf32>
    %235 = arith.maximumf %233, %234 : vector<48x128xf32>
    %c47_i32_85 = arith.constant 47 : i32
    %236 = tpu.dynamic_rotate %235 by %c47_i32_85 dim 0 : vector<48x128xf32>, i32 -> vector<48x128xf32>
    %237 = arith.maximumf %235, %236 : vector<48x128xf32>
    %c0_86 = arith.constant 0 : index
    %c0_87 = arith.constant 0 : index
    %238 = vector.load %arg12[%c0_86, %c0_87] : memref<48x128xf32, #tpu.memory_space<vmem>>, vector<48x128xf32>
    tpu.vector_store %arg12[%c0_86, %c0_87], %237 {strides = array<i32>} : memref<48x128xf32, #tpu.memory_space<vmem>>, vector<48x128xf32>,
    %c0_88 = arith.constant 0 : index
    %c0_89 = arith.constant 0 : index
    %239 = tpu.strided_load %arg12[%c0_88, %c0_89] {strides = array<i32: 2, 1>} : memref<48x128xf32, #tpu.memory_space<vmem>>, vector<24x128xf32>
    %c0_90 = arith.constant 0 : index
    %c0_91 = arith.constant 0 : index
    %240 = vector.load %arg6[%c0_90, %c0_91] : memref<640x256xbf16, #tpu.memory_space<vmem>>, vector<640x256xbf16>
    %c3 = arith.constant 3 : index
    %c0_92 = arith.constant 0 : index
    %241 = vector.load %arg8[%c3, %c0_92] : memref<32x256xf32, #tpu.memory_space<vmem>>, vector<1x256xf32>
    %242 = tpu.iota {dimensions = array<i32: 0>} : vector<24x1xi32>
    %c7_i32 = arith.constant 7 : i32
    %243 = vector.broadcast %c7_i32 : i32 to vector<24x1xi32>
    %244 = arith.andi %242, %243 : vector<24x1xi32>
    %c2_i32_93 = arith.constant 2 : i32
    %245 = tpu.dynamic_rotate %239 by %c2_i32_93 dim 0 : vector<24x128xf32>, i32 -> vector<24x128xf32>
    %c-2_i32_94 = arith.constant -2 : i32
    %246 = vector.broadcast %c-2_i32_94 : i32 to vector<24x1xi32>
    %247 = arith.addi %244, %246 : vector<24x1xi32>
    %c0_i32_95 = arith.constant 0 : i32
    %248 = vector.broadcast %c0_i32_95 : i32 to vector<24x1xi32>
    %249 = arith.cmpi sge, %247, %248 : vector<24x1xi32>
    %c-2_i32_96 = arith.constant -2 : i32
    %250 = vector.broadcast %c-2_i32_96 : i32 to vector<24x1xi32>
    %251 = arith.addi %244, %250 : vector<24x1xi32>
    %c8_i32 = arith.constant 8 : i32
    %252 = vector.broadcast %c8_i32 : i32 to vector<24x1xi32>
    %253 = arith.cmpi slt, %251, %252 : vector<24x1xi32>
    %254 = arith.andi %249, %253 : vector<24x1xi1>
    %cst_97 = arith.constant 0.000000e+00 : f32
    %255 = vector.shape_cast %254 : vector<24x1xi1> to vector<24x1xi1>
    %256 = vector.broadcast %255 : vector<24x1xi1> to vector<24x128xi1>
    %257 = vector.broadcast %cst_97 : f32 to vector<24x128xf32>
    %258 = arith.select %256, %245, %257 : vector<24x128xi1>, vector<24x128xf32>
    %c1_i32_98 = arith.constant 1 : i32
    %259 = tpu.dynamic_rotate %239 by %c1_i32_98 dim 0 : vector<24x128xf32>, i32 -> vector<24x128xf32>
    %c-1_i32_99 = arith.constant -1 : i32
    %260 = vector.broadcast %c-1_i32_99 : i32 to vector<24x1xi32>
    %261 = arith.addi %244, %260 : vector<24x1xi32>
    %c0_i32_100 = arith.constant 0 : i32
    %262 = vector.broadcast %c0_i32_100 : i32 to vector<24x1xi32>
    %263 = arith.cmpi sge, %261, %262 : vector<24x1xi32>
    %c-1_i32_101 = arith.constant -1 : i32
    %264 = vector.broadcast %c-1_i32_101 : i32 to vector<24x1xi32>
    %265 = arith.addi %244, %264 : vector<24x1xi32>
    %c8_i32_102 = arith.constant 8 : i32
    %266 = vector.broadcast %c8_i32_102 : i32 to vector<24x1xi32>
    %267 = arith.cmpi slt, %265, %266 : vector<24x1xi32>
    %268 = arith.andi %263, %267 : vector<24x1xi1>
    %cst_103 = arith.constant 0.000000e+00 : f32
    %269 = vector.shape_cast %268 : vector<24x1xi1> to vector<24x1xi1>
    %270 = vector.broadcast %269 : vector<24x1xi1> to vector<24x128xi1>
    %271 = vector.broadcast %cst_103 : f32 to vector<24x128xf32>
    %272 = arith.select %270, %259, %271 : vector<24x128xi1>, vector<24x128xf32>
    %c23_i32 = arith.constant 23 : i32
    %273 = tpu.dynamic_rotate %239 by %c23_i32 dim 0 : vector<24x128xf32>, i32 -> vector<24x128xf32>
    %c1_i32_104 = arith.constant 1 : i32
    %274 = vector.broadcast %c1_i32_104 : i32 to vector<24x1xi32>
    %275 = arith.addi %244, %274 : vector<24x1xi32>
    %c0_i32_105 = arith.constant 0 : i32
    %276 = vector.broadcast %c0_i32_105 : i32 to vector<24x1xi32>
    %277 = arith.cmpi sge, %275, %276 : vector<24x1xi32>
    %c1_i32_106 = arith.constant 1 : i32
    %278 = vector.broadcast %c1_i32_106 : i32 to vector<24x1xi32>
    %279 = arith.addi %244, %278 : vector<24x1xi32>
    %c8_i32_107 = arith.constant 8 : i32
    %280 = vector.broadcast %c8_i32_107 : i32 to vector<24x1xi32>
    %281 = arith.cmpi slt, %279, %280 : vector<24x1xi32>
    %282 = arith.andi %277, %281 : vector<24x1xi1>
    %cst_108 = arith.constant 0.000000e+00 : f32
    %283 = vector.shape_cast %282 : vector<24x1xi1> to vector<24x1xi1>
    %284 = vector.broadcast %283 : vector<24x1xi1> to vector<24x128xi1>
    %285 = vector.broadcast %cst_108 : f32 to vector<24x128xf32>
    %286 = arith.select %284, %273, %285 : vector<24x128xi1>, vector<24x128xf32>
    %c22_i32 = arith.constant 22 : i32
    %287 = tpu.dynamic_rotate %239 by %c22_i32 dim 0 : vector<24x128xf32>, i32 -> vector<24x128xf32>
    %c2_i32_109 = arith.constant 2 : i32
    %288 = vector.broadcast %c2_i32_109 : i32 to vector<24x1xi32>
    %289 = arith.addi %244, %288 : vector<24x1xi32>
    %c0_i32_110 = arith.constant 0 : i32
    %290 = vector.broadcast %c0_i32_110 : i32 to vector<24x1xi32>
    %291 = arith.cmpi sge, %289, %290 : vector<24x1xi32>
    %c2_i32_111 = arith.constant 2 : i32
    %292 = vector.broadcast %c2_i32_111 : i32 to vector<24x1xi32>
    %293 = arith.addi %244, %292 : vector<24x1xi32>
    %c8_i32_112 = arith.constant 8 : i32
    %294 = vector.broadcast %c8_i32_112 : i32 to vector<24x1xi32>
    %295 = arith.cmpi slt, %293, %294 : vector<24x1xi32>
    %296 = arith.andi %291, %295 : vector<24x1xi1>
    %cst_113 = arith.constant 0.000000e+00 : f32
    %297 = vector.shape_cast %296 : vector<24x1xi1> to vector<24x1xi1>
    %298 = vector.broadcast %297 : vector<24x1xi1> to vector<24x128xi1>
    %299 = vector.broadcast %cst_113 : f32 to vector<24x128xf32>
    %300 = arith.select %298, %287, %299 : vector<24x128xi1>, vector<24x128xf32>
    %301 = tpu.concatenate %258, %272, %239, %286, %300 in 1 : vector<24x128xf32>, vector<24x128xf32>, vector<24x128xf32>, vector<24x128xf32>, vector<24x128xf32> -> vector<24x640xf32>
    %302 = arith.truncf %301 : vector<24x640xf32> to vector<24x640xbf16>
    %cst_114 = arith.constant dense<0.000000e+00> : vector<24x256xf32>
    %303 = tpu.matmul %302, %240, %cst_114 {dimension_numbers = #tpu.dot_dimension_numbers<[1], [0], [0], [1], [0, 0, 1, 1], [], []>} : vector<24x640xbf16>, vector<640x256xbf16>, vector<24x256xf32> -> vector<24x256xf32>
    %304 = vector.broadcast %241 : vector<1x256xf32> to vector<24x256xf32>
    %305 = arith.addf %303, %304 : vector<24x256xf32>
    %cst_115 = arith.constant 0.000000e+00 : f32
    %306 = vector.broadcast %cst_115 : f32 to vector<24x256xf32>
    %307 = arith.maximumf %305, %306 : vector<24x256xf32>
    %c0_116 = arith.constant 0 : index
    %c0_117 = arith.constant 0 : index
    %c0_118 = arith.constant 0 : index
    %308 = vector.load %arg2[%c0_116, %c0_117, %c0_118] : memref<1x1x4xf32, #tpu.memory_space<vmem>>, vector<1x1x4xf32>
    %309 = vector.shape_cast %308 : vector<1x1x4xf32> to vector<1x4xf32>
    %c0_119 = arith.constant 0 : index
    %c0_120 = arith.constant 0 : index
    %310 = vector.load %arg7[%c0_119, %c0_120] : memref<720x128xbf16, #tpu.memory_space<vmem>>, vector<4x32xbf16>
    %311 = arith.truncf %309 : vector<1x4xf32> to vector<1x4xbf16>
    %cst_121 = arith.constant dense<0.000000e+00> : vector<1x32xf32>
    %312 = tpu.matmul %311, %310, %cst_121 {dimension_numbers = #tpu.dot_dimension_numbers<[1], [0], [0], [1], [0, 0, 1, 1], [], []>} : vector<1x4xbf16>, vector<4x32xbf16>, vector<1x32xf32> -> vector<1x32xf32>
    %c4 = arith.constant 4 : index
    %c0_122 = arith.constant 0 : index
    %313 = vector.load %arg8[%c4, %c0_122] : memref<32x256xf32, #tpu.memory_space<vmem>>, vector<1x32xf32>
    %314 = arith.addf %312, %313 : vector<1x32xf32>
    %cst_123 = arith.constant 0.000000e+00 : f32
    %315 = vector.broadcast %cst_123 : f32 to vector<1x32xf32>
    %316 = arith.maximumf %314, %315 : vector<1x32xf32>
    %c16 = arith.constant 16 : index
    %c0_124 = arith.constant 0 : index
    %317 = vector.load %arg7[%c16, %c0_124] : memref<720x128xbf16, #tpu.memory_space<vmem>>, vector<32x64xbf16>
    %318 = arith.truncf %316 : vector<1x32xf32> to vector<1x32xbf16>
    %cst_125 = arith.constant dense<0.000000e+00> : vector<1x64xf32>
    %319 = tpu.matmul %318, %317, %cst_125 {dimension_numbers = #tpu.dot_dimension_numbers<[1], [0], [0], [1], [0, 0, 1, 1], [], []>} : vector<1x32xbf16>, vector<32x64xbf16>, vector<1x64xf32> -> vector<1x64xf32>
    %c5 = arith.constant 5 : index
    %c0_126 = arith.constant 0 : index
    %320 = vector.load %arg8[%c5, %c0_126] : memref<32x256xf32, #tpu.memory_space<vmem>>, vector<1x64xf32>
    %321 = arith.addf %319, %320 : vector<1x64xf32>
    %cst_127 = arith.constant 0.000000e+00 : f32
    %322 = vector.broadcast %cst_127 : f32 to vector<1x64xf32>
    %323 = arith.maximumf %321, %322 : vector<1x64xf32>
    %c48 = arith.constant 48 : index
    %c0_128 = arith.constant 0 : index
    %324 = vector.load %arg7[%c48, %c0_128] : memref<720x128xbf16, #tpu.memory_space<vmem>>, vector<64x128xbf16>
    %325 = arith.truncf %323 : vector<1x64xf32> to vector<1x64xbf16>
    %cst_129 = arith.constant dense<0.000000e+00> : vector<1x128xf32>
    %326 = tpu.matmul %325, %324, %cst_129 {dimension_numbers = #tpu.dot_dimension_numbers<[1], [0], [0], [1], [0, 0, 1, 1], [], []>} : vector<1x64xbf16>, vector<64x128xbf16>, vector<1x128xf32> -> vector<1x128xf32>
    %c6 = arith.constant 6 : index
    %c0_130 = arith.constant 0 : index
    %327 = vector.load %arg8[%c6, %c0_130] : memref<32x256xf32, #tpu.memory_space<vmem>>, vector<1x128xf32>
    %328 = arith.addf %326, %327 : vector<1x128xf32>
    %cst_131 = arith.constant 0.000000e+00 : f32
    %329 = vector.broadcast %cst_131 : f32 to vector<1x128xf32>
    %330 = arith.maximumf %328, %329 : vector<1x128xf32>
    %c688 = arith.constant 688 : index
    %c0_132 = arith.constant 0 : index
    %331 = vector.load %arg7[%c688, %c0_132] : memref<720x128xbf16, #tpu.memory_space<vmem>>, vector<12x24xbf16>
    %332 = arith.truncf %307 : vector<24x256xf32> to vector<24x256xbf16>
    %cst_133 = arith.constant dense<0.000000e+00> : vector<12x256xf32>
    %333 = tpu.matmul %331, %332, %cst_133 {dimension_numbers = #tpu.dot_dimension_numbers<[1], [0], [0], [1], [0, 0, 1, 1], [], []>} : vector<12x24xbf16>, vector<24x256xbf16>, vector<12x256xf32> -> vector<12x256xf32>
    %c16_134 = arith.constant 16 : index
    %c0_135 = arith.constant 0 : index
    %334 = vector.load %arg8[%c16_134, %c0_135] : memref<32x256xf32, #tpu.memory_space<vmem>>, vector<12x1xf32>
    %335 = vector.broadcast %334 : vector<12x1xf32> to vector<12x256xf32>
    %336 = arith.addf %333, %335 : vector<12x256xf32>
    %cst_136 = arith.constant 0.000000e+00 : f32
    %337 = vector.broadcast %cst_136 : f32 to vector<12x256xf32>
    %338 = arith.maximumf %336, %337 : vector<12x256xf32>
    %c704 = arith.constant 704 : index
    %c0_137 = arith.constant 0 : index
    %339 = vector.load %arg7[%c704, %c0_137] : memref<720x128xbf16, #tpu.memory_space<vmem>>, vector<1x12xbf16>
    %340 = arith.truncf %338 : vector<12x256xf32> to vector<12x256xbf16>
    %cst_138 = arith.constant dense<0.000000e+00> : vector<1x256xf32>
    %341 = tpu.matmul %339, %340, %cst_138 {dimension_numbers = #tpu.dot_dimension_numbers<[1], [0], [0], [1], [0, 0, 1, 1], [], []>} : vector<1x12xbf16>, vector<12x256xbf16>, vector<1x256xf32> -> vector<1x256xf32>
    %c28 = arith.constant 28 : index
    %c0_139 = arith.constant 0 : index
    %342 = vector.load %arg8[%c28, %c0_139] : memref<32x256xf32, #tpu.memory_space<vmem>>, vector<1x1xf32>
    %343 = vector.broadcast %342 : vector<1x1xf32> to vector<1x256xf32>
    %344 = arith.addf %341, %343 : vector<1x256xf32>
    %cst_140 = arith.constant 0.000000e+00 : f32
    %345 = vector.broadcast %cst_140 : f32 to vector<1x256xf32>
    %346 = arith.maximumf %344, %345 : vector<1x256xf32>
    %347 = tpu.concatenate %346, %330 in 1 : vector<1x256xf32>, vector<1x128xf32> -> vector<1x384xf32>
    %c112 = arith.constant 112 : index
    %c0_141 = arith.constant 0 : index
    %348 = vector.load %arg7[%c112, %c0_141] : memref<720x128xbf16, #tpu.memory_space<vmem>>, vector<384x128xbf16>
    %349 = arith.truncf %347 : vector<1x384xf32> to vector<1x384xbf16>
    %cst_142 = arith.constant dense<0.000000e+00> : vector<1x128xf32>
    %350 = tpu.matmul %349, %348, %cst_142 {dimension_numbers = #tpu.dot_dimension_numbers<[1], [0], [0], [1], [0, 0, 1, 1], [], []>} : vector<1x384xbf16>, vector<384x128xbf16>, vector<1x128xf32> -> vector<1x128xf32>
    %c7 = arith.constant 7 : index
    %c0_143 = arith.constant 0 : index
    %351 = vector.load %arg8[%c7, %c0_143] : memref<32x256xf32, #tpu.memory_space<vmem>>, vector<1x128xf32>
    %352 = arith.addf %350, %351 : vector<1x128xf32>
    %cst_144 = arith.constant 0.000000e+00 : f32
    %353 = vector.broadcast %cst_144 : f32 to vector<1x128xf32>
    %354 = arith.maximumf %352, %353 : vector<1x128xf32>
    %c496 = arith.constant 496 : index
    %c0_145 = arith.constant 0 : index
    %355 = vector.load %arg7[%c496, %c0_145] : memref<720x128xbf16, #tpu.memory_space<vmem>>, vector<128x64xbf16>
    %356 = arith.truncf %354 : vector<1x128xf32> to vector<1x128xbf16>
    %cst_146 = arith.constant dense<0.000000e+00> : vector<1x64xf32>
    %357 = tpu.matmul %356, %355, %cst_146 {dimension_numbers = #tpu.dot_dimension_numbers<[1], [0], [0], [1], [0, 0, 1, 1], [], []>} : vector<1x128xbf16>, vector<128x64xbf16>, vector<1x64xf32> -> vector<1x64xf32>
    %c8 = arith.constant 8 : index
    %c0_147 = arith.constant 0 : index
    %358 = vector.load %arg8[%c8, %c0_147] : memref<32x256xf32, #tpu.memory_space<vmem>>, vector<1x64xf32>
    %359 = arith.addf %357, %358 : vector<1x64xf32>
    %cst_148 = arith.constant 0.000000e+00 : f32
    %360 = vector.broadcast %cst_148 : f32 to vector<1x64xf32>
    %361 = arith.maximumf %359, %360 : vector<1x64xf32>
    %c624 = arith.constant 624 : index
    %c0_149 = arith.constant 0 : index
    %362 = vector.load %arg7[%c624, %c0_149] : memref<720x128xbf16, #tpu.memory_space<vmem>>, vector<64x1xbf16>
    %363 = arith.truncf %361 : vector<1x64xf32> to vector<1x64xbf16>
    %cst_150 = arith.constant dense<0.000000e+00> : vector<1x1xf32>
    %364 = tpu.matmul %363, %362, %cst_150 {dimension_numbers = #tpu.dot_dimension_numbers<[1], [0], [0], [1], [0, 0, 1, 1], [], []>} : vector<1x64xbf16>, vector<64x1xbf16>, vector<1x1xf32> -> vector<1x1xf32>
    %c9 = arith.constant 9 : index
    %c0_151 = arith.constant 0 : index
    %365 = vector.load %arg8[%c9, %c0_151] : memref<32x256xf32, #tpu.memory_space<vmem>>, vector<1x1xf32>
    %366 = arith.addf %364, %365 : vector<1x1xf32>
    %c0_152 = arith.constant 0 : index
    %c0_153 = arith.constant 0 : index
    %c0_154 = arith.constant 0 : index
    %367 = vector.load %arg9[%c0_152, %c0_153, %c0_154] : memref<1x1x1xf32, #tpu.memory_space<vmem>>, vector<1x1x1xf32>
    %368 = vector.shape_cast %367 : vector<1x1x1xf32> to vector<1x1xf32>
    %369 = vector.shape_cast %366 : vector<1x1xf32> to vector<1x1x1xf32>
    tpu.vector_store %arg9[%c0_152, %c0_153, %c0_154], %369 {strides = array<i32>} : memref<1x1x1xf32, #tpu.memory_space<vmem>>, vector<1x1x1xf32>,
    return
  }
  func.func @transform_0(%arg0: i32) -> (i32, i32, i32) {
    %c0_i32 = arith.constant 0 : i32
    %c0_i32_0 = arith.constant 0 : i32
    %c0_i32_1 = arith.constant 0 : i32
    return %arg0, %c0_i32, %c0_i32_0 : i32, i32, i32
  }
  func.func @transform_1(%arg0: i32) -> (i32, i32, i32) {
    %c0_i32 = arith.constant 0 : i32
    %c0_i32_0 = arith.constant 0 : i32
    %c0_i32_1 = arith.constant 0 : i32
    return %arg0, %c0_i32, %c0_i32_0 : i32, i32, i32
  }
  func.func @transform_2(%arg0: i32) -> (i32, i32) {
    %c0_i32 = arith.constant 0 : i32
    %c0_i32_0 = arith.constant 0 : i32
    %c0_i32_1 = arith.constant 0 : i32
    return %c0_i32, %c0_i32_0 : i32, i32
  }
  func.func @transform_3(%arg0: i32) -> (i32, i32) {
    %c0_i32 = arith.constant 0 : i32
    %c0_i32_0 = arith.constant 0 : i32
    %c0_i32_1 = arith.constant 0 : i32
    return %c0_i32, %c0_i32_0 : i32, i32
  }
  func.func @transform_4(%arg0: i32) -> (i32, i32) {
    %c0_i32 = arith.constant 0 : i32
    %c0_i32_0 = arith.constant 0 : i32
    %c0_i32_1 = arith.constant 0 : i32
    return %c0_i32, %c0_i32_0 : i32, i32
  }
  func.func @transform_5(%arg0: i32) -> (i32, i32) {
    %c0_i32 = arith.constant 0 : i32
    %c0_i32_0 = arith.constant 0 : i32
    %c0_i32_1 = arith.constant 0 : i32
    return %c0_i32, %c0_i32_0 : i32, i32
  }
  func.func @transform_6(%arg0: i32) -> (i32, i32) {
    %c0_i32 = arith.constant 0 : i32
    %c0_i32_0 = arith.constant 0 : i32
    %c0_i32_1 = arith.constant 0 : i32
    return %c0_i32, %c0_i32_0 : i32, i32
  }
  func.func @transform_7(%arg0: i32) -> (i32, i32) {
    %c0_i32 = arith.constant 0 : i32
    %c0_i32_0 = arith.constant 0 : i32
    %c0_i32_1 = arith.constant 0 : i32
    return %c0_i32, %c0_i32_0 : i32, i32
  }
  func.func @transform_8(%arg0: i32) -> (i32, i32, i32) {
    %c0_i32 = arith.constant 0 : i32
    %c0_i32_0 = arith.constant 0 : i32
    %c0_i32_1 = arith.constant 0 : i32
    return %arg0, %c0_i32, %c0_i32_0 : i32, i32, i32
  }
}

</mosaic_0001>

<bundles_post_ra>
// kernel: tpu_custom_call.1
= control target key start
LH: loop header
LB: loop body
LE: loop exit
PB: predicated region body
PF: predicated region fallthrough
CT: control target
= control target key end

     0   :  { %13 = vsyncpa [#allocation6], 0  ;;  %s8393_s0 = inlined_call_operand.vmem [shape: f32[2,192,1], index: 0, kind: input, shape index: {}]   ;;  %s8394_s1 = inlined_call_operand.vmem [shape: f32[2,1,4], index: 1, kind: input, shape index: {}]   ;;  %s8395_s2 = inlined_call_operand.vmem [shape: bf16[5,32], index: 2, kind: input, shape index: {}]   ;;  %s8396_s3 = inlined_call_operand.vmem [shape: bf16[160,64], index: 3, kind: input, shape index: {}]   ;;  %s8397_s4 = inlined_call_operand.vmem [shape: bf16[320,128], index: 4, kind: input, shape index: {}]   ;;  %s8398_s5 = inlined_call_operand.hbm [shape: bf16[640,256], index: 5, kind: input, shape index: {}]   ;;  %s8399_s6 = inlined_call_operand.vmem [shape: bf16[720,128], index: 6, kind: input, shape index: {}]   ;;  %s8400_s7 = inlined_call_operand.hbm [shape: f32[32,256], index: 7, kind: input, shape index: {}]   ;;  %s8401_s8 = inlined_call_operand.vmem [shape: f32[2,1,1], index: 8, kind: output, shape index: {}]  }
   0x1   :  { %14 = vsyncpa [#allocation8], 0  ;;  %s6210_s27 = smov 0  }
   0x2 LB: > { %s6153_s28 = smov [#allocation5]   ;;  %s6216_s30 = sadd.s32 4294967295, %s6151_s27   ;;  %s6151_s27 = sphi %s6210_s27, %s20_s27  }
   0x3   : > { %s250_s29 = sshll.u32 %s6153_s28, 4  ;;  %p5303_p0 = scmp.ge.s32.totalorder %s6151_s27, 1  ;;  %s251_s29 = int_to_ptr.vmem [resolvable:$true] %s250_s29 }
   0x4   : > { %p229_p1 = scmp.lt.s32.totalorder %s6151_s27, 3  ;;  %p8402_p3 = scmp.eq.s32.totalorder %s6216_s30, 0 }
   0x5   : > { %s6154_s10 = smov [#allocation7]   ;;  %s6081_s15 = scalar_lea.hbm %s8398_s5, 10240 }
   0x6   : > { %p6220_p2 = pnand %p5303_p0, %p229_p1  ;;  %s266_s11 = sshll.u32 %s6154_s10, 4  ;;  %s6233_s11 = int_to_ptr.vmem [resolvable:$true] %s266_s11 }
   0x7   : > { %p6082_p6 = scmp.ne.s32.totalorder %s8398_s5, %s6081_s15  ;;  %p6088_p10 = scmp.lt.u32.totalorder %s6081_s15, %s8398_s5 }
   0x8   : > { %s8425_s9 = scalar_select %p6220_p2, 1, 0 }
   0x9   : > { %p5732_p4 = pneg %p6220_p2 }
   0xb   : > { %p6229_p5 = pnand %p8402_p3, %p5732_p4 }
   0xd   : > { %p6083_p7 = pneg %p6229_p5 }
   0xf   : > { %p6084_p8 = pnand %p6083_p7, %p6082_p6 }
  0x11   : > { %p6085_p9 = pneg %p6084_p8 }
  0x13   : > { %p6090_p11 = pnand %p6088_p10, %p6085_p9 }
  0x15   : > { %6093 = shalt.err (!%p6090_p11)
}
  0x16   : > { %s6094_s20 = scalar_lea.vmem %s251_s29, 10240  ;;  %p6102_p1 = scmp.lt.s32.totalorder %s251_s29, %s251_s29 }
  0x17   : > { %p6095_p12 = scmp.ne.s32.totalorder %s251_s29, %s6094_s20  ;;  %p6103_p4 = scmp.lt.s32.totalorder %s6094_s20, %s6094_s20 }
  0x19   : > { %p6097_p13 = pnand %p6095_p12, %p6083_p7  ;;  %p6104_p3 = por %p6103_p4, %p6102_p1 }
  0x1b   : > { %p6098_p0 = pneg %p6097_p13 }
  0x1d   : > { %p6105_p2 = pnand %p6104_p3, %p6098_p0 }
  0x1f   : > { %6108 = shalt.err (!%p6105_p2)
}
  0x20   : > { %s6155_s21 = smov 128   ;;  %s6156_s22 = smov 8  }
  0x21   : > { %5735 = dma.hbm_to_vmem [thread:$0]  (!%p6229_p5), %s8398_s5, 10240, %s251_s29, [#allocation6], %s6155_s21, %s6155_s21, %s6156_s22  }
  0x22   : > { %s6109_s28 = scalar_lea.hbm %s8400_s7, 1024 }
  0x23   : > { %p6110_p6 = scmp.ne.s32.totalorder %s8400_s7, %s6109_s28  ;;  %p6116_p8 = scmp.lt.u32.totalorder %s6109_s28, %s8400_s7 }
  0x25   : > { %p6112_p2 = pnand %p6110_p6, %p6083_p7 }
  0x27   : > { %p6113_p3 = pneg %p6112_p2 }
  0x29   : > { %p6118_p9 = pnand %p6116_p8, %p6113_p3 }
  0x2b   : > { %6121 = shalt.err (!%p6118_p9)
}
  0x2c   : > { %s6122_s29 = scalar_lea.vmem %s6233_s11, 1024  ;;  %p6130_p13 = scmp.lt.s32.totalorder %s6233_s11, %s6233_s11 }
  0x2d   : > { %p6123_p10 = scmp.ne.s32.totalorder %s6233_s11, %s6122_s29  ;;  %p6131_p0 = scmp.lt.s32.totalorder %s6122_s29, %s6122_s29 }
  0x2f   : > { %p6125_p11 = pnand %p6123_p10, %p6083_p7  ;;  %p6132_p1 = por %p6131_p0, %p6130_p13 }
  0x31   : > { %p6126_p12 = pneg %p6125_p11 }
  0x33   : > { %p6133_p4 = pnand %p6132_p1, %p6126_p12 }
  0x35   : > { %6136 = shalt.err (!%p6133_p4)
}
  0x36   : > { %s6157_s16 = smov 256   ;;  %s6158_s17 = smov 16  }
  0x37   : > { %5738 = dma.hbm_to_vmem [thread:$0]  (!%p6229_p5), %s8400_s7, 1024, %s6233_s11, [#allocation8], %s6157_s16, %s6157_s16, %s6158_s17  }
  0x38   : > { %p8427_p6 = scmp.ne.s32.totalorder %s8425_s9, 0 }
  0x3a   : > { %296 = sbr.rel (%p8427_p6) target bundleno = 2696 (0xa88), region = 52 }
  0x41   : > { %p8428_p7 = scmp.eq.s32.totalorder %s6216_s30, 0 }
  0x43   : > { %6142 = dma.done.wait (%p8428_p7), [#allocation6], 10240   ;;  %p8429_p2 = pmov %p8428_p7 }
  0x45   : > { %6144 = vsyncadd (%p8429_p2), [#allocation6], 4294957056  ;;  %p8430_p3 = pmov %p8429_p2 }
  0x46   : > { %p8431_p8 = pmov %p8429_p2 }
  0x47   : > { %6146 = dma.done.wait (%p8430_p3), [#allocation8], 1024  }
  0x48   : > { %6148 = vsyncadd (%p8431_p8), [#allocation8], 4294966272  ;;  %p335_p9 = scmp.lt.s32.totalorder %s6216_s30, 1  ;;  %v373_v0 = vlaneseq  ;;  %v8406_v1 = vmov 0   ;;  %s6160_s12 = smov 64  }
  0x49   : > { %5764 = vset.pattern.permute.xlu1 %v8406_v1  ;;  %5763 = vset.pattern.permute.xlu0 %v8406_v1  ;;  %s6162_s25 = smov 96  }
  0x4a   : > { %s8460_s30 = smov (!%p335_p9, %s6216_s30), 1  ;;  %2888 = vmatprep.subr.bf16.mxu0 %v8406_v1  ;;  %v6299_v2 = vshrl.u32 %v373_v0, 7 }
  0x4b   : > { %s5723_s9 = smul.u32 192, %s8460_s30  ;;  %s342_s15 = scalar_lea.vmem %s8394_s1, %s8460_s30 }
  0x4c   : > { %vm446_vm0 = vcmp.lt.s32.totalorder %v6299_v2, 2  ;;  %v398_v6 = vand.u32 63, %v6299_v2  ;;  %vm788_vm1 = vcmp.lt.s32.totalorder %v6299_v2, 1  ;;  %vm1642_vm4 = vcmp.lt.s32.totalorder %v6299_v2, 6  ;;  %s345_s22 = scalar_lea.vmem %s8401_s8, %s8460_s30 }
  0x4d   : > { %s6305_s20 = scalar_lea.vmem %s8393_s0, %s5723_s9  ;;  %v397_v62 = vadd.s32 184, %v6299_v2  ;;  %vm1301_vm5 = vcmp.lt.s32.totalorder %v6299_v2, 7 }
  0x4e   : > { %v6308_v3 = vld [vmem:[%s6305_s20 + $0x8] sm:$0xff]  ;;  %v6311_v4 = vld [vmem:[%s6305_s20 + $0x10] sm:$0xff]  ;;  %v6315_v5 = vld [vmem:[%s6305_s20] sm:$0xff]  ;;  %v471_v19 = vadd.s32 4294967294, %v398_v6  ;;  %v813_v25 = vadd.s32 4294967295, %v398_v6 }
  0x4f   : > { %v423_v7 = vrot.slane %v6308_v3, 6  ;;  %v424_v8 = vrot.slane %v6311_v4, 6  ;;  %v422_v9 = vrot.slane %v6315_v5, 6  ;;  %v6322_v10 = vld [vmem:[%s6305_s20 + $0xa8] sm:$0xff]  ;;  %v6325_v11 = vld [vmem:[%s6305_s20 + $0xb0] sm:$0xff]  ;;  %v6328_v12 = vld [vmem:[%s6305_s20 + $0xb8] sm:$0xff] }
  0x50   : > { %8432 = vst [vmem:[#allocation11_spill] sm:$0xff] %v6325_v11  ;;  %v8410_v13 = vrot.slane %v6322_v10, 6  ;;  %v444_v14 = vrot.slane %v6325_v11, 6  ;;  %v445_v15 = vrot.slane %v6328_v12, 6  ;;  %v765_v18 = vrot.slane %v6308_v3, 7  ;;  %v6357_v30 = vld [vmem:[%s6305_s20 + $0x18] sm:$0xff] }
  0x51   : > { %v468_v16 = vsel %vm446_vm0, %v423_v7, %v424_v8  ;;  %v469_v17 = vsel %vm446_vm0, %v422_v9, %v423_v7  ;;  %v766_v22 = vrot.slane %v6311_v4, 7  ;;  %v764_v23 = vrot.slane %v6315_v5, 7  ;;  %v6361_v33 = vld [vmem:[%s6305_s20 + $0x20] sm:$0xff]  ;;  %v6404_v53 = vld [vmem:[%s6305_s20 + $0x28] sm:$0xff]  ;;  %v6409_v54 = vld [vmem:[%s6305_s20 + $0x30] sm:$0xff] }
  0x52   : > { %604 = vperm.xlu1 %5764, %v468_v16   ;;  %599 = vperm.xlu0 %5763, %v469_v17   ;;  %v448_v20 = vsel %vm446_vm0, %v8410_v13, %v444_v14  ;;  %v447_v21 = vsel %vm446_vm0, %v444_v14, %v445_v15  ;;  %v787_v24 = vrot.slane %v6328_v12, 7  ;;  %v470_v28 = vsel %vm446_vm0, %v445_v15, %v422_v9 }
  0x53   : > { %v810_v26 = vsel %vm788_vm1, %v765_v18, %v766_v22  ;;  %v811_v27 = vsel %vm788_vm1, %v764_v23, %v765_v18  ;;  %vm495_vm2 = vcmp.ge.s32.totalorder %v471_v19, 0  ;;  %vm837_vm3 = vcmp.ge.s32.totalorder %v813_v25, 0 }
  0x54   : > { %v812_v29 = vsel %vm788_vm1, %v787_v24, %v764_v23  ;;  %v567_v31 = vsel %vm495_vm2, %v470_v28, 0.0  ;;  %v786_v32 = vrot.slane %v6325_v11, 7  ;;  %v8408_v35 = vrot.slane %v6322_v10, 7 }
  0x55   : > { %v909_v34 = vsel %vm837_vm3, %v812_v29, 0.0  ;;  %v425_v36 = vrot.slane %v6357_v30, 6  ;;  %v1619_v37 = vrot.slane %v6308_v3, 2  ;;  %v1620_v38 = vrot.slane %v6311_v4, 2 }
  0x56   : > { %704 = vperm.xlu1 %5764, %v448_v20   ;;  %709 = vperm.xlu0 %5763, %v447_v21   ;;  %v426_v39 = vrot.slane %v6361_v33, 6  ;;  %v1618_v40 = vrot.slane %v6315_v5, 2  ;;  %v789_v41 = vsel %vm788_vm1, %v786_v32, %v787_v24  ;;  %v790_v42 = vsel %vm788_vm1, %v8408_v35, %v786_v32 }
  0x57   : > { %v6380_v43 = vsel %vm1642_vm4, %v1619_v37, %v1620_v38  ;;  %v1641_v44 = vrot.slane %v6328_v12, 2  ;;  %v467_v48 = vsel %vm446_vm0, %v424_v8, %v425_v36  ;;  %v767_v49 = vrot.slane %v6357_v30, 7 }
  0x58   : > { %v6385_v45 = vsel %vm1642_vm4, %v1618_v40, %v1619_v37  ;;  %v466_v47 = vsel %vm446_vm0, %v425_v36, %v426_v39  ;;  %v768_v50 = vrot.slane %v6361_v33, 7  ;;  %v427_v55 = vrot.slane %v6404_v53, 6 }
  0x59   : > { %v6391_v46 = vsel %vm1642_vm4, %v1641_v44, %v1618_v40  ;;  %v809_v52 = vsel %vm788_vm1, %v766_v22, %v767_v49  ;;  %v769_v56 = vrot.slane %v6404_v53, 7  ;;  %v428_v57 = vrot.slane %v6409_v54, 6 }
  0x5a   : > { %945 = vperm.xlu1 %5764, %v810_v26   ;;  %940 = vperm.xlu0 %5763, %v811_v27   ;;  %v808_v51 = vsel %vm788_vm1, %v767_v49, %v768_v50  ;;  %v465_v58 = vsel %vm446_vm0, %v426_v39, %v427_v55  ;;  %v770_v59 = vrot.slane %v6409_v54, 7  ;;  %v1277_v0 = vrot.slane %v6315_v5, 1  ;;  %v6464_v27 = vld [vmem:[%s6305_s20 + $0x38] sm:$0xff]  ;;  %v6478_v39 = vld [vmem:[%s6305_s20 + $0x40] sm:$0xff] }
  0x5b   : > { %v807_v60 = vsel %vm788_vm1, %v768_v50, %v769_v56  ;;  %v464_v61 = vsel %vm446_vm0, %v427_v55, %v428_v57  ;;  %v1278_v6 = vrot.slane %v6308_v3, 1  ;;  %v421_v7 = vand.u32 63, %v397_v62  ;;  %v6506_v50 = vld [vmem:[%s6305_s20 + $0x48] sm:$0xff] }
  0x5c   : > { %v806_v63 = vsel %vm788_vm1, %v769_v56, %v770_v59  ;;  %v1279_v9 = vrot.slane %v6311_v4, 1  ;;  %v1280_v14 = vrot.slane %v6357_v30, 1  ;;  %v1300_v15 = vrot.slane %v6328_v12, 1 }
  0x5d   : > { %v1324_v8 = vsel %vm1301_vm5, %v1277_v0, %v1278_v6  ;;  %v1349_v16 = vadd.s32 1, %v421_v7  ;;  %v8405_v17 = vrot.slane %v6325_v11, 1  ;;  %v1281_v21 = vrot.slane %v6361_v33, 1 }
  0x5e   : > { %935 = vperm.xlu1 %5764, %v909_v34   ;;  %594 = vperm.xlu0 %5763, %v567_v31   ;;  %v1325_v18 = vsel %vm1301_vm5, %v1300_v15, %v1277_v0  ;;  %v1282_v22 = vrot.slane %v6404_v53, 1  ;;  %v6461_v25 = vadd.s32 64, %v6299_v2  ;;  %v1690_v26 = vadd.s32 2, %v421_v7 }
  0x5f   : > { %vm1397_vm6 = vcmp.lt.s32.totalorder %v1349_v16, 64  ;;  %v1302_v20 = vsel %vm1301_vm5, %v8405_v17, %v1300_v15  ;;  %v1321_v24 = vsel %vm1301_vm5, %v1280_v14, %v1281_v21  ;;  %v6467_v28 = vadd.s32 56, %v6299_v2 }
  0x60   : > { %v1445_v19 = vsel %vm1397_vm6, %v1325_v18, 0.0  ;;  %v1320_v23 = vsel %vm1301_vm5, %v1281_v21, %v1282_v22  ;;  %8433 = vst [vmem:[#allocation12_spill] sm:$0xff] %v6461_v25  ;;  %v8404_v29 = vrot.slane %v6325_v11, 2  ;;  %v1621_v31 = vrot.slane %v6357_v30, 2 }
  0x61   : > { %8434 = vst [vmem:[#allocation13_spill] sm:$0xff] %v6467_v28  ;;  %vm1738_vm7 = vcmp.lt.s32.totalorder %v1690_v26, 64  ;;  %v406_v32 = vand.u32 63, %v6461_v25  ;;  %v1283_v34 = vrot.slane %v6409_v54, 1  ;;  %v1622_v36 = vrot.slane %v6361_v33, 2 }
  0x62   : > { %1050 = vperm.xlu1 %5764, %v789_v41   ;;  %1045 = vperm.xlu0 %5763, %v790_v42   ;;  %v1284_v37 = vrot.slane %v6464_v27, 1  ;;  %v1663_v40 = vsel %vm1642_vm4, %v1620_v38, %v1621_v31  ;;  %v1786_v41 = vsel %vm1738_vm7, %v6391_v46, 0.0  ;;  %v1623_v42 = vrot.slane %v6404_v53, 2 }
  0x63   : > { %v821_v38 = vadd.s32 4294967295, %v406_v32  ;;  %v1662_v46 = vsel %vm1642_vm4, %v1621_v31, %v1622_v36  ;;  %v1624_v49 = vrot.slane %v6409_v54, 2  ;;  %v431_v56 = vrot.slane %v6506_v50, 6 }
  0x64   : > { %v1285_v15 = vrot.slane %v6478_v39, 1  ;;  %v1286_v18 = vrot.slane %v6506_v50, 1  ;;  %vm2103_vm2 = vcmask 261120  }
  0x65   : > { %vm845_vm9 = vcmp.ge.s32.totalorder %v821_v38, 0  ;;  %v1660_v0 = vsel %vm1642_vm4, %v1623_v42, %v1624_v49 }
  0x66   : > { %614 = vperm.xlu1 %5764, %v466_v47   ;;  %609 = vperm.xlu0 %5763, %v467_v48   ;;  %v1318_v47 = vsel %vm1301_vm5, %v1283_v34, %v1284_v37 }
  0x6a   : > { %955 = vperm.xlu1 %5764, %v808_v51   ;;  %950 = vperm.xlu0 %5763, %v809_v52  }
  0x6e   : > { %1112 = vperm.xlu1 %5764, %v6308_v3   ;;  %1107 = vperm.xlu0 %5763, %v6315_v5   ;;  %v1322_v3 = vsel %vm1301_vm5, %v1279_v9, %v1280_v14  ;;  %v1323_v5 = vsel %vm1301_vm5, %v1278_v6, %v1279_v9  ;;  %v405_v9 = vand.u32 63, %v6467_v28 }
  0x70   : > { %v1333_v16 = vadd.s32 1, %v405_v9  ;;  %v1674_v21 = vadd.s32 2, %v405_v9 }
  0x72   : > { %1217 = vperm.xlu1 %5764, %v6325_v11   ;;  %1117 = vperm.xlu0 %5763, %v6311_v4   ;;  %v1319_v4 = vsel %vm1301_vm5, %v1282_v22, %v1283_v34  ;;  %vm1381_vm10 = vcmp.lt.s32.totalorder %v1333_v16, 64  ;;  %v6551_v22 = vld [vmem:[%s6305_s20 + $0x58] sm:$0xff]  ;;  %vm1722_vm11 = vcmp.lt.s32.totalorder %v1674_v21, 64  ;;  %v1627_v34 = vrot.slane %v6506_v50, 2 }
  0x73   : > { %v1288_v26 = vrot.slane %v6551_v22, 1 }
  0x76   : > { %619 = vperm.xlu1 %5764, %v465_v58   ;;  %1222 = vperm.xlu0 %5763, %v6328_v12   ;;  %v430_v12 = vrot.slane %v6478_v39, 6  ;;  %v6518_v58 = vld [vmem:[%s6305_s20 + $0x50] sm:$0xff] }
  0x78   : > { %v461_v6 = vsel %vm446_vm0, %v430_v12, %v431_v56 }
  0x7a   : > { %960 = vperm.xlu1 %5764, %v807_v60   ;;  %624 = vperm.xlu0 %5763, %v464_v61   ;;  %v1625_v61 = vrot.slane %v6464_v27, 2 }
  0x7e   : > { %1122 = vperm.xlu1 %5764, %v6357_v30   ;;  %965 = vperm.xlu0 %5763, %v806_v63   ;;  %v1643_v30 = vsel %vm1642_vm4, %v8404_v29, %v1641_v44  ;;  %v772_v44 = vrot.slane %v6478_v39, 7  ;;  %v432_v63 = vrot.slane %v6518_v58, 6 }
  0x80   : > { %v460_v7 = vsel %vm446_vm0, %v431_v56, %v432_v63 }
  0x82   : > { %1448 = vperm.xlu1 %5764, %v1324_v8   ;;  %1127 = vperm.xlu0 %5763, %v6361_v33   ;;  %v429_v33 = vrot.slane %v6464_v27, 6  ;;  %v774_v8 = vrot.slane %v6518_v58, 7 }
  0x84   : > { %v462_v48 = vsel %vm446_vm0, %v429_v33, %v430_v12  ;;  %v463_v52 = vsel %vm446_vm0, %v428_v57, %v429_v33  ;;  %v773_v57 = vrot.slane %v6506_v50, 7 }
  0x86   : > { %1458 = vperm.xlu1 %5764, %v1322_v3   ;;  %1453 = vperm.xlu0 %5763, %v1323_v5   ;;  %v802_v14 = vsel %vm788_vm1, %v773_v57, %v774_v8  ;;  %v1317_v3 = vsel %vm1301_vm5, %v1284_v37, %v1285_v15 }
  0x87   : > { %v1429_v5 = vsel %vm1381_vm10, %v1317_v3, 0.0  ;;  %v6640_v3 = vld [vmem:[%s6305_s20 + $0x78] sm:$0xff] }
  0x8a   : > { %1563 = vperm.xlu1 %5764, %v1445_v19   ;;  %1558 = vperm.xlu0 %5763, %v1302_v20   ;;  %v1287_v19 = vrot.slane %v6518_v58, 1  ;;  %v1626_v20 = vrot.slane %v6478_v39, 2 }
  0x8e   : > { %1137 = vperm.xlu1 %5764, %v6409_v54   ;;  %1132 = vperm.xlu0 %5763, %v6404_v53   ;;  %v1661_v53 = vsel %vm1642_vm4, %v1622_v36, %v1623_v42  ;;  %v1659_v54 = vsel %vm1642_vm4, %v1624_v49, %v1625_v61  ;;  %v1628_v36 = vrot.slane %v6518_v58, 2  ;;  %v6596_v49 = vld [vmem:[%s6305_s20 + $0x70] sm:$0xff] }
  0x8f   : > { %v436_v56 = vrot.slane %v6596_v49, 6  ;;  %v1291_v16 = vrot.slane %v6596_v49, 1 }
  0x90   : > { %v1656_v37 = vsel %vm1642_vm4, %v1627_v34, %v1628_v36 }
  0x92   : > { %1468 = vperm.xlu1 %5764, %v1320_v23   ;;  %1463 = vperm.xlu0 %5763, %v1321_v24   ;;  %v1315_v23 = vsel %vm1301_vm5, %v1286_v18, %v1287_v19  ;;  %v1316_v24 = vsel %vm1301_vm5, %v1285_v15, %v1286_v18 }
  0x96   : > { %1794 = vperm.xlu1 %5764, %v6380_v43   ;;  %1789 = vperm.xlu0 %5763, %v6385_v45   ;;  %v771_v43 = vrot.slane %v6464_v27, 7  ;;  %v479_v45 = vadd.s32 4294967294, %v406_v32  ;;  %v1314_v32 = vsel %vm1301_vm5, %v1287_v19, %v1288_v26 }
  0x98   : > { %vm503_vm8 = vcmp.ge.s32.totalorder %v479_v45, 0  ;;  %v804_v51 = vsel %vm788_vm1, %v771_v43, %v772_v44  ;;  %v805_v62 = vsel %vm788_vm1, %v770_v59, %v771_v43  ;;  %v803_v59 = vsel %vm788_vm1, %v772_v44, %v773_v57  ;;  %v6583_v45 = vld [vmem:[%s6305_s20 + $0x68] sm:$0xff] }
  0x99   : > { %v575_v55 = vsel %vm503_vm8, %v462_v48, 0.0  ;;  %v917_v60 = vsel %vm845_vm9, %v804_v51, 0.0  ;;  %v775_v43 = vrot.slane %v6551_v22, 7  ;;  %v778_v57 = vrot.slane %v6596_v49, 7 }
  0x9a   : > { %1899 = vperm.xlu1 %5764, %v1643_v30   ;;  %1799 = vperm.xlu0 %5763, %v1663_v40   ;;  %v433_v30 = vrot.slane %v6551_v22, 6  ;;  %v1629_v40 = vrot.slane %v6551_v22, 2  ;;  %v1290_v15 = vrot.slane %v6583_v45, 1 }
  0x9b   : > { %v801_v38 = vsel %vm788_vm1, %v774_v8, %v775_v43 }
  0x9c   : > { %v459_v33 = vsel %vm446_vm0, %v432_v63, %v433_v30  ;;  %v1655_v42 = vsel %vm1642_vm4, %v1628_v36, %v1629_v40 }
  0x9e   : > { %1473 = vperm.xlu1 %5764, %v1319_v4   ;;  %1904 = vperm.xlu0 %5763, %v1786_v41   ;;  %v6572_v41 = vld [vmem:[%s6305_s20 + $0x60] sm:$0xff] }
  0x9f   : > { %v434_v12 = vrot.slane %v6572_v41, 6  ;;  %v776_v48 = vrot.slane %v6572_v41, 7 }
  0xa2   : > { %1804 = vperm.xlu1 %5764, %v1662_v46   ;;  %1478 = vperm.xlu0 %5763, %v1318_v47   ;;  %v458_v46 = vsel %vm446_vm0, %v433_v30, %v434_v12  ;;  %v435_v47 = vrot.slane %v6583_v45, 6 }
  0xa6   : > { %629 = vperm.xlu1 %5764, %v463_v52   ;;  %1809 = vperm.xlu0 %5763, %v1661_v53   ;;  %v457_v52 = vsel %vm446_vm0, %v434_v12, %v435_v47  ;;  %v800_v53 = vsel %vm788_vm1, %v775_v43, %v776_v48  ;;  %v779_v43 = vrot.slane %v6640_v3, 7 }
  0xaa   : > { %970 = vperm.xlu1 %5764, %v805_v62   ;;  %634 = vperm.xlu0 %5763, %v575_v55   ;;  %v777_v55 = vrot.slane %v6583_v45, 7  ;;  %v456_v62 = vsel %vm446_vm0, %v435_v47, %v436_v56 }
  0xae   : > { %1814 = vperm.xlu1 %5764, %v1660_v0   ;;  %975 = vperm.xlu0 %5763, %v917_v60  }
  0xb2   : > { %639 = vperm.xlu1 %5764, %v461_v6   ;;  %1819 = vperm.xlu0 %5763, %v1659_v54   ;;  %v798_v6 = vsel %vm788_vm1, %v777_v55, %v778_v57 }
  0xb6   : > { %980 = vperm.xlu1 %5764, %v803_v59   ;;  %644 = vperm.xlu0 %5763, %v460_v7   ;;  %v1289_v7 = vrot.slane %v6572_v41, 1 }
  0xb8   : > { %v1312_v21 = vsel %vm1301_vm5, %v1289_v7, %v1290_v15 }
  0xba   : > { %1142 = vperm.xlu1 %5764, %v6464_v27   ;;  %985 = vperm.xlu0 %5763, %v802_v14   ;;  %v1658_v27 = vsel %vm1642_vm4, %v1625_v61, %v1626_v20  ;;  %v799_v61 = vsel %vm788_vm1, %v776_v48, %v777_v55  ;;  %v1313_v14 = vsel %vm1301_vm5, %v1288_v26, %v1289_v7 }
  0xbb   : > { %v1770_v31 = vsel %vm1722_vm11, %v1658_v27, 0.0  ;;  %v797_v48 = vsel %vm788_vm1, %v778_v57, %v779_v43 }
  0xbe   : > { %1152 = vperm.xlu1 %5764, %v6506_v50   ;;  %1147 = vperm.xlu0 %5763, %v6478_v39   ;;  %v1657_v39 = vsel %vm1642_vm4, %v1626_v20, %v1627_v34  ;;  %v1311_v20 = vsel %vm1301_vm5, %v1290_v15, %v1291_v16 }
  0xc2   : > { %1483 = vperm.xlu1 %5764, %v1429_v5   ;;  %1157 = vperm.xlu0 %5763, %v6518_v58   ;;  %v390_v5 = vadd.s32 128, %v6299_v2 }
  0xc4   : > { %v414_v26 = vand.u32 63, %v390_v5  ;;  %v389_v5 = vadd.s32 120, %v6299_v2 }
  0xc6   : > { %1493 = vperm.xlu1 %5764, %v1315_v23   ;;  %1488 = vperm.xlu0 %5763, %v1316_v24   ;;  %v1630_v23 = vrot.slane %v6572_v41, 2  ;;  %v1292_v24 = vrot.slane %v6640_v3, 1 }
  0xc8   : > { %v1654_v34 = vsel %vm1642_vm4, %v1629_v40, %v1630_v23  ;;  %v1310_v36 = vsel %vm1301_vm5, %v1291_v16, %v1292_v24 }
  0xca   : > { %1824 = vperm.xlu1 %5764, %v1770_v31   ;;  %1498 = vperm.xlu0 %5763, %v1314_v32   ;;  %v6659_v32 = vld [vmem:[%s6305_s20 + $0x80] sm:$0xff] }
  0xcb   : > { %v438_v30 = vrot.slane %v6659_v32, 6  ;;  %v1634_v29 = vrot.slane %v6659_v32, 2 }
  0xce   : > { %1834 = vperm.xlu1 %5764, %v1656_v37   ;;  %1829 = vperm.xlu0 %5763, %v1657_v39   ;;  %v437_v37 = vrot.slane %v6640_v3, 6  ;;  %v1631_v39 = vrot.slane %v6583_v45, 2 }
  0xd0   : > { %v1653_v40 = vsel %vm1642_vm4, %v1630_v23, %v1631_v39  ;;  %v454_v12 = vsel %vm446_vm0, %v437_v37, %v438_v30 }
  0xd1   : > { %v6585_v4 = vpop.permute.xlu1 %604  ;;  %v6587_v44 = vpop.permute.xlu0 %599 }
  0xd2   : > { %649 = vperm.xlu1 %5764, %v459_v33   ;;  %1839 = vperm.xlu0 %5763, %v1655_v42  }
  0xd5   : > { %v6598_v50 = vpop.permute.xlu1 %704  ;;  %v6600_v51 = vpop.permute.xlu0 %709 }
  0xd6   : > { %990 = vperm.xlu1 %5764, %v801_v38   ;;  %654 = vperm.xlu0 %5763, %v458_v46   ;;  %v829_v38 = vadd.s32 4294967295, %v414_v26 }
  0xd8   : > { %vm853_vm13 = vcmp.ge.s32.totalorder %v829_v38, 0 }
  0xd9   : > { %v6608_v58 = vpop.permute.xlu1 %945  ;;  %v6610_v60 = vpop.permute.xlu0 %940 }
  0xda   : > { %659 = vperm.xlu1 %5764, %v457_v52   ;;  %995 = vperm.xlu0 %5763, %v800_v53   ;;  %v1632_v53 = vrot.slane %v6596_v49, 2 }
  0xdd   : > { %v6617_v63 = vpop.permute.xlu1 %935  ;;  %v6619_v0 = vpop.permute.xlu0 %594 }
  0xde   : > { %1000 = vperm.xlu1 %5764, %v799_v61   ;;  %664 = vperm.xlu0 %5763, %v456_v62  }
  0xe1   : > { %v6623_v54 = vpop.permute.xlu1 %1050  ;;  %v6625_v59 = vpop.permute.xlu0 %1045 }
  0xe2   : > { %1162 = vperm.xlu1 %5764, %v6551_v22   ;;  %1005 = vperm.xlu0 %5763, %v798_v6   ;;  %v455_v22 = vsel %vm446_vm0, %v436_v56, %v437_v37  ;;  %v6694_v56 = vld [vmem:[%s6305_s20 + $0x88] sm:$0xff]  ;;  %v1652_v6 = vsel %vm1642_vm4, %v1631_v39, %v1632_v53  ;;  %v413_v37 = vand.u32 63, %v389_v5  ;;  %v371_v39 = vld [vmem:[%s8395_s2] sm:$0x7] }
  0xe3   : > { %v439_v57 = vrot.slane %v6694_v56, 6  ;;  %v781_v23 = vrot.slane %v6694_v56, 7 }
  0xe4   : > { %v1341_v38 = vadd.s32 1, %v413_v37 }
  0xe5   : > { %v6629_v8 = vpop.permute.xlu1 %614  ;;  %v6631_v9 = vpop.permute.xlu0 %609 }
  0xe6   : > { %1172 = vperm.xlu1 %5764, %v6583_v45   ;;  %1167 = vperm.xlu0 %5763, %v6572_v41   ;;  %v487_v41 = vadd.s32 4294967294, %v414_v26  ;;  %v780_v45 = vrot.slane %v6659_v32, 7  ;;  %vm1389_vm14 = vcmp.lt.s32.totalorder %v1341_v38, 64  ;;  %v1635_v38 = vrot.slane %v6694_v56, 2 }
  0xe8   : > { %vm511_vm12 = vcmp.ge.s32.totalorder %v487_v41, 0  ;;  %v796_v55 = vsel %vm788_vm1, %v779_v43, %v780_v45 }
  0xe9   : > { %v6643_v18 = vpop.permute.xlu1 %955  ;;  %v6645_v19 = vpop.permute.xlu0 %950  ;;  %v583_v52 = vsel %vm511_vm12, %v454_v12, 0.0  ;;  %v925_v7 = vsel %vm853_vm13, %v796_v55, 0.0  ;;  %v1293_v12 = vrot.slane %v6659_v32, 1 }
  0xea   : > { %1503 = vperm.xlu1 %5764, %v1313_v14   ;;  %1177 = vperm.xlu0 %5763, %v6596_v49   ;;  %v1633_v49 = vrot.slane %v6640_v3, 2  ;;  %v6705_v14 = vld [vmem:[%s6305_s20 + $0x90] sm:$0xff] }
  0xeb   : > { %v8413_v26 = vrot.slane %v6705_v14, 6  ;;  %v1636_v1 = vrot.slane %v6705_v14, 2 }
  0xed   : > { %v6654_v27 = vpop.permute.xlu1 %1112  ;;  %v6656_v31 = vpop.permute.xlu0 %1107  ;;  %v452_v41 = vsel %vm446_vm0, %v439_v57, %v8413_v26 }
  0xee   : > { %1513 = vperm.xlu1 %5764, %v1311_v20   ;;  %1508 = vperm.xlu0 %5763, %v1312_v21   ;;  %v453_v20 = vsel %vm446_vm0, %v438_v30, %v439_v57  ;;  %v1651_v21 = vsel %vm1642_vm4, %v1632_v53, %v1633_v49  ;;  %v795_v30 = vsel %vm788_vm1, %v780_v45, %v781_v23  ;;  %v8411_v53 = vsub.s32 1, %v6299_v2  ;;  %v6747_v57 = vld [vmem:[%s6305_s20 + $0x98] sm:$0xff] }
  0xef   : > { %v1227_v45 = vsub.s32 2, %v6299_v2 }
  0xf1   : > { %v6672_v33 = vpop.permute.xlu1 %1217  ;;  %v6674_v42 = vpop.permute.xlu0 %1117 }
  0xf2   : > { %1844 = vperm.xlu1 %5764, %v1654_v34   ;;  %1518 = vperm.xlu0 %5763, %v1310_v36  }
  0xf5   : > { %v6684_v46 = vpop.permute.xlu1 %619  ;;  %v6686_v47 = vpop.permute.xlu0 %1222 }
  0xf6   : > { %669 = vperm.xlu1 %5764, %v455_v22   ;;  %1849 = vperm.xlu0 %5763, %v1653_v40   ;;  %v8412_v22 = vrot.slane %v6705_v14, 7 }
  0xf8   : > { %v794_v55 = vsel %vm788_vm1, %v781_v23, %v8412_v22 }
  0xf9   : > { %v6696_v61 = vpop.permute.xlu1 %960  ;;  %v6698_v62 = vpop.permute.xlu0 %624 }
  0xfa   : > { %1010 = vperm.xlu1 %5764, %v797_v48   ;;  %674 = vperm.xlu0 %5763, %v583_v52   ;;  %v591_v48 = vunpack.c.l.bf16 %v371_v39  ;;  %v8409_v52 = vsub.s32 0, %v6299_v2  ;;  %v1294_v39 = vrot.slane %v6694_v56, 1 }
  0xfc   : > { %v6759_v23 = vrot.slane %v591_v48, %v8409_v52  ;;  %v6767_v17 = vrot.slane %v591_v48, %v1227_v45 }
  0xfd   : > { %v6707_v15 = vpop.permute.xlu1 %1122  ;;  %v6709_v16 = vpop.permute.xlu0 %965 }
  0xfe   : > { %1854 = vperm.xlu1 %5764, %v1652_v6   ;;  %1015 = vperm.xlu0 %5763, %v925_v7   ;;  %v1568_v6 = vsub.s32 3, %v6299_v2  ;;  %v1909_v7 = vsub.s32 4, %v6299_v2  ;;  %v1251_v25 = vmul.f32 %v6767_v17, %v6672_v33 }
 0x100   : > { %v6772_v35 = vrot.slane %v591_v48, %v1568_v6  ;;  %v6774_v13 = vrot.slane %v591_v48, %v1909_v7  ;;  %v1229_v7 = vmul.f32 %v6767_v17, %v6656_v31 }
 0x101   : > { %v6720_v34 = vpop.permute.xlu1 %1448  ;;  %v6722_v36 = vpop.permute.xlu0 %1127 }
 0x102   : > { %679 = vperm.xlu1 %5764, %v453_v20   ;;  %1859 = vperm.xlu0 %5763, %v1651_v21   ;;  %v1309_v21 = vsel %vm1301_vm5, %v1292_v24, %v1293_v12  ;;  %v8416_v24 = vrot.slane %v6747_v57, 6 }
 0x103   : > { %v1437_v52 = vsel %vm1389_vm14, %v1309_v21, 0.0  ;;  %v8435_v21 = vrot.slane %v6747_v57, 1 }
 0x105   : > { %v6734_v40 = vpop.permute.xlu1 %1458  ;;  %v1454_v43 = vpop.permute.xlu0 %1453 }
 0x106   : > { %1020 = vperm.xlu1 %5764, %v795_v30   ;;  %684 = vperm.xlu0 %5763, %v452_v41   ;;  %v1295_v30 = vrot.slane %v6705_v14, 1  ;;  %v6763_v41 = vrot.slane %v591_v48, %v8411_v53  ;;  %v1682_v48 = vadd.s32 2, %v413_v37  ;;  %v1230_v37 = vmul.f32 %v6767_v17, %v6654_v27 }
 0x108   : > { %v1057_v53 = vmul.f32 %v6763_v41, %v6617_v63  ;;  %v1307_v26 = vsel %vm1301_vm5, %v1294_v39, %v1295_v30  ;;  %v1058_v6 = vmul.f32 %v6763_v41, %v6610_v60  ;;  %v1308_v63 = vsel %vm1301_vm5, %v1293_v12, %v1294_v39 }
 0x109   : > { %v6749_v5 = vpop.permute.xlu1 %1563  ;;  %v1559_v20 = vpop.permute.xlu0 %1558  ;;  %v6803_v60 = vsel %vm1301_vm5, %v1295_v30, %v8435_v21  ;;  %v1079_v30 = vmul.f32 %v6763_v41, %v6625_v59  ;;  %v1570_v21 = vmul.f32 %v6772_v35, %v6720_v34  ;;  %v1571_v59 = vmul.f32 %v6772_v35, %v1454_v43 }
 0x10a   : > { %1182 = vperm.xlu1 %5764, %v6640_v3   ;;  %1025 = vperm.xlu0 %5763, %v794_v55   ;;  %v716_v55 = vmul.f32 %v6759_v23, %v6619_v0  ;;  %v1650_v0 = vsel %vm1642_vm4, %v1633_v49, %v1634_v29  ;;  %v6811_v3 = vsel %vm1642_vm4, %v1634_v29, %v1635_v38  ;;  %vm1730_vm15 = vcmp.lt.s32.totalorder %v1682_v48, 64 }
 0x10b   : > { %v1059_v49 = vmul.f32 %v6763_v41, %v6608_v58  ;;  %v738_v34 = vmul.f32 %v6759_v23, %v6598_v50 }
 0x10c   : > { %v1081_v39 = vadd.f32 %v1057_v53, %v716_v55  ;;  %v718_v53 = vmul.f32 %v6759_v23, %v6585_v4  ;;  %v8437_v4 = vrot.slane %v6747_v57, 2 }
 0x10d   : > { %v6780_v22 = vpop.permute.xlu1 %1137  ;;  %v6782_v45 = vpop.permute.xlu0 %1132  ;;  %v1103_v50 = vadd.f32 %v1079_v30, %v738_v34  ;;  %v1080_v30 = vmul.f32 %v6763_v41, %v6623_v54  ;;  %v6862_v34 = vld [vmem:[#allocation7] ss:$0 sm:$0xff]  ;;  %v1252_v54 = vmul.f32 %v6767_v17, %v6686_v47 }
 0x10e   : > { %1192 = vperm.xlu1 %5764, %v6694_v56   ;;  %1187 = vperm.xlu0 %5763, %v6659_v32   ;;  %v6807_v32 = vsel %vm1642_vm4, %v1635_v38, %v1636_v1  ;;  %v717_v56 = vmul.f32 %v6759_v23, %v6587_v44  ;;  %v8436_v44 = vrot.slane %v6705_v14, 6  ;;  %v1253_v12 = vadd.f32 %v1229_v7, %v1081_v39 }
 0x10f   : > { %v6848_v43 = vsel %vm1642_vm4, %v1636_v1, %v8437_v4  ;;  %v1592_v39 = vmul.f32 %v6772_v35, %v1559_v20  ;;  %v1778_v1 = vsel %vm1730_vm15, %v1650_v0, 0.0  ;;  %vm2772_vm15 = vcmask 523264  }
 0x110   : > { %v6832_v58 = vsel %vm446_vm0, %v8436_v44, %v8416_v24  ;;  %v1082_v55 = vadd.f32 %v1058_v6, %v717_v56  ;;  %v1231_v44 = vmul.f32 %v6767_v17, %v6674_v42  ;;  %v1083_v24 = vadd.f32 %v1059_v49, %v718_v53  ;;  %v6852_v6 = vld [vmem:[%s6305_s20 + $0xa0] sm:$0xff] }
 0x111   : > { %v6824_v29 = vpop.permute.xlu1 %1468  ;;  %v1464_v38 = vpop.permute.xlu0 %1463  ;;  %v1594_v7 = vadd.f32 %v1570_v21, %v1253_v12  ;;  %v1572_v56 = vmul.f32 %v6772_v35, %v6734_v40  ;;  %v1275_v12 = vadd.f32 %v1251_v25, %v1103_v50  ;;  %v442_v40 = vrot.slane %v6852_v6, 6 }
 0x112   : > { %1523 = vperm.xlu1 %5764, %v1437_v52   ;;  %1197 = vperm.xlu0 %5763, %v6705_v14   ;;  %v1254_v28 = vadd.f32 %v1230_v37, %v1082_v55  ;;  %v783_v52 = vrot.slane %v6747_v57, 7  ;;  %v1255_v21 = vadd.f32 %v1231_v44, %v1083_v24  ;;  %v1060_v25 = vmul.f32 %v6763_v41, %v6645_v19 }
 0x113   : > { %v1616_v0 = vadd.f32 %v1592_v39, %v1275_v12  ;;  %v719_v19 = vmul.f32 %v6759_v23, %v6631_v9  ;;  %v1573_v9 = vmul.f32 %v6772_v35, %v1464_v38  ;;  %v1233_v38 = vmul.f32 %v6767_v17, %v6722_v36 }
 0x114   : > { %v1595_v37 = vadd.f32 %v1571_v59, %v1254_v28  ;;  %v739_v28 = vmul.f32 %v6759_v23, %v6600_v51  ;;  %v1596_v24 = vadd.f32 %v1572_v56, %v1255_v21  ;;  %v1593_v56 = vmul.f32 %v6772_v35, %v6749_v5 }
 0x115   : > { %v1795_v11 = vpop.permute.xlu1 %1794  ;;  %v1790_v49 = vpop.permute.xlu0 %1789 }
 0x116   : > { %v1912_v53 = vmul.f32 %v6774_v13, %v1795_v11  ;;  %v1911_v55 = vmul.f32 %v6774_v13, %v1790_v49  ;;  %1533 = vperm.xlu1 %5764, %v1307_v26   ;;  %1528 = vperm.xlu0 %5763, %v1308_v63   ;;  %v8438_v26 = vrot.slane %v6705_v14, 7  ;;  %v1104_v50 = vadd.f32 %v1080_v30, %v739_v28 }
 0x118   : > { %v1936_v20 = vadd.f32 %v1912_v53, %v1595_v37  ;;  %v1935_v11 = vadd.f32 %v1911_v55, %v1594_v7  ;;  %v6873_v63 = vsel %vm788_vm1, %v8438_v26, %v783_v52  ;;  %v1232_v7 = vmul.f32 %v6767_v17, %v6707_v15 }
 0x119   : > { %v1900_v48 = vpop.permute.xlu1 %1899  ;;  %v1800_v51 = vpop.permute.xlu0 %1799  ;;  %v1061_v55 = vmul.f32 %v6763_v41, %v6643_v18  ;;  %v1276_v30 = vadd.f32 %v1252_v54, %v1104_v50  ;;  %v784_v50 = vrot.slane %v6852_v6, 7 }
 0x11a   : > { %v1960_v59 = vadd.f32 %v1936_v20, %v6862_v34  ;;  %v1959_v44 = vadd.f32 %v1935_v11, %v6862_v34  ;;  %v1933_v14 = vmul.f32 %v6774_v13, %v1900_v48  ;;  %v1913_v4 = vmul.f32 %v6774_v13, %v1800_v51  ;;  %1864 = vperm.xlu1 %5764, %v1778_v1  }
 0x11b   : > { %1538 = vperm.xlu0 %5763, %v6803_v60   ;;  %v1084_v1 = vadd.f32 %v1060_v25, %v719_v19  ;;  %v1617_v18 = vadd.f32 %v1593_v56, %v1276_v30  ;;  %v1062_v19 = vmul.f32 %v6763_v41, %v6696_v61 }
 0x11c   : > { %v1984_v39 = vadd.f32 %v1960_v59, %v6654_v27  ;;  %v1983_v49 = vadd.f32 %v1959_v44, %v6656_v31  ;;  %v1957_v37 = vadd.f32 %v1933_v14, %v1616_v0  ;;  %v1937_v53 = vadd.f32 %v1913_v4, %v1596_v24 }
 0x11d   : > { %v6895_v12 = vpop.permute.xlu1 %1473  ;;  %v1905_v21 = vpop.permute.xlu0 %1904  ;;  %v720_v31 = vmul.f32 %v6759_v23, %v6629_v8  ;;  %v1256_v20 = vadd.f32 %v1232_v7, %v1084_v1  ;;  %v5885_v1 = vld [vmem:[%s8396_s3] sm:$0xff]  }
 0x11e   : > { %v2008_v28 = vmax.f32 %v1984_v39, 0.0  ;;  %v2007_v5 = vmax.f32 %v1983_v49, 0.0  ;;  %v1981_v60 = vadd.f32 %v1957_v37, %v6862_v34  ;;  %v1961_v27 = vadd.f32 %v1937_v53, %v6862_v34  ;;  %1874 = vperm.xlu1 %5764, %v6807_v32   ;;  %2889 = vmatpush1.bf16.msra.mxu0 %v5885_v1 }
 0x11f   : > { %v1934_v11 = vmul.f32 %v6774_v13, %v1905_v21  ;;  %1869 = vperm.xlu0 %5763, %v6811_v3   ;;  %v1085_v24 = vadd.f32 %v1061_v55, %v720_v31  ;;  %v1574_v32 = vmul.f32 %v6772_v35, %v6824_v29  ;;  %v1597_v59 = vadd.f32 %v1573_v9, %v1256_v20 }
 0x120   : > { %v2032_v26 = vrot.slane %v2008_v28, 1  ;;  %v2031_v25 = vrot.slane %v2007_v5, 1  ;;  %v6907_v54 = vadd.f32 %v1961_v27, %v6674_v42  ;;  %v2005_v8 = vadd.f32 %v1981_v60, %v6672_v33 }
 0x121   : > { %v1958_v0 = vadd.f32 %v1934_v11, %v1617_v18  ;;  %v1805_v48 = vpop.permute.xlu1 %1804  ;;  %v6912_v51 = vpop.permute.xlu0 %1478  ;;  %v8439_v33 = vrot.slane %v6747_v57, 6  ;;  %v1257_v7 = vadd.f32 %v1233_v38, %v1085_v24  ;;  %v8440_v55 = vrot.slane %v6322_v10, 6 }
 0x122   : > { %v2077_v3 = vsel %vm1301_vm5, %v2031_v25, %v2032_v26  ;;  %v2009_v44 = vmax.f32 %v6907_v54, 0.0  ;;  %v1914_v14 = vmul.f32 %v6774_v13, %v1805_v48  ;;  %689 = vperm.xlu1 %5764, %v6832_v58   ;;  %v2029_v39 = vmax.f32 %v2005_v8, 0.0 }
 0x123   : > { %v2079_v42 = vmax.f32 %v2007_v5, %v2077_v3  ;;  %v1982_v4 = vadd.f32 %v1958_v0, %v6862_v34  ;;  %1879 = vperm.xlu0 %5763, %v6848_v43   ;;  %v450_v29 = vsel %vm446_vm0, %v8439_v33, %v442_v40  ;;  %v721_v43 = vmul.f32 %v6759_v23, %v6684_v46 }
 0x124   : > { %v2033_v58 = vrot.slane %v2009_v44, 1  ;;  %v1938_v56 = vadd.f32 %v1914_v14, %v1597_v59  ;;  %v449_v61 = vsel %vm446_vm0, %v442_v40, %v8440_v55  ;;  %v1598_v46 = vadd.f32 %v1574_v32, %v1257_v7 }
 0x125   : > { %2104 = vst.msk [vmem:[#allocation2] sm:$0xff] %vm2103_vm2, %v2079_v42  ;;  %v2006_v49 = vadd.f32 %v1982_v4, %v6686_v47  ;;  %v6936_v37 = vpop.permute.xlu1 %629  ;;  %v1810_v53 = vpop.permute.xlu0 %1809  ;;  %v1234_v21 = vmul.f32 %v6767_v17, %v6782_v45  ;;  %v792_v40 = vsel %vm788_vm1, %v783_v52, %v784_v50  ;;  %v1086_v27 = vadd.f32 %v1062_v19, %v721_v43 }
 0x126   : > { %v2076_v30 = vsel %vm1301_vm5, %v2032_v26, %v2033_v58  ;;  %v1962_v47 = vadd.f32 %v1938_v56, %v6862_v34  ;;  %v1915_v9 = vmul.f32 %v6774_v13, %v1810_v53  ;;  %1030 = vperm.xlu1 %5764, %v6873_v63   ;;  %v8441_v18 = vrot.slane %v6322_v10, 7  ;;  %v5886_v10 = vld [vmem:[%s8396_s3 + $0x8] sm:$0xff]  }
 0x127   : > { %v2080_v5 = vmax.f32 %v2008_v28, %v2076_v30  ;;  %v2030_v60 = vmax.f32 %v2006_v49, 0.0  ;;  %694 = vperm.xlu0 %5763, %v450_v29   ;;  %v8442_v11 = vmov 0   ;;  %v1063_v28 = vmul.f32 %v6763_v41, %v6709_v16  ;;  %v7010_v49 = vld [vmem:[%s6305_s20 + $0xa8] sm:$0xff]  ;;  %s6161_s20 = smov 32  }
 0x128   : > { %v1986_v31 = vadd.f32 %v1962_v47, %v6707_v15  ;;  %v1939_v20 = vadd.f32 %v1915_v9, %v1598_v46  ;;  %v791_v63 = vsel %vm788_vm1, %v784_v50, %v8441_v18  ;;  %2890 = vmatprep.subr.bf16.mxu0 %v8442_v11  ;;  %v6966_v38 = vrot.slane %v2029_v39, 1  ;;  %v5888_v46 = vld [vmem:[%s8396_s3 + $0x18] sm:$0xff]  }
 0x129   : > { %2105 = vst.msk [vmem:[#allocation2 + $0x8] sm:$0xff] %vm2103_vm2, %v2080_v5  ;;  %v1575_v52 = vmul.f32 %v6772_v35, %v6895_v12  ;;  %v2054_v26 = vrot.slane %v2030_v60, 1  ;;  %v6971_v15 = vpop.permute.xlu1 %970  ;;  %v6973_v24 = vpop.permute.xlu0 %634  ;;  %v722_v32 = vmul.f32 %v6759_v23, %v6698_v62  ;;  %v1235_v16 = vmul.f32 %v6767_v17, %v6780_v22  ;;  %2891 = vmatpush1.bf16.msra.mxu0 %v5886_v10 }
 0x12a   : > { %v2010_v8 = vmax.f32 %v1986_v31, 0.0  ;;  %v1963_v0 = vadd.f32 %v1939_v20, %v6862_v34  ;;  %699 = vperm.xlu1 %5764, %v449_v61   ;;  %v1258_v12 = vadd.f32 %v1234_v21, %v1086_v27  ;;  %2892 = vmatprep.subr.bf16.mxu0 %v8442_v11  ;;  %v1576_v19 = vmul.f32 %v6772_v35, %v6912_v51 }
 0x12b   : > { %v2055_v48 = vsel %vm1301_vm5, %v6966_v38, %v2054_v26  ;;  %v2078_v59 = vsel %vm1301_vm5, %v2054_v26, %v2031_v25  ;;  %1035 = vperm.xlu0 %5763, %v792_v40   ;;  %v1087_v4 = vadd.f32 %v1063_v28, %v722_v32  ;;  %v5887_v25 = vld [vmem:[%s8396_s3 + $0x10] sm:$0xff]   ;;  %v1298_v53 = vrot.slane %v7010_v49, 1 }
 0x12c   : > { %v2101_v3 = vmax.f32 %v2029_v39, %v2055_v48  ;;  %v2102_v14 = vmax.f32 %v2030_v60, %v2078_v59  ;;  %v2034_v62 = vrot.slane %v2010_v8, 1  ;;  %v6989_v42 = vadd.f32 %v1963_v0, %v6722_v36  ;;  %v8445_v48 = vld [vmem:[#allocation11_spill] sm:$0xff] }
 0x12d   : > { %v1599_v33 = vadd.f32 %v1575_v52, %v1258_v12  ;;  %v1815_v29 = vpop.permute.xlu1 %1814  ;;  %v6992_v50 = vpop.permute.xlu0 %975  ;;  %v1297_v39 = vrot.slane %v6852_v6, 1  ;;  %2893 = vmatpush1.bf16.msra.mxu0 %v5887_v25  ;;  %v2172_v61 = vand.u32 31, %v6299_v2  ;;  %v1638_v1 = vrot.slane %v6852_v6, 2 }
 0x12e   : > { %2126 = vst.msk [vmem:[#allocation2 + $0xb0] sm:$0xff] %vm2103_vm2, %v2101_v3  ;;  %2127 = vst.msk [vmem:[#allocation2 + $0xb8] sm:$0xff] %vm2103_vm2, %v2102_v14  ;;  %v2075_v36 = vsel %vm1301_vm5, %v2033_v58, %v2034_v62  ;;  %v2011_v7 = vmax.f32 %v6989_v42, 0.0  ;;  %v1916_v56 = vmul.f32 %v6774_v13, %v1815_v29  ;;  %1202 = vperm.xlu1 %5764, %v6747_v57   ;;  %2894 = vmatprep.subr.bf16.mxu0 %v8442_v11 }
 0x12f   : > { %v2081_v43 = vmax.f32 %v2009_v44, %v2075_v36  ;;  %1040 = vperm.xlu0 %5763, %v791_v63   ;;  %v1259_v58 = vadd.f32 %v1235_v16, %v1087_v4  ;;  %v7025_v30 = vadd.s32 88, %v6299_v2  ;;  %v1304_v40 = vsel %vm1301_vm5, %v1297_v39, %v1298_v53 }
 0x130   : > { %v2035_v51 = vrot.slane %v2011_v7, 1  ;;  %v1940_v55 = vadd.f32 %v1916_v56, %v1599_v33  ;;  %v8443_v20 = vrot.slane %v6747_v57, 1  ;;  %v7040_v63 = vld [vmem:[#allocation2] ss:$2 sm:$0xff]  ;;  %v2208_v28 = vadd.s32 4294967294, %v2172_v61 }
 0x131   : > { %2106 = vst.msk [vmem:[#allocation2 + $0x10] sm:$0xff] %vm2103_vm2, %v2081_v43  ;;  %v7018_v54 = vpop.permute.xlu1 %639  ;;  %v1820_v44 = vpop.permute.xlu0 %1819  ;;  %v1600_v47 = vadd.f32 %v1576_v19, %v1259_v58  ;;  %2895 = vmatpush1.bf16.msra.mxu0 %v5888_v46  ;;  %v8424_v10 = vand.u32 31, %v7025_v30  ;;  %v2316_v12 = vadd.s32 4294967295, %v2172_v61  ;;  %v8446_v59 = vrot.slane %v8445_v48, 1  ;;  %v5890_v19 = vld [vmem:[%s8396_s3 + $0x28] sm:$0xff]  }
 0x132   : > { %v2074_v9 = vsel %vm1301_vm5, %v2034_v62, %v2035_v51  ;;  %v1964_v21 = vadd.f32 %v1940_v55, %v6862_v34  ;;  %v1917_v5 = vmul.f32 %v6774_v13, %v1820_v44  ;;  %1212 = vperm.xlu1 %5764, %v7010_v49   ;;  %v1305_v18 = vsel %vm1301_vm5, %v8443_v20, %v1297_v39 }
 0x133   : > { %v2082_v60 = vmax.f32 %v2010_v8, %v2074_v9  ;;  %1207 = vperm.xlu0 %5763, %v6852_v6   ;;  %2896 = vmatprep.subr.bf16.mxu0 %v8442_v11  ;;  %v8444_v8 = vrot.slane %v6747_v57, 2  ;;  %v1303_v3 = vsel %vm1301_vm5, %v1298_v53, %v8446_v59  ;;  %v1639_v14 = vrot.slane %v7010_v49, 2 }
 0x134   : > { %v1988_v27 = vadd.f32 %v1964_v21, %v6782_v45  ;;  %v1941_v31 = vadd.f32 %v1917_v5, %v1600_v47  ;;  %v5889_v45 = vld [vmem:[%s8396_s3 + $0x20] sm:$0xff]   ;;  %v2184_v62 = vrot.slane %v7040_v63, 6  ;;  %vm2220_vm3 = vcmp.ge.s32.totalorder %v2208_v28, 0 }
 0x135   : > { %2107 = vst.msk [vmem:[#allocation2 + $0x18] sm:$0xff] %vm2103_vm2, %v2082_v60  ;;  %v7044_v6 = vpop.permute.xlu1 %980  ;;  %v7046_v52 = vpop.permute.xlu0 %644  ;;  %v7048_v26 = vld [vmem:[#allocation2 + $0xb0] ss:$2 sm:$0xff]  ;;  %v1646_v0 = vsel %vm1642_vm4, %v8444_v8, %v1638_v1  ;;  %2897 = vmatpush1.bf16.msra.mxu0 %v5889_v45  ;;  %v2292_v49 = vrot.slane %v7040_v63, 7  ;;  %v8447_v55 = vrot.slane %v8445_v48, 2  ;;  %vm2328_vm6 = vcmp.ge.s32.totalorder %v2316_v12, 0 }
 0x136   : > { %v2012_v32 = vmax.f32 %v1988_v27, 0.0  ;;  %v1965_v16 = vadd.f32 %v1941_v31, %v6862_v34  ;;  %1548 = vperm.xlu1 %5764, %v1304_v40   ;;  %v8420_v4 = vrot.slane %v7048_v26, 6  ;;  %v8423_v29 = vrot.slane %v7048_v26, 7  ;;  %2898 = vmatprep.subr.bf16.mxu0 %v8442_v11 }
 0x137   : > { %1543 = vperm.xlu0 %5763, %v1305_v18   ;;  %v8421_v53 = vrot.slane %v7048_v26, 2  ;;  %v1644_v61 = vsel %vm1642_vm4, %v1639_v14, %v8447_v55  ;;  %v1645_v46 = vsel %vm1642_vm4, %v1638_v1, %v1639_v14  ;;  %v2508_v47 = vrot.slane %v7040_v63, 2  ;;  %v5891_v1 = vld [vmem:[%s8396_s3 + $0x30] sm:$0xff]  }
 0x138   : > { %v2036_v33 = vrot.slane %v2012_v32, 1  ;;  %v7067_v57 = vadd.f32 %v1965_v16, %v6780_v22  ;;  %v2207_v56 = vsel %vm446_vm0, %v8420_v4, %v2184_v62  ;;  %v2543_v22 = vadd.s32 2, %v8424_v10 }
 0x139   : > { %v7071_v25 = vpop.permute.xlu1 %1142  ;;  %v7073_v36 = vpop.permute.xlu0 %985  ;;  %2899 = vmatpush1.bf16.msra.mxu0 %v5890_v19  ;;  %v2531_v40 = vsel %vm1642_vm4, %v8421_v53, %v2508_v47  ;;  %v1064_v12 = vmul.f32 %v6763_v41, %v6971_v15  ;;  %v1065_v59 = vmul.f32 %v6763_v41, %v6992_v50  ;;  %v723_v14 = vmul.f32 %v6759_v23, %v6936_v37  ;;  %v5893_v37 = vld [vmem:[%s8396_s3 + $0x40] sm:$0xff]  }
 0x13a   : > { %v2073_v43 = vsel %vm1301_vm5, %v2035_v51, %v2036_v33  ;;  %v2013_v39 = vmax.f32 %v7067_v57, 0.0  ;;  %1884 = vperm.xlu1 %5764, %v1646_v0   ;;  %v7096_v51 = vsel %vm2220_vm3, %v2207_v56, 0.0  ;;  %2900 = vmatprep.subr.bf16.mxu0 %v8442_v11  ;;  %vm2567_vm7 = vcmp.lt.s32.totalorder %v2543_v22, 32 }
 0x13b   : > { %v2083_v58 = vmax.f32 %v2011_v7, %v2073_v43  ;;  %1553 = vperm.xlu0 %5763, %v1303_v3   ;;  %v2315_v7 = vsel %vm788_vm1, %v8423_v29, %v2292_v49  ;;  %v7143_v0 = vsel %vm2567_vm7, %v2531_v40, 0.0  ;;  %v1066_v3 = vmul.f32 %v6763_v41, %v7044_v6 }
 0x13c   : > { %v7100_v44 = vrot.slane %v2013_v39, 1  ;;  %v7104_v42 = vld [vmem:[#allocation2 + $0x10] ss:$2 sm:$0xff]  ;;  %v2388_v20 = vsel %vm2328_vm6, %v2315_v7, 0.0  ;;  %v1236_v15 = vmul.f32 %v6767_v17, %v7071_v25  ;;  %v725_v50 = vmul.f32 %v6759_v23, %v7018_v54 }
 0x13d   : > { %2108 = vst.msk [vmem:[#allocation2 + $0x20] sm:$0xff] %vm2103_vm2, %v2083_v58  ;;  %v7113_v9 = vpop.permute.xlu1 %1152  ;;  %v7115_v21 = vpop.permute.xlu0 %1147  ;;  %v2293_v5 = vrot.slane %v7104_v42, 7  ;;  %v5770_v18 = vpack.i.bf16 %v7104_v42, %v7040_v63  ;;  %2901 = vmatpush1.bf16.msra.mxu0 %v5891_v1  ;;  %v2185_v45 = vrot.slane %v7104_v42, 6  ;;  %v1088_v56 = vadd.f32 %v1064_v12, %v723_v14 }
 0x13e   : > { %v2072_v60 = vsel %vm1301_vm5, %v2036_v33, %v7100_v44  ;;  %1894 = vperm.xlu1 %5764, %v1644_v61   ;;  %2902 = vmatprep.subr.bf16.mxu0 %v8442_v11  ;;  %v2509_v33 = vrot.slane %v7104_v42, 2  ;;  %v1238_v22 = vmul.f32 %v6767_v17, %v7113_v9  ;;  %v1090_v58 = vadd.f32 %v1066_v3, %v725_v50 }
 0x13f   : > { %v2084_v27 = vmax.f32 %v2012_v32, %v2072_v60  ;;  %1889 = vperm.xlu0 %5763, %v1645_v46   ;;  %v2314_v31 = vsel %vm788_vm1, %v2292_v49, %v2293_v5  ;;  %v5892_v32 = vld [vmem:[%s8396_s3 + $0x38] sm:$0xff]   ;;  %v7150_v48 = vsel %vm446_vm0, %v2184_v62, %v2185_v45  ;;  %v724_v62 = vmul.f32 %v6759_v23, %v6973_v24 }
 0x140   : > { %v5765_v28 = vpack.i.bf16 %v2314_v31, %v2388_v20  ;;  %v2401_v49 = vrot.slane %v7104_v42, 1  ;;  %v1237_v54 = vmul.f32 %v6767_v17, %v7115_v21  ;;  %v8422_v55 = vrot.slane %v7040_v63, 1 }
 0x141   : > { %2109 = vst.msk [vmem:[#allocation2 + $0x28] sm:$0xff] %vm2103_vm2, %v2084_v27  ;;  %v1484_v16 = vpop.permute.xlu1 %1483  ;;  %v7137_v8 = vpop.permute.xlu0 %1157  ;;  %2903 = vmatpush1.bf16.msra.mxu0 %v5892_v32  ;;  %v1089_v24 = vadd.f32 %v1065_v59, %v724_v62  ;;  %v1260_v61 = vadd.f32 %v1236_v15, %v1088_v56  ;;  %v1067_v46 = vmul.f32 %v6763_v41, %v7073_v36  ;;  %v5894_v36 = vld [vmem:[%s8396_s3 + $0x48] sm:$0xff]   ;;  %vm2785_vm3 = vcmask 785408  }
 0x142   : > { %5771 = vrot.lane.b32.xlu1 %v5770_v18, %s6160_s12  ;;  %2904 = vmatprep.subr.bf16.mxu0 %v8442_v11  ;;  %v1577_v43 = vmul.f32 %v6772_v35, %v1484_v16  ;;  %v2530_v60 = vsel %vm1642_vm4, %v2508_v47, %v2509_v33  ;;  %v1262_v16 = vadd.f32 %v1238_v22, %v1090_v58 }
 0x143   : > { %5766 = vrot.lane.b32.xlu0 %v5765_v28, %s6161_s20  ;;  %v2422_v12 = vsel %vm1301_vm5, %v8422_v55, %v2401_v49  ;;  %v1261_v59 = vadd.f32 %v1237_v54, %v1089_v24 }
 0x144   : > { %v1601_v32 = vadd.f32 %v1577_v43, %v1260_v61 }
 0x145   : > { %v1494_v19 = vpop.permute.xlu1 %1493  ;;  %v1489_v6 = vpop.permute.xlu0 %1488  ;;  %2905 = vmatpush1.bf16.msra.mxu0 %v5893_v37 }
 0x146   : > { %v1579_v7 = vmul.f32 %v6772_v35, %v1494_v19  ;;  %v1578_v40 = vmul.f32 %v6772_v35, %v1489_v6  ;;  %2906 = vmatprep.subr.bf16.mxu0 %v8442_v11  ;;  %v726_v6 = vmul.f32 %v6759_v23, %v7046_v52 }
 0x148   : > { %v7180_v1 = vld [vmem:[#allocation2 + $0x20] ss:$2 sm:$0xff]  ;;  %v1603_v37 = vadd.f32 %v1579_v7, %v1262_v16  ;;  %v1602_v56 = vadd.f32 %v1578_v40, %v1261_v59  ;;  %v1091_v58 = vadd.f32 %v1067_v46, %v726_v6 }
 0x149   : > { %v1825_v27 = vpop.permute.xlu1 %1824  ;;  %v1499_v31 = vpop.permute.xlu0 %1498  ;;  %v2510_v20 = vrot.slane %v7180_v1, 2  ;;  %v2402_v18 = vrot.slane %v7180_v1, 1  ;;  %v2186_v28 = vrot.slane %v7180_v1, 6  ;;  %2907 = vmatpush1.bf16.msra.mxu0 %v5894_v36 }
 0x14a   : > { %v1918_v47 = vmul.f32 %v6774_v13, %v1825_v27  ;;  %v1580_v52 = vmul.f32 %v6772_v35, %v1499_v31 }
 0x14b   : > { %v2529_v3 = vsel %vm1642_vm4, %v2509_v33, %v2510_v20  ;;  %v2421_v14 = vsel %vm1301_vm5, %v2401_v49, %v2402_v18  ;;  %v7209_v15 = vsel %vm446_vm0, %v2185_v45, %v2186_v28  ;;  %v1239_v33 = vmul.f32 %v6767_v17, %v7137_v8 }
 0x14c   : > { %v1942_v62 = vadd.f32 %v1918_v47, %v1601_v32  ;;  %v2799_v50 = vpack.c.bf16 %v2529_v3, %v2530_v60  ;;  %v5775_v19 = vpack.i.bf16 %v2421_v14, %v2422_v12 }
 0x14d   : > { %v1835_v22 = vpop.permute.xlu1 %1834  ;;  %v1830_v43 = vpop.permute.xlu0 %1829  ;;  %v1263_v60 = vadd.f32 %v1239_v33, %v1091_v58  ;;  %v7259_v58 = vadd.s32 24, %v6299_v2 }
 0x14e   : > { %v1966_v49 = vadd.f32 %v1942_v62, %v6862_v34  ;;  %v1920_v24 = vmul.f32 %v6774_v13, %v1835_v22  ;;  %v1919_v45 = vmul.f32 %v6774_v13, %v1830_v43  ;;  %5321 = vmatprep.mubr.msk.bf16.mxu0 %vm2103_vm2, %v2799_v50  ;;  %5776 = vrot.lane.b32.xlu0 %v5775_v19, %s6162_s25 }
 0x14f   : > { %v1604_v47 = vadd.f32 %v1580_v52, %v1263_v60 }
 0x150   : > { %v1990_v54 = vadd.f32 %v1966_v49, %v7071_v25  ;;  %v1944_v61 = vadd.f32 %v1920_v24, %v1603_v37  ;;  %v1943_v7 = vadd.f32 %v1919_v45, %v1602_v56 }
 0x151   : > { %v7222_v40 = vpop.permute.xlu1 %649  ;;  %v1840_v27 = vpop.permute.xlu0 %1839 }
 0x152   : > { %v2014_v36 = vmax.f32 %v1990_v54, 0.0  ;;  %v1968_v16 = vadd.f32 %v1944_v61, %v6862_v34  ;;  %v1967_v32 = vadd.f32 %v1943_v7, %v6862_v34  ;;  %v1921_v12 = vmul.f32 %v6774_v13, %v1840_v27 }
 0x153   : > { %v7265_v61 = vadd.s32 32, %v6299_v2  ;;  %v2175_v27 = vand.u32 31, %v7259_v58 }
 0x154   : > { %v2038_v59 = vrot.slane %v2014_v36, 1  ;;  %v1992_v46 = vadd.f32 %v1968_v16, %v7113_v9  ;;  %v1991_v31 = vadd.f32 %v1967_v32, %v7115_v21  ;;  %v1945_v25 = vadd.f32 %v1921_v12, %v1604_v47 }
 0x155   : > { %v991_v3 = vpop.permute.xlu1 %990  ;;  %v7229_v14 = vpop.permute.xlu0 %654  ;;  %v2176_v32 = vand.u32 31, %v7265_v61 }
 0x156   : > { %v2071_v62 = vsel %vm1301_vm5, %v7100_v44, %v2038_v59  ;;  %v2016_v50 = vmax.f32 %v1992_v46, 0.0  ;;  %v2015_v19 = vmax.f32 %v1991_v31, 0.0  ;;  %v1969_v33 = vadd.f32 %v1945_v25, %v6862_v34 }
 0x157   : > { %v2085_v6 = vmax.f32 %v2013_v39, %v2071_v62  ;;  %v2427_v25 = vadd.s32 1, %v2175_v27  ;;  %v2212_v42 = vadd.s32 4294967294, %v2176_v32 }
 0x158   : > { %v2040_v37 = vrot.slane %v2016_v50, 1  ;;  %v2039_v56 = vrot.slane %v2015_v19, 1  ;;  %v7239_v9 = vadd.f32 %v1969_v33, %v7137_v8  ;;  %v2535_v33 = vadd.s32 2, %v2175_v27 }
 0x159   : > { %2110 = vst.msk [vmem:[#allocation2 + $0x30] sm:$0xff] %vm2103_vm2, %v2085_v6  ;;  %v7241_v21 = vpop.permute.xlu1 %659  ;;  %v996_v22 = vpop.permute.xlu0 %995  ;;  %vm2451_vm8 = vcmp.lt.s32.totalorder %v2427_v25, 32  ;;  %vm2224_vm10 = vcmp.ge.s32.totalorder %v2212_v42, 0 }
 0x15a   : > { %v2069_v44 = vsel %vm1301_vm5, %v2039_v56, %v2040_v37  ;;  %v2070_v43 = vsel %vm1301_vm5, %v2038_v59, %v2039_v56  ;;  %v2017_v49 = vmax.f32 %v7239_v9, 0.0  ;;  %vm2559_vm9 = vcmp.lt.s32.totalorder %v2535_v33, 32 }
 0x15b   : > { %v2086_v57 = vmax.f32 %v2014_v36, %v2070_v43  ;;  %v2087_v39 = vmax.f32 %v2015_v19, %v2069_v44  ;;  %v2294_v36 = vrot.slane %v7180_v1, 7 }
 0x15c   : > { %v7252_v8 = vrot.slane %v2017_v49, 1 }
 0x15d   : > { %2111 = vst.msk [vmem:[#allocation2 + $0x38] sm:$0xff] %vm2103_vm2, %v2086_v57  ;;  %2112 = vst.msk [vmem:[#allocation2 + $0x40] sm:$0xff] %vm2103_vm2, %v2087_v39  ;;  %v7254_v24 = vpop.permute.xlu1 %1000  ;;  %v7256_v45 = vpop.permute.xlu0 %664  ;;  %v2313_v19 = vsel %vm788_vm1, %v2293_v5, %v2294_v36 }
 0x15e   : > { %v2068_v52 = vsel %vm1301_vm5, %v2040_v37, %v7252_v8  ;;  %v1068_v37 = vmul.f32 %v6763_v41, %v991_v3  ;;  %v727_v3 = vmul.f32 %v6759_v23, %v7222_v40  ;;  %v1070_v53 = vmul.f32 %v6763_v41, %v7254_v24 }
 0x15f   : > { %v2088_v54 = vmax.f32 %v2016_v50, %v2068_v52 }
 0x161   : > { %v7267_v7 = vpop.permute.xlu1 %1162  ;;  %v7269_v60 = vpop.permute.xlu0 %1005  ;;  %2113 = vst.msk [vmem:[#allocation2 + $0x48] sm:$0xff] %vm2103_vm2, %v2088_v54  ;;  %v1092_v54 = vadd.f32 %v1068_v37, %v727_v3  ;;  %v1069_v37 = vmul.f32 %v6763_v41, %v996_v22 }
 0x162   : > { %v1240_v27 = vmul.f32 %v6767_v17, %v7267_v7  ;;  %v1071_v24 = vmul.f32 %v6763_v41, %v7269_v60 }
 0x164   : > { %v7274_v16 = vld [vmem:[#allocation2 + $0x30] ss:$2 sm:$0xff]  ;;  %v1264_v3 = vadd.f32 %v1240_v27, %v1092_v54 }
 0x165   : > { %v7277_v47 = vpop.permute.xlu1 %1172  ;;  %v7279_v12 = vpop.permute.xlu0 %1167  ;;  %v5785_v59 = vpack.i.bf16 %v7274_v16, %v7180_v1  ;;  %v2295_v46 = vrot.slane %v7274_v16, 7  ;;  %v2511_v31 = vrot.slane %v7274_v16, 2  ;;  %v2187_v62 = vrot.slane %v7274_v16, 6 }
 0x167   : > { %5786 = vrot.lane.b32.xlu0 %v5785_v59, %s6160_s12  ;;  %v2312_v50 = vsel %vm788_vm1, %v2294_v36, %v2295_v46  ;;  %v7299_v6 = vsel %vm1642_vm4, %v2510_v20, %v2511_v31  ;;  %v7306_v44 = vsel %vm446_vm0, %v2186_v28, %v2187_v62  ;;  %v2403_v20 = vrot.slane %v7274_v16, 1 }
 0x168   : > { %v5780_v56 = vpack.i.bf16 %v2312_v50, %v2313_v19  ;;  %v7312_v57 = vld [vmem:[#allocation2 + $0x40] ss:$2 sm:$0xff] }
 0x169   : > { %v1504_v5 = vpop.permute.xlu1 %1503  ;;  %v7310_v43 = vpop.permute.xlu0 %1177  ;;  %v2404_v39 = vrot.slane %v7312_v57, 1  ;;  %v2512_v28 = vrot.slane %v7312_v57, 2  ;;  %v2188_v52 = vrot.slane %v7312_v57, 6  ;;  %v2420_v25 = vsel %vm1301_vm5, %v2402_v18, %v2403_v20 }
 0x16a   : > { %5781 = vrot.lane.b32.xlu1 %v5780_v56, %s6161_s20  ;;  %v1581_v56 = vmul.f32 %v6772_v35, %v1504_v5 }
 0x16b   : > { %v2419_v36 = vsel %vm1301_vm5, %v2403_v20, %v2404_v39  ;;  %v2527_v19 = vsel %vm1642_vm4, %v2511_v31, %v2512_v28  ;;  %v2203_v33 = vsel %vm446_vm0, %v2187_v62, %v2188_v52  ;;  %v728_v31 = vmul.f32 %v6759_v23, %v7229_v14 }
 0x16c   : > { %v2499_v50 = vsel %vm2451_vm8, %v2419_v36, 0.0  ;;  %v7341_v1 = vsel %vm2559_vm9, %v2527_v19, 0.0  ;;  %v7345_v20 = vsel %vm2224_vm10, %v2203_v33, 0.0  ;;  %v1241_v36 = vmul.f32 %v6767_v17, %v7279_v12 }
 0x16d   : > { %v1514_v40 = vpop.permute.xlu1 %1513  ;;  %v1509_v59 = vpop.permute.xlu0 %1508  ;;  %v5790_v42 = vpack.i.bf16 %v2499_v50, %v2420_v25  ;;  %v1093_v5 = vadd.f32 %v1069_v37, %v728_v31  ;;  %v1605_v25 = vadd.f32 %v1581_v56, %v1264_v3  ;;  %v729_v37 = vmul.f32 %v6759_v23, %v7241_v21 }
 0x16e   : > { %v1582_v50 = vmul.f32 %v6772_v35, %v1509_v59  ;;  %v1242_v59 = vmul.f32 %v6767_v17, %v7277_v47  ;;  %v730_v21 = vmul.f32 %v6759_v23, %v7256_v45 }
 0x16f   : > { %5791 = vrot.lane.b32.xlu1 %v5790_v42, %s6162_s25  ;;  %v1265_v4 = vadd.f32 %v1241_v36, %v1093_v5  ;;  %v1094_v3 = vadd.f32 %v1070_v53, %v729_v37  ;;  %v1583_v36 = vmul.f32 %v6772_v35, %v1514_v40 }
 0x170   : > { %v1095_v60 = vadd.f32 %v1071_v24, %v730_v21 }
 0x171   : > { %v1845_v22 = vpop.permute.xlu1 %1844  ;;  %v1519_v62 = vpop.permute.xlu0 %1518  ;;  %v1606_v27 = vadd.f32 %v1582_v50, %v1265_v4  ;;  %v1266_v50 = vadd.f32 %v1242_v59, %v1094_v3 }
 0x172   : > { %v1922_v19 = vmul.f32 %v6774_v13, %v1845_v22 }
 0x174   : > { %v1946_v33 = vadd.f32 %v1922_v19, %v1605_v25  ;;  %v1607_v19 = vadd.f32 %v1583_v36, %v1266_v50 }
 0x175   : > { %v7356_v14 = vpop.permute.xlu1 %669  ;;  %v1850_v54 = vpop.permute.xlu0 %1849 }
 0x176   : > { %v1970_v55 = vadd.f32 %v1946_v33, %v6862_v34  ;;  %v1923_v42 = vmul.f32 %v6774_v13, %v1850_v54 }
 0x178   : > { %v1994_v56 = vadd.f32 %v1970_v55, %v7267_v7  ;;  %v1947_v31 = vadd.f32 %v1923_v42, %v1606_v27  ;;  %v1243_v55 = vmul.f32 %v6767_v17, %v7310_v43  ;;  %v1584_v27 = vmul.f32 %v6772_v35, %v1519_v62 }
 0x179   : > { %v7368_v4 = vpop.permute.xlu1 %1010  ;;  %v7370_v22 = vpop.permute.xlu0 %674 }
 0x17a   : > { %v2018_v5 = vmax.f32 %v1994_v56, 0.0  ;;  %v1971_v25 = vadd.f32 %v1947_v31, %v6862_v34  ;;  %v1267_v59 = vadd.f32 %v1243_v55, %v1095_v60 }
 0x17c   : > { %v2042_v53 = vrot.slane %v2018_v5, 1  ;;  %v1995_v7 = vadd.f32 %v1971_v25, %v7279_v12  ;;  %v1608_v24 = vadd.f32 %v1584_v27, %v1267_v59 }
 0x17d   : > { %v1855_v40 = vpop.permute.xlu1 %1854  ;;  %v1016_v33 = vpop.permute.xlu0 %1015 }
 0x17e   : > { %v2067_v54 = vsel %vm1301_vm5, %v7252_v8, %v2042_v53  ;;  %v2019_v42 = vmax.f32 %v1995_v7, 0.0  ;;  %v1924_v45 = vmul.f32 %v6774_v13, %v1855_v40 }
 0x17f   : > { %v2089_v37 = vmax.f32 %v2017_v49, %v2067_v54 }
 0x180   : > { %v2043_v56 = vrot.slane %v2019_v42, 1  ;;  %v1948_v31 = vadd.f32 %v1924_v45, %v1607_v19 }
 0x181   : > { %2114 = vst.msk [vmem:[#allocation2 + $0x50] sm:$0xff] %vm2103_vm2, %v2089_v37  ;;  %v680_v12 = vpop.permute.xlu1 %679  ;;  %v1860_v3 = vpop.permute.xlu0 %1859 }
 0x182   : > { %v2066_v36 = vsel %vm1301_vm5, %v2042_v53, %v2043_v56  ;;  %v1972_v8 = vadd.f32 %v1948_v31, %v6862_v34  ;;  %v1925_v62 = vmul.f32 %v6774_v13, %v1860_v3  ;;  %v2296_v53 = vrot.slane %v7312_v57, 7 }
 0x183   : > { %v2090_v25 = vmax.f32 %v2018_v5, %v2066_v36  ;;  %v2320_v5 = vadd.s32 4294967295, %v2176_v32 }
 0x184   : > { %v1996_v21 = vadd.f32 %v1972_v8, %v7277_v47  ;;  %v1949_v9 = vadd.f32 %v1925_v62, %v1608_v24  ;;  %v2311_v32 = vsel %vm788_vm1, %v2295_v46, %v2296_v53 }
 0x185   : > { %2115 = vst.msk [vmem:[#allocation2 + $0x58] sm:$0xff] %vm2103_vm2, %v2090_v25  ;;  %v1021_v49 = vpop.permute.xlu1 %1020  ;;  %v7392_v50 = vpop.permute.xlu0 %684  ;;  %vm2332_vm11 = vcmp.ge.s32.totalorder %v2320_v5, 0 }
 0x186   : > { %v2020_v55 = vmax.f32 %v1996_v21, 0.0  ;;  %v1973_v7 = vadd.f32 %v1949_v9, %v6862_v34  ;;  %v2392_v36 = vsel %vm2332_vm11, %v2311_v32, 0.0 }
 0x188   : > { %v2044_v60 = vrot.slane %v2020_v55, 1  ;;  %v7396_v19 = vadd.f32 %v1973_v7, %v7310_v43  ;;  %v1073_v7 = vmul.f32 %v6763_v41, %v1016_v33 }
 0x189   : > { %v7401_v40 = vpop.permute.xlu1 %1182  ;;  %v1026_v47 = vpop.permute.xlu0 %1025 }
 0x18a   : > { %v2065_v54 = vsel %vm1301_vm5, %v2043_v56, %v2044_v60  ;;  %v2021_v27 = vmax.f32 %v7396_v19, 0.0 }
 0x18b   : > { %v2091_v45 = vmax.f32 %v2019_v42, %v2065_v54 }
 0x18c   : > { %v7408_v34 = vrot.slane %v2021_v27, 1  ;;  %v7410_v43 = vld [vmem:[#allocation2 + $0x50] ss:$2 sm:$0xff] }
 0x18d   : > { %2116 = vst.msk [vmem:[#allocation2 + $0x60] sm:$0xff] %vm2103_vm2, %v2091_v45  ;;  %v7417_v37 = vpop.permute.xlu1 %1192  ;;  %v7419_v59 = vpop.permute.xlu0 %1187  ;;  %v5800_v42 = vpack.i.bf16 %v7410_v43, %v7312_v57  ;;  %v2297_v56 = vrot.slane %v7410_v43, 7  ;;  %v2513_v31 = vrot.slane %v7410_v43, 2  ;;  %v2189_v46 = vrot.slane %v7410_v43, 6 }
 0x18e   : > { %v2064_v16 = vsel %vm1301_vm5, %v2044_v60, %v7408_v34  ;;  %v1074_v60 = vmul.f32 %v6763_v41, %v1021_v49 }
 0x18f   : > { %v2092_v3 = vmax.f32 %v2020_v55, %v2064_v16  ;;  %5801 = vrot.lane.b32.xlu1 %v5800_v42, %s6160_s12  ;;  %v2310_v24 = vsel %vm788_vm1, %v2296_v53, %v2297_v56  ;;  %v7438_v8 = vsel %vm1642_vm4, %v2512_v28, %v2513_v31  ;;  %v7444_v25 = vsel %vm446_vm0, %v2188_v52, %v2189_v46 }
 0x190   : > { %v5795_v62 = vpack.i.bf16 %v2310_v24, %v2392_v36  ;;  %v1072_v55 = vmul.f32 %v6763_v41, %v7368_v4  ;;  %v731_v28 = vmul.f32 %v6759_v23, %v7356_v14  ;;  %v1244_v52 = vmul.f32 %v6767_v17, %v7401_v40 }
 0x191   : > { %2117 = vst.msk [vmem:[#allocation2 + $0x68] sm:$0xff] %vm2103_vm2, %v2092_v3  ;;  %v1524_v21 = vpop.permute.xlu1 %1523  ;;  %v7447_v9 = vpop.permute.xlu0 %1197  ;;  %v732_v53 = vmul.f32 %v6759_v23, %v7370_v22  ;;  %v733_v4 = vmul.f32 %v6759_v23, %v680_v12  ;;  %v2405_v42 = vrot.slane %v7410_v43, 1  ;;  %v1246_v14 = vmul.f32 %v6767_v17, %v7417_v37 }
 0x192   : > { %5796 = vrot.lane.b32.xlu0 %v5795_v62, %s6161_s20  ;;  %v1096_v45 = vadd.f32 %v1072_v55, %v731_v28  ;;  %v1585_v32 = vmul.f32 %v6772_v35, %v1524_v21  ;;  %v1075_v3 = vmul.f32 %v6763_v41, %v1026_v47  ;;  %v1245_v22 = vmul.f32 %v6767_v17, %v7419_v59 }
 0x193   : > { %v1097_v33 = vadd.f32 %v1073_v7, %v732_v53  ;;  %v1098_v49 = vadd.f32 %v1074_v60, %v733_v4  ;;  %v2418_v47 = vsel %vm1301_vm5, %v2404_v39, %v2405_v42 }
 0x194   : > { %v1268_v16 = vadd.f32 %v1244_v52, %v1096_v45 }
 0x195   : > { %v1534_v5 = vpop.permute.xlu1 %1533  ;;  %v1529_v54 = vpop.permute.xlu0 %1528  ;;  %v1270_v52 = vadd.f32 %v1246_v14, %v1098_v49  ;;  %v1247_v14 = vmul.f32 %v6767_v17, %v7447_v9 }
 0x196   : > { %v1609_v55 = vadd.f32 %v1585_v32, %v1268_v16  ;;  %v1587_v28 = vmul.f32 %v6772_v35, %v1534_v5  ;;  %v1586_v53 = vmul.f32 %v6772_v35, %v1529_v54  ;;  %v734_v54 = vmul.f32 %v6759_v23, %v7392_v50  ;;  %v7502_v16 = vld [vmem:[#allocation7] ss:$0 sm:$0xff] }
 0x198   : > { %v7466_v24 = vld [vmem:[#allocation2 + $0x60] ss:$2 sm:$0xff]  ;;  %v1611_v49 = vadd.f32 %v1587_v28, %v1270_v52 }
 0x199   : > { %v1865_v36 = vpop.permute.xlu1 %1864  ;;  %v2406_v12 = vrot.slane %v7466_v24, 1  ;;  %v2514_v62 = vrot.slane %v7466_v24, 2  ;;  %v2190_v21 = vrot.slane %v7466_v24, 6 }
 0x19a   : > { %v1926_v7 = vmul.f32 %v6774_v13, %v1865_v36  ;;  %v1539_v60 = vpop.permute.xlu0 %1538 }
 0x19b   : > { %v2417_v45 = vsel %vm1301_vm5, %v2405_v42, %v2406_v12  ;;  %v7488_v5 = vsel %vm1642_vm4, %v2513_v31, %v2514_v62  ;;  %v7496_v39 = vsel %vm446_vm0, %v2189_v46, %v2190_v21  ;;  %v1269_v42 = vadd.f32 %v1245_v22, %v1097_v33 }
 0x19c   : > { %v1950_v4 = vadd.f32 %v1926_v7, %v1609_v55  ;;  %v5805_v32 = vpack.i.bf16 %v2417_v45, %v2418_v47  ;;  %v1099_v46 = vadd.f32 %v1075_v3, %v734_v54  ;;  %v1588_v45 = vmul.f32 %v6772_v35, %v1539_v60 }
 0x19d   : > { %v1875_v31 = vpop.permute.xlu1 %1874  ;;  %v1610_v47 = vadd.f32 %v1586_v53, %v1269_v42 }
 0x19e   : > { %v1974_v36 = vadd.f32 %v7502_v16, %v1950_v4  ;;  %v1928_v55 = vmul.f32 %v6774_v13, %v1875_v31  ;;  %v1870_v7 = vpop.permute.xlu0 %1869  ;;  %5806 = vrot.lane.b32.xlu0 %v5805_v32, %s6162_s25  ;;  %v1271_v57 = vadd.f32 %v1247_v14, %v1099_v46 }
 0x19f   : > { %v1927_v50 = vmul.f32 %v6774_v13, %v1870_v7 }
 0x1a0   : > { %v1998_v33 = vadd.f32 %v1974_v36, %v7401_v40  ;;  %v1952_v22 = vadd.f32 %v1928_v55, %v1611_v49  ;;  %v1612_v31 = vadd.f32 %v1588_v45, %v1271_v57 }
 0x1a1   : > { %v1951_v28 = vadd.f32 %v1927_v50, %v1610_v47  ;;  %v690_v52 = vpop.permute.xlu1 %689 }
 0x1a2   : > { %v2022_v29 = vmax.f32 %v1998_v33, 0.0  ;;  %v1976_v4 = vadd.f32 %v7502_v16, %v1952_v22  ;;  %v1880_v10 = vpop.permute.xlu0 %1879  ;;  %v8449_v33 = vld [vmem:[#allocation12_spill] sm:$0xff] }
 0x1a3   : > { %v1975_v18 = vadd.f32 %v7502_v16, %v1951_v28  ;;  %v1929_v3 = vmul.f32 %v6774_v13, %v1880_v10  ;;  %v2180_v22 = vand.u32 31, %v8449_v33 }
 0x1a4   : > { %v2046_v53 = vrot.slane %v2022_v29, 1  ;;  %v2000_v60 = vadd.f32 %v1976_v4, %v7417_v37 }
 0x1a5   : > { %v1999_v32 = vadd.f32 %v1975_v18, %v7419_v59  ;;  %v1953_v54 = vadd.f32 %v1929_v3, %v1612_v31  ;;  %v1031_v40 = vpop.permute.xlu1 %1030 }
 0x1a6   : > { %v2063_v42 = vsel %vm1301_vm5, %v7408_v34, %v2046_v53  ;;  %v2024_v14 = vmax.f32 %v2000_v60, 0.0  ;;  %v695_v49 = vpop.permute.xlu0 %694 }
 0x1a7   : > { %v2093_v57 = vmax.f32 %v2021_v27, %v2063_v42  ;;  %v2023_v36 = vmax.f32 %v1999_v32, 0.0  ;;  %v1977_v55 = vadd.f32 %v7502_v16, %v1953_v54  ;;  %v8448_v27 = vld [vmem:[#allocation13_spill] sm:$0xff]  ;;  %v2298_v32 = vrot.slane %v7466_v24, 7 }
 0x1a8   : > { %v2048_v10 = vrot.slane %v2024_v14, 1  ;;  %v2179_v47 = vand.u32 31, %v8448_v27  ;;  %v7549_v42 = vadd.s32 4294967294, %v2180_v22 }
 0x1a9   : > { %2118 = vst.msk [vmem:[#allocation2 + $0x70] sm:$0xff] %vm2103_vm2, %v2093_v57  ;;  %v2047_v37 = vrot.slane %v2023_v36, 1  ;;  %v7523_v18 = vadd.f32 %v1977_v55, %v7447_v9  ;;  %v700_v59 = vpop.permute.xlu1 %699  ;;  %v736_v55 = vmul.f32 %v6759_v23, %v695_v49 }
 0x1aa   : > { %v1036_v7 = vpop.permute.xlu0 %1035  ;;  %v2539_v54 = vadd.s32 2, %v2179_v47  ;;  %vm2228_vm14 = vcmp.ge.s32.totalorder %v7549_v42, 0 }
 0x1ab   : > { %v2061_v34 = vsel %vm1301_vm5, %v2047_v37, %v2048_v10  ;;  %v2062_v46 = vsel %vm1301_vm5, %v2046_v53, %v2047_v37  ;;  %v2025_v19 = vmax.f32 %v7523_v18, 0.0  ;;  %v1076_v53 = vmul.f32 %v6763_v41, %v1031_v40 }
 0x1ac   : > { %v2094_v45 = vmax.f32 %v2022_v29, %v2062_v46  ;;  %v2095_v50 = vmax.f32 %v2023_v36, %v2061_v34  ;;  %v2431_v29 = vadd.s32 1, %v2179_v47  ;;  %v1077_v57 = vmul.f32 %v6763_v41, %v1036_v7 }
 0x1ad   : > { %v7534_v9 = vrot.slane %v2025_v19, 1  ;;  %v7536_v28 = vpop.permute.xlu1 %1202  ;;  %v2309_v7 = vsel %vm788_vm1, %v2297_v56, %v2298_v32  ;;  %vm2563_vm13 = vcmp.lt.s32.totalorder %v2539_v54, 32 }
 0x1ae   : > { %2119 = vst.msk [vmem:[#allocation2 + $0x78] sm:$0xff] %vm2103_vm2, %v2094_v45  ;;  %2120 = vst.msk [vmem:[#allocation2 + $0x80] sm:$0xff] %vm2103_vm2, %v2095_v50  ;;  %v1041_v4 = vpop.permute.xlu0 %1040  ;;  %v1248_v40 = vmul.f32 %v6767_v17, %v7536_v28  ;;  %vm2455_vm12 = vcmp.lt.s32.totalorder %v2431_v29, 32  ;;  %v1101_v49 = vadd.f32 %v1077_v57, %v736_v55 }
 0x1af   : > { %v2060_v31 = vsel %vm1301_vm5, %v2048_v10, %v7534_v9  ;;  %v1078_v10 = vmul.f32 %v6763_v41, %v1041_v4 }
 0x1b0   : > { %v2096_v3 = vmax.f32 %v2024_v14, %v2060_v31  ;;  %v735_v14 = vmul.f32 %v6759_v23, %v690_v52  ;;  %v737_v52 = vmul.f32 %v6759_v23, %v700_v59 }
 0x1b1   : > { %v7544_v60 = vpop.permute.xlu1 %1212 }
 0x1b2   : > { %2121 = vst.msk [vmem:[#allocation2 + $0x88] sm:$0xff] %vm2103_vm2, %v2096_v3  ;;  %v7553_v36 = vpop.permute.xlu0 %1207  ;;  %v1100_v37 = vadd.f32 %v1076_v53, %v735_v14  ;;  %v1250_v45 = vmul.f32 %v6767_v17, %v7544_v60  ;;  %v1102_v31 = vadd.f32 %v1078_v10, %v737_v52 }
 0x1b3   : > { %v1249_v23 = vmul.f32 %v6767_v17, %v7553_v36 }
 0x1b4   : > { %v1272_v4 = vadd.f32 %v1248_v40, %v1100_v37  ;;  %v1274_v52 = vadd.f32 %v1250_v45, %v1102_v31 }
 0x1b5   : > { %v1549_v34 = vpop.permute.xlu1 %1548  ;;  %v7560_v46 = vld [vmem:[#allocation2 + $0x70] ss:$2 sm:$0xff] }
 0x1b6   : > { %v1544_v27 = vpop.permute.xlu0 %1543  ;;  %v5815_v41 = vpack.i.bf16 %v7560_v46, %v7466_v24  ;;  %v2299_v47 = vrot.slane %v7560_v46, 7  ;;  %v2515_v50 = vrot.slane %v7560_v46, 2  ;;  %v2191_v56 = vrot.slane %v7560_v46, 6 }
 0x1b7   : > { %v1589_v43 = vmul.f32 %v6772_v35, %v1544_v27  ;;  %v2407_v14 = vrot.slane %v7560_v46, 1  ;;  %v1590_v27 = vmul.f32 %v6772_v35, %v1549_v34 }
 0x1b8   : > { %5816 = vrot.lane.b32.xlu0 %v5815_v41, %s6160_s12  ;;  %v2308_v59 = vsel %vm788_vm1, %v2298_v32, %v2299_v47  ;;  %v7590_v55 = vsel %vm1642_vm4, %v2514_v62, %v2515_v50  ;;  %v7596_v17 = vsel %vm446_vm0, %v2190_v21, %v2191_v56 }
 0x1b9   : > { %v1885_v3 = vpop.permute.xlu1 %1884  ;;  %v5810_v53 = vpack.i.bf16 %v2308_v59, %v2309_v7  ;;  %v7583_v57 = vld [vmem:[#allocation2 + $0x80] ss:$2 sm:$0xff]  ;;  %v1613_v40 = vadd.f32 %v1589_v43, %v1272_v4  ;;  %v1273_v59 = vadd.f32 %v1249_v23, %v1101_v49 }
 0x1ba   : > { %v1930_v32 = vmul.f32 %v6774_v13, %v1885_v3  ;;  %v1554_v10 = vpop.permute.xlu0 %1553  ;;  %v2408_v37 = vrot.slane %v7583_v57, 1  ;;  %v2516_v7 = vrot.slane %v7583_v57, 2  ;;  %v2192_v41 = vrot.slane %v7583_v57, 6 }
 0x1bb   : > { %v1591_v62 = vmul.f32 %v6772_v35, %v1554_v10  ;;  %5811 = vrot.lane.b32.xlu1 %v5810_v53, %s6161_s20  ;;  %v2416_v35 = vsel %vm1301_vm5, %v2406_v12, %v2407_v14 }
 0x1bc   : > { %v1954_v21 = vadd.f32 %v1930_v32, %v1613_v40  ;;  %v2415_v43 = vsel %vm1301_vm5, %v2407_v14, %v2408_v37  ;;  %v2523_v45 = vsel %vm1642_vm4, %v2515_v50, %v2516_v7  ;;  %v1614_v32 = vadd.f32 %v1590_v27, %v1273_v59 }
 0x1bd   : > { %v1615_v4 = vadd.f32 %v1591_v62, %v1274_v52  ;;  %v1895_v34 = vpop.permute.xlu1 %1894  ;;  %v2503_v49 = vsel %vm2455_vm12, %v2415_v43, 0.0  ;;  %v7619_v31 = vsel %vm2563_vm13, %v2523_v45, 0.0  ;;  %v2199_v12 = vsel %vm446_vm0, %v2191_v56, %v2192_v41 }
 0x1be   : > { %v1978_v23 = vadd.f32 %v7502_v16, %v1954_v21  ;;  %v1932_v3 = vmul.f32 %v6774_v13, %v1895_v34  ;;  %v1890_v53 = vpop.permute.xlu0 %1889  ;;  %v5820_v40 = vpack.i.bf16 %v2503_v49, %v2416_v35  ;;  %v2805_v50 = vpack.c.bf16 %v7619_v31, %v7590_v55 }
 0x1bf   : > { %v1931_v24 = vmul.f32 %v6774_v13, %v1890_v53  ;;  %v7634_v14 = vsel %vm2228_vm14, %v2199_v12, 0.0 }
 0x1c0   : > { %v2002_v29 = vadd.f32 %v1978_v23, %v7536_v28  ;;  %v1956_v54 = vadd.f32 %v1932_v3, %v1615_v4  ;;  %5821 = vrot.lane.b32.xlu1 %v5820_v40, %s6162_s25 }
 0x1c1   : > { %v1955_v10 = vadd.f32 %v1931_v24, %v1614_v32  ;;  %v5772_v52 = vpop.permute.xlu1 %5771 }
 0x1c2   : > { %v2026_v62 = vmax.f32 %v2002_v29, 0.0  ;;  %v1980_v27 = vadd.f32 %v7502_v16, %v1956_v54  ;;  %v5767_v13 = vpop.permute.xlu0 %5766  ;;  %v5774_v45 = vunpack.i.h.bf16 %v5772_v52  ;;  %v5773_v4 = vunpack.i.l.bf16 %v5772_v52 }
 0x1c3   : > { %v1979_v59 = vadd.f32 %v7502_v16, %v1955_v10  ;;  %v5769_v21 = vunpack.i.h.bf16 %v5767_v13  ;;  %v5768_v43 = vunpack.i.l.bf16 %v5767_v13  ;;  %v2324_v13 = vadd.s32 4294967295, %v2180_v22 }
 0x1c4   : > { %v2050_v56 = vrot.slane %v2026_v62, 1  ;;  %v2004_v28 = vadd.f32 %v1980_v27, %v7544_v60  ;;  %v8450_v27 = vpack.c.bf16 %v7341_v1, %v7299_v6 }
 0x1c5   : > { %v2003_v34 = vadd.f32 %v1979_v59, %v7553_v36  ;;  %v2761_v42 = vsel %vm2103_vm2, %v7150_v48, %v5769_v21  ;;  %v2760_v35 = vsel %vm2103_vm2, %v7096_v51, %v5768_v43  ;;  %vm2336_vm6 = vcmp.ge.s32.totalorder %v2324_v13, 0  ;;  %v6080_v43 = vld [vmem:[#allocation2 + $0xb0] ss:$2 sm:$0xff] }
 0x1c6   : > { %v2059_v16 = vsel %vm1301_vm5, %v7534_v9, %v2050_v56  ;;  %v2028_v49 = vmax.f32 %v2004_v28, 0.0  ;;  %v5777_v23 = vpop.permute.xlu0 %5776  ;;  %v2773_v48 = vsel %vm2772_vm15, %v2760_v35, %v5773_v4  ;;  %v2774_v32 = vsel %vm2772_vm15, %v2761_v42, %v5774_v45 }
 0x1c7   : > { %v2097_v60 = vmax.f32 %v2025_v19, %v2059_v16  ;;  %v2027_v3 = vmax.f32 %v2003_v34, 0.0  ;;  %v5779_v53 = vunpack.i.h.bf16 %v5777_v23  ;;  %v5778_v36 = vunpack.i.l.bf16 %v5777_v23 }
 0x1c8   : > { %v2052_v40 = vrot.slane %v2028_v49, 1  ;;  %v8452_v42 = vrot.slane %v7048_v26, 7 }
 0x1c9   : > { %2122 = vst.msk [vmem:[#allocation2 + $0x90] sm:$0xff] %vm2103_vm2, %v2097_v60  ;;  %v2051_v51 = vrot.slane %v2027_v3, 1  ;;  %v2786_v24 = vsel %vm2785_vm3, %v2773_v48, %v5778_v36  ;;  %v2787_v9 = vsel %vm2785_vm3, %v2774_v32, %v5779_v53  ;;  %v8453_v60 = vrot.slane %v7040_v63, 1 }
 0x1ca   : > { %v2056_v18 = vsel %vm1301_vm5, %v2052_v40, %v6966_v38  ;;  %v2798_v19 = vpack.c.bf16 %v2787_v9, %v2786_v24  ;;  %v2300_v38 = vrot.slane %v7583_v57, 7 }
 0x1cb   : > { %v2100_v12 = vmax.f32 %v2028_v49, %v2056_v18  ;;  %v2057_v29 = vsel %vm1301_vm5, %v2051_v51, %v2052_v40  ;;  %v2058_v54 = vsel %vm1301_vm5, %v2050_v56, %v2051_v51  ;;  %v2411_v56 = vrot.slane %v6080_v43, 1 }
 0x1cc   : > { %v2098_v10 = vmax.f32 %v2026_v62, %v2058_v54  ;;  %v2099_v52 = vmax.f32 %v2027_v3, %v2057_v29  ;;  %2921 = vmatmul.mubr.bf16.vlgmr.msra.gmra.mrb[0].mxu0 %v2798_v19  ;;  %v8451_v62 = vand.u32 31, %v7025_v30  ;;  %v2307_v6 = vsel %vm788_vm1, %v2299_v47, %v2300_v38 }
 0x1cd   : > { %2125 = vst.msk [vmem:[#allocation2 + $0xa8] sm:$0xff] %vm2103_vm2, %v2100_v12  ;;  %5322 = vmatprep.mubr.msk.bf16.mxu0 %vm2103_vm2, %v8450_v27  ;;  %v2396_v47 = vsel %vm2336_vm6, %v2307_v6, 0.0  ;;  %v2423_v3 = vsel %vm1301_vm5, %v2411_v56, %v8453_v60  ;;  %v8454_v18 = vrot.slane %v7048_v26, 2 }
 0x1ce   : > { %2123 = vst.msk [vmem:[#allocation2 + $0x98] sm:$0xff] %vm2103_vm2, %v2098_v10  ;;  %2124 = vst.msk [vmem:[#allocation2 + $0xa0] sm:$0xff] %vm2103_vm2, %v2099_v52  ;;  %v2435_v59 = vadd.s32 1, %v8451_v62 }
 0x1d0   : > { %vm2459_vm7 = vcmp.lt.s32.totalorder %v2435_v59, 32 }
 0x1d1   : > { %v2507_v24 = vsel %vm2459_vm7, %v2423_v3, 0.0 }
 0x1d5   : > { %v2146_v21 = vld [vmem:[#allocation2 + $0x90] ss:$2 sm:$0xff]  ;;  %v7677_v1 = vld [vmem:[#allocation2 + $0xa0] ss:$2 sm:$0xff] }
 0x1d6   : > { %v5830_v28 = vpack.i.bf16 %v2146_v21, %v7583_v57  ;;  %v2301_v45 = vrot.slane %v2146_v21, 7  ;;  %v2302_v33 = vrot.slane %v7677_v1, 7  ;;  %v2409_v22 = vrot.slane %v2146_v21, 1 }
 0x1d7   : > { %v2410_v30 = vrot.slane %v7677_v1, 1  ;;  %v2517_v4 = vrot.slane %v2146_v21, 2  ;;  %v2518_v34 = vrot.slane %v7677_v1, 2  ;;  %v2193_v32 = vrot.slane %v2146_v21, 6 }
 0x1d8   : > { %5831 = vrot.lane.b32.xlu1 %v5830_v28, %s6160_s12  ;;  %v2306_v46 = vsel %vm788_vm1, %v2300_v38, %v2301_v45  ;;  %v2304_v35 = vsel %vm788_vm1, %v2302_v33, %v8452_v42  ;;  %v2305_v16 = vsel %vm788_vm1, %v2301_v45, %v2302_v33  ;;  %v2414_v36 = vsel %vm1301_vm5, %v2408_v37, %v2409_v22 }
 0x1d9   : > { %v5825_v49 = vpack.i.bf16 %v2306_v46, %v2396_v47  ;;  %v5840_v23 = vpack.i.bf16 %v2304_v35, %v2305_v16  ;;  %v2413_v53 = vsel %vm1301_vm5, %v2409_v22, %v2410_v30  ;;  %v2412_v40 = vsel %vm1301_vm5, %v2410_v30, %v2411_v56  ;;  %v5787_v38 = vpop.permute.xlu0 %5786 }
 0x1da   : > { %v7707_v63 = vsel %vm1642_vm4, %v2517_v4, %v2518_v34  ;;  %v7713_v48 = vsel %vm1642_vm4, %v2516_v7, %v2517_v4  ;;  %v2194_v51 = vrot.slane %v7677_v1, 6  ;;  %v7723_v19 = vsel %vm1642_vm4, %v2518_v34, %v8454_v18 }
 0x1db   : > { %5826 = vrot.lane.b32.xlu0 %v5825_v49, %s6161_s20  ;;  %v2807_v9 = vpack.c.bf16 %v7707_v63, %v7713_v48  ;;  %v5835_v7 = vpack.i.bf16 %v2413_v53, %v2414_v36  ;;  %v7729_v54 = vsel %vm446_vm0, %v2192_v41, %v2193_v32  ;;  %v5850_v10 = vpack.i.bf16 %v2507_v24, %v2412_v40 }
 0x1dc   : > { %5841 = vrot.lane.b32.xlu1 %v5840_v23, %s6161_s20  ;;  %v5782_v37 = vpop.permute.xlu1 %5781  ;;  %v7735_v52 = vsel %vm446_vm0, %v2193_v32, %v2194_v51  ;;  %v2809_v27 = vpack.c.bf16 %v7143_v0, %v7723_v19  ;;  %v5845_v13 = vpack.i.bf16 %v6080_v43, %v7677_v1  ;;  %v5789_v62 = vunpack.i.h.bf16 %v5787_v38 }
 0x1dd   : > { %v5784_v12 = vunpack.i.h.bf16 %v5782_v37  ;;  %v5783_v29 = vunpack.i.l.bf16 %v5782_v37  ;;  %v5788_v59 = vunpack.i.l.bf16 %v5787_v38 }
 0x1df   : > { %5836 = vrot.lane.b32.xlu0 %v5835_v7, %s6162_s25  ;;  %v2762_v57 = vsel %vm2103_vm2, %v7209_v15, %v5783_v29  ;;  %v2763_v41 = vsel %vm2103_vm2, %v7306_v44, %v5784_v12  ;;  %v8455_v44 = vpack.c.bf16 %v7488_v5, %v7438_v8 }
 0x1e0   : > { %5851 = vrot.lane.b32.xlu1 %v5850_v10, %s6162_s25  ;;  %v2775_v28 = vsel %vm2772_vm15, %v2762_v57, %v5788_v59  ;;  %v2776_v45 = vsel %vm2772_vm15, %v2763_v41, %v5789_v62 }
 0x1e1   : > { %v5792_v21 = vpop.permute.xlu1 %5791 }
 0x1e2   : > { %v5794_v6 = vunpack.i.h.bf16 %v5792_v21  ;;  %v5793_v56 = vunpack.i.l.bf16 %v5792_v21 }
 0x1e3   : > { %5846 = vrot.lane.b32.xlu0 %v5845_v13, %s6160_s12 }
 0x1e4   : > { %v2788_v33 = vsel %vm2785_vm3, %v2775_v28, %v5793_v56  ;;  %v2789_v15 = vsel %vm2785_vm3, %v2776_v45, %v5794_v6 }
 0x1e5   : > { %v2800_v22 = vpack.c.bf16 %v2789_v15, %v2788_v33 }
 0x1e7   : > { %2929 = vmatmul.mubr.bf16.gmra.mrb[4].mxu0 %v2800_v22 }
 0x1e8   : > { %5323 = vmatprep.mubr.msk.bf16.mxu0 %vm2103_vm2, %v8455_v44 }
 0x201   : > { %v5802_v34 = vpop.permute.xlu1 %5801 }
 0x202   : > { %v5804_v42 = vunpack.i.h.bf16 %v5802_v34  ;;  %v5803_v35 = vunpack.i.l.bf16 %v5802_v34 }
 0x204   : > { %v5797_v43 = vpop.permute.xlu0 %5796 }
 0x205   : > { %v5799_v30 = vunpack.i.h.bf16 %v5797_v43  ;;  %v5798_v4 = vunpack.i.l.bf16 %v5797_v43 }
 0x207   : > { %v2765_v46 = vsel %vm2103_vm2, %v7444_v25, %v5799_v30  ;;  %v2764_v47 = vsel %vm2103_vm2, %v7345_v20, %v5798_v4 }
 0x208   : > { %v2777_v60 = vsel %vm2772_vm15, %v2764_v47, %v5803_v35  ;;  %v2778_v8 = vsel %vm2772_vm15, %v2765_v46, %v5804_v42 }
 0x210   : > { %v5807_v16 = vpop.permute.xlu0 %5806 }
 0x211   : > { %v5809_v49 = vunpack.i.h.bf16 %v5807_v16  ;;  %v5808_v23 = vunpack.i.l.bf16 %v5807_v16 }
 0x213   : > { %v2790_v5 = vsel %vm2785_vm3, %v2777_v60, %v5808_v23  ;;  %v2791_v3 = vsel %vm2785_vm3, %v2778_v8, %v5809_v49 }
 0x214   : > { %v2802_v53 = vpack.c.bf16 %v2791_v3, %v2790_v5 }
 0x216   : > { %2937 = vmatmul.mubr.bf16.gmra.mrb[8].mxu0 %v2802_v53 }
 0x217   : > { %5324 = vmatprep.mubr.msk.bf16.mxu0 %vm2103_vm2, %v2805_v50 }
 0x22a   : > { %v5817_v40 = vpop.permute.xlu0 %5816 }
 0x22b   : > { %v5819_v24 = vunpack.i.h.bf16 %v5817_v40  ;;  %v5818_v18 = vunpack.i.l.bf16 %v5817_v40 }
 0x22d   : > { %v5812_v20 = vpop.permute.xlu1 %5811 }
 0x22e   : > { %v5814_v25 = vunpack.i.h.bf16 %v5812_v20  ;;  %v5813_v36 = vunpack.i.l.bf16 %v5812_v20 }
 0x230   : > { %v2766_v32 = vsel %vm2103_vm2, %v7496_v39, %v5813_v36  ;;  %v2767_v37 = vsel %vm2103_vm2, %v7596_v17, %v5814_v25 }
 0x231   : > { %v2779_v10 = vsel %vm2772_vm15, %v2766_v32, %v5818_v18  ;;  %v2780_v55 = vsel %vm2772_vm15, %v2767_v37, %v5819_v24 }
 0x232   : > { %v5822_v12 = vpop.permute.xlu1 %5821 }
 0x233   : > { %v5824_v29 = vunpack.i.h.bf16 %v5822_v12  ;;  %v5823_v7 = vunpack.i.l.bf16 %v5822_v12 }
 0x235   : > { %v2792_v31 = vsel %vm2785_vm3, %v2779_v10, %v5823_v7  ;;  %v2793_v50 = vsel %vm2785_vm3, %v2780_v55, %v5824_v29 }
 0x236   : > { %v2804_v38 = vpack.c.bf16 %v2793_v50, %v2792_v31 }
 0x238   : > { %2945 = vmatmul.mubr.bf16.gmra.mrb[12].mxu0 %v2804_v38 }
 0x239   : > { %5325 = vmatprep.mubr.msk.bf16.mxu0 %vm2103_vm2, %v2807_v9 }
 0x24a   : > { %v5832_v39 = vpop.permute.xlu1 %5831 }
 0x24b   : > { %v5834_v21 = vunpack.i.h.bf16 %v5832_v39  ;;  %v5833_v6 = vunpack.i.l.bf16 %v5832_v39 }
 0x24d   : > { %v5827_v17 = vpop.permute.xlu0 %5826 }
 0x24e   : > { %v5829_v57 = vunpack.i.h.bf16 %v5827_v17  ;;  %v5828_v41 = vunpack.i.l.bf16 %v5827_v17  ;;  %v5842_v13 = vpop.permute.xlu1 %5841 }
 0x24f   : > { %v5844_v33 = vunpack.i.h.bf16 %v5842_v13  ;;  %v5843_v63 = vunpack.i.l.bf16 %v5842_v13 }
 0x250   : > { %v2769_v62 = vsel %vm2103_vm2, %v7729_v54, %v5829_v57  ;;  %v2768_v59 = vsel %vm2103_vm2, %v7634_v14, %v5828_v41  ;;  %v8456_v14 = vrot.slane %v7048_v26, 6 }
 0x251   : > { %v5837_v56 = vpop.permute.xlu0 %5836  ;;  %v2781_v48 = vsel %vm2772_vm15, %v2768_v59, %v5833_v6  ;;  %v2782_v9 = vsel %vm2772_vm15, %v2769_v62, %v5834_v21  ;;  %v2770_v46 = vsel %vm2103_vm2, %v7735_v52, %v5843_v63  ;;  %v7804_v52 = vld [vmem:[#allocation7 + $0x1] ss:$0 sm:$0xff] }
 0x252   : > { %v5839_v28 = vunpack.i.h.bf16 %v5837_v56  ;;  %v5838_v45 = vunpack.i.l.bf16 %v5837_v56  ;;  %v5852_v15 = vpop.permute.xlu1 %5851  ;;  %v2196_v30 = vsel %vm446_vm0, %v2194_v51, %v8456_v14 }
 0x253   : > { %v2771_v47 = vsel %vm2103_vm2, %v2196_v30, %v5844_v33  ;;  %v5854_v42 = vunpack.i.h.bf16 %v5852_v15  ;;  %v5853_v35 = vunpack.i.l.bf16 %v5852_v15 }
 0x254   : > { %v2794_v22 = vsel %vm2785_vm3, %v2781_v48, %v5838_v45  ;;  %v2795_v44 = vsel %vm2785_vm3, %v2782_v9, %v5839_v28 }
 0x255   : > { %v5847_v54 = vpop.permute.xlu0 %5846  ;;  %v2806_v43 = vpack.c.bf16 %v2795_v44, %v2794_v22 }
 0x256   : > { %v5849_v4 = vunpack.i.h.bf16 %v5847_v54  ;;  %v5848_v34 = vunpack.i.l.bf16 %v5847_v54 }
 0x257   : > { %2953 = vmatmul.mubr.bf16.gmra.mrb[16].mxu0 %v2806_v43 }
 0x258   : > { %v2784_v16 = vsel %vm2772_vm15, %v2771_v47, %v5849_v4  ;;  %v2783_v49 = vsel %vm2772_vm15, %v2770_v46, %v5848_v34  ;;  %5326 = vmatprep.mubr.msk.bf16.mxu0 %vm2103_vm2, %v2809_v27  ;;  %v7833_v34 = vadd.s32 8, %v6299_v2 }
 0x259   : > { %v2796_v26 = vsel %vm2785_vm3, %v2783_v49, %v5853_v35  ;;  %v2797_v1 = vsel %vm2785_vm3, %v2784_v16, %v5854_v42 }
 0x25a   : > { %v2808_v51 = vpack.c.bf16 %v2797_v1, %v2796_v26  ;;  %v3082_v49 = vand.u32 15, %v7833_v34 }
 0x25c   : > { %v3208_v1 = vadd.s32 1, %v3082_v49 }
 0x25e   : > { %vm3220_vm8 = vcmp.lt.s32.totalorder %v3208_v1, 16  ;;  %v3081_v1 = vand.u32 15, %v6299_v2 }
 0x25f   : > { %2961 = vmatmul.mubr.bf16.gmra.mrb[20].mxu0 %v2808_v51 }
 0x29f   : > { %v2922_v23 = vpop.f32.mrb[0].mxu0 }
 0x2a0   : > { %v2923_v60 = vadd.f32 %v2922_v23, %v7804_v52  ;;  %v2924_v8 = vpop.f32.mrb[1].mxu0  ;;  %v5895_v23 = vld [vmem:[%s8397_s4 + $0x40] sm:$0xff]  }
 0x2a1   : > { %v2925_v5 = vpop.f32.mrb[2].mxu0  ;;  %v5897_v8 = vld [vmem:[%s8397_s4 + $0x48] sm:$0xff]   ;;  %5507 = vmatprep.subr.bf16.mxu1 %v5895_v23 }
 0x2a2   : > { %v2969_v3 = vmax.f32 %v2923_v60, 0.0  ;;  %v2926_v53 = vadd.f32 %v2925_v5, %v7804_v52  ;;  %v2927_v20 = vpop.f32.mrb[3].mxu0  ;;  %v5896_v60 = vld [vmem:[%s8397_s4] sm:$0xff]  }
 0x2a3   : > { %5508 = vmatpush3.bf16.msra.mxu1 %v5896_v60  ;;  %v5908_v60 = vld [vmem:[%s8397_s4 + $0x30] sm:$0xff]  }
 0x2a4   : > { %v2970_v0 = vmax.f32 %v2926_v53, 0.0  ;;  %v7808_v19 = vrot.slane %v2969_v3, 1  ;;  %5509 = vmatprep.subr.bf16.mxu1 %v5897_v8 }
 0x2a6   : > { %v2982_v27 = vrot.slane %v2970_v0, 1 }
 0x2a8   : > { %v3003_v25 = vsel %vm1301_vm5, %v7808_v19, %v2982_v27 }
 0x2a9   : > { %v3005_v36 = vmax.f32 %v2969_v3, %v3003_v25  ;;  %v5899_v25 = vld [vmem:[%s8397_s4 + $0x50] sm:$0xff]  }
 0x2ab   : > { %3017 = vst.msk [vmem:[#allocation3] sm:$0xff] %vm2772_vm15, %v3005_v36 }
 0x2ba   : > { %v2930_v40 = vpop.f32.mrb[4].mxu0 }
 0x2bb   : > { %v2931_v32 = vadd.f32 %v2930_v40, %v7804_v52  ;;  %v2932_v37 = vpop.f32.mrb[5].mxu0 }
 0x2bc   : > { %v2933_v24 = vpop.f32.mrb[6].mxu0  ;;  %v5900_v37 = vld [vmem:[%s8397_s4 + $0x10] sm:$0xff]  }
 0x2bd   : > { %v2971_v18 = vmax.f32 %v2931_v32, 0.0  ;;  %v2934_v12 = vadd.f32 %v2933_v24, %v7804_v52  ;;  %v2935_v29 = vpop.f32.mrb[7].mxu0  ;;  %v5901_v24 = vld [vmem:[%s8397_s4 + $0x58] sm:$0xff]  }
 0x2bf   : > { %v2983_v7 = vrot.slane %v2971_v18, 1  ;;  %v2972_v10 = vmax.f32 %v2934_v12, 0.0  ;;  %v5903_v12 = vld [vmem:[%s8397_s4 + $0x60] sm:$0xff]  }
 0x2c1   : > { %v3002_v55 = vsel %vm1301_vm5, %v2982_v27, %v2983_v7  ;;  %v2984_v31 = vrot.slane %v2972_v10, 1 }
 0x2c2   : > { %v3006_v50 = vmax.f32 %v2970_v0, %v3002_v55  ;;  %v5898_v0 = vld [vmem:[%s8397_s4 + $0x8] sm:$0xff]  }
 0x2c3   : > { %v3001_v38 = vsel %vm1301_vm5, %v2983_v7, %v2984_v31  ;;  %5510 = vmatpush3.bf16.msra.mxu1 %v5898_v0  ;;  %v5904_v7 = vld [vmem:[%s8397_s4 + $0x20] sm:$0xff]  }
 0x2c4   : > { %3018 = vst.msk [vmem:[#allocation3 + $0x8] sm:$0xff] %vm2772_vm15, %v3006_v50  ;;  %v3007_v39 = vmax.f32 %v2971_v18, %v3001_v38  ;;  %5511 = vmatprep.subr.bf16.mxu1 %v5899_v25  ;;  %v5902_v18 = vld [vmem:[%s8397_s4 + $0x18] sm:$0xff]   ;;  %v3153_v25 = vadd.s32 4294967295, %v3081_v1 }
 0x2c6   : > { %3019 = vst.msk [vmem:[#allocation3 + $0x10] sm:$0xff] %vm2772_vm15, %v3007_v39  ;;  %vm3159_vm10 = vcmp.ge.s32.totalorder %v3153_v25, 0  ;;  %v3099_v25 = vadd.s32 4294967294, %v3081_v1 }
 0x2c7   : > { %5512 = vmatpush3.bf16.msra.mxu1 %v5900_v37 }
 0x2c8   : > { %5513 = vmatprep.subr.bf16.mxu1 %v5901_v24  ;;  %vm3105_vm14 = vcmp.ge.s32.totalorder %v3099_v25, 0 }
 0x2cb   : > { %v7846_v51 = vld [vmem:[#allocation3] ss:$2 sm:$0xff]  ;;  %5514 = vmatpush3.bf16.msra.mxu1 %v5902_v18 }
 0x2cc   : > { %v3195_v20 = vrot.slane %v7846_v51, 1  ;;  %5515 = vmatprep.subr.bf16.mxu1 %v5903_v12 }
 0x2cf   : > { %5516 = vmatpush3.bf16.msra.mxu1 %v5904_v7  ;;  %v3141_v7 = vrot.slane %v7846_v51, 7 }
 0x2e9   : > { %v2938_v17 = vpop.f32.mrb[8].mxu0 }
 0x2ea   : > { %v2939_v57 = vadd.f32 %v2938_v17, %v7804_v52  ;;  %v2940_v41 = vpop.f32.mrb[9].mxu0 }
 0x2eb   : > { %v2941_v13 = vpop.f32.mrb[10].mxu0 }
 0x2ec   : > { %v2973_v62 = vmax.f32 %v2939_v57, 0.0  ;;  %v2942_v59 = vadd.f32 %v2941_v13, %v7804_v52  ;;  %v2943_v21 = vpop.f32.mrb[11].mxu0  ;;  %v5906_v57 = vld [vmem:[%s8397_s4 + $0x28] sm:$0xff]  }
 0x2ee   : > { %v2985_v6 = vrot.slane %v2973_v62, 1  ;;  %v2974_v56 = vmax.f32 %v2942_v59, 0.0 }
 0x2f0   : > { %v3000_v28 = vsel %vm1301_vm5, %v2984_v31, %v2985_v6  ;;  %v2986_v45 = vrot.slane %v2974_v56, 1  ;;  %v5905_v31 = vld [vmem:[%s8397_s4 + $0x68] sm:$0xff]  }
 0x2f1   : > { %v3008_v33 = vmax.f32 %v2972_v10, %v3000_v28  ;;  %5517 = vmatprep.subr.bf16.mxu1 %v5905_v31 }
 0x2f2   : > { %v2999_v63 = vsel %vm1301_vm5, %v2985_v6, %v2986_v45  ;;  %5518 = vmatpush3.bf16.msra.mxu1 %v5906_v57 }
 0x2f3   : > { %3020 = vst.msk [vmem:[#allocation3 + $0x18] sm:$0xff] %vm2772_vm15, %v3008_v33  ;;  %v3009_v48 = vmax.f32 %v2973_v62, %v2999_v63  ;;  %v5907_v62 = vld [vmem:[%s8397_s4 + $0x70] sm:$0xff]  }
 0x2f4   : > { %5519 = vmatprep.subr.bf16.mxu1 %v5907_v62 }
 0x2f5   : > { %3021 = vst.msk [vmem:[#allocation3 + $0x20] sm:$0xff] %vm2772_vm15, %v3009_v48 }
 0x2f6   : > { %5520 = vmatpush3.bf16.msra.mxu1 %v5908_v60 }
 0x2fa   : > { %v7842_v26 = vld [vmem:[#allocation3 + $0x10] ss:$2 sm:$0xff] }
 0x2fb   : > { %v3196_v3 = vrot.slane %v7842_v26, 1 }
 0x2fd   : > { %v3205_v36 = vsel %vm1301_vm5, %v3195_v20, %v3196_v3 }
 0x30b   : > { %v2946_v9 = vpop.f32.mrb[12].mxu0 }
 0x30c   : > { %v2947_v15 = vadd.f32 %v2946_v9, %v7804_v52  ;;  %v2948_v22 = vpop.f32.mrb[13].mxu0 }
 0x30d   : > { %v2949_v44 = vpop.f32.mrb[14].mxu0 }
 0x30e   : > { %v2975_v54 = vmax.f32 %v2947_v15, 0.0  ;;  %v2950_v43 = vadd.f32 %v2949_v44, %v7804_v52  ;;  %v2951_v14 = vpop.f32.mrb[15].mxu0 }
 0x310   : > { %v2987_v30 = vrot.slane %v2975_v54, 1  ;;  %v2976_v4 = vmax.f32 %v2950_v43, 0.0 }
 0x312   : > { %v2998_v46 = vsel %vm1301_vm5, %v2986_v45, %v2987_v30  ;;  %v2988_v47 = vrot.slane %v2976_v4, 1 }
 0x313   : > { %v3010_v42 = vmax.f32 %v2974_v56, %v2998_v46 }
 0x314   : > { %v2997_v35 = vsel %vm1301_vm5, %v2987_v30, %v2988_v47  ;;  %v7914_v30 = vadd.s32 40, %v6299_v2 }
 0x315   : > { %3022 = vst.msk [vmem:[#allocation3 + $0x28] sm:$0xff] %vm2772_vm15, %v3010_v42  ;;  %v3011_v16 = vmax.f32 %v2975_v54, %v2997_v35  ;;  %v3084_v35 = vand.u32 15, %v7259_v58 }
 0x316   : > { %v3086_v23 = vand.u32 15, %v7914_v30  ;;  %v4423_v30 = vld [vmem:[%s342_s15] sm:$0x1] }
 0x317   : > { %3023 = vst.msk [vmem:[#allocation3 + $0x30] sm:$0xff] %vm2772_vm15, %v3011_v16  ;;  %v7924_v16 = vadd.s32 16, %v6299_v2 }
 0x319   : > { %v3083_v0 = vand.u32 15, %v7924_v16 }
 0x31b   : > { %v3155_v18 = vadd.s32 4294967295, %v3083_v0 }
 0x31c   : > { %v7857_v5 = vld [vmem:[#allocation3 + $0x20] ss:$2 sm:$0xff] }
 0x31d   : > { %v3197_v53 = vrot.slane %v7857_v5, 1  ;;  %vm3161_vm12 = vcmp.ge.s32.totalorder %v3155_v18, 0 }
 0x31f   : > { %v3204_v27 = vsel %vm1301_vm5, %v3196_v3, %v3197_v53  ;;  %v3210_v3 = vadd.s32 1, %v3084_v35 }
 0x320   : > { %v3244_v40 = vsel %vm3220_vm8, %v3204_v27, 0.0  ;;  %v3085_v27 = vand.u32 15, %v7265_v61  ;;  %vm6164_vm8 = vmmov 0  }
 0x321   : > { %v5855_v32 = vpack.i.bf16 %v3244_v40, %v3205_v36  ;;  %v3212_v36 = vadd.s32 1, %v3086_v23  ;;  %v5910_v40 = vld [vmem:[%s8397_s4 + $0x38] sm:$0xff]   ;;  %vm3222_vm9 = vcmp.lt.s32.totalorder %v3210_v3, 16 }
 0x322   : > { %v3157_v12 = vadd.s32 4294967295, %v3085_v27 }
 0x323   : > { %5856 = vrot.lane.b32.xlu0 %v5855_v32, %s6160_s12  ;;  %vm3224_vm11 = vcmp.lt.s32.totalorder %v3212_v36, 16  ;;  %v3087_v36 = vrot.slane %v7846_v51, 6 }
 0x324   : > { %vm3163_vm13 = vcmp.ge.s32.totalorder %v3157_v12, 0 }
 0x32a   : > { %v2954_v29 = vpop.f32.mrb[16].mxu0 }
 0x32b   : > { %v2955_v10 = vadd.f32 %v2954_v29, %v7804_v52  ;;  %v2956_v55 = vpop.f32.mrb[17].mxu0 }
 0x32c   : > { %v2957_v50 = vpop.f32.mrb[18].mxu0 }
 0x32d   : > { %v2977_v38 = vmax.f32 %v2955_v10, 0.0  ;;  %v2958_v39 = vadd.f32 %v2957_v50, %v7804_v52  ;;  %v2959_v17 = vpop.f32.mrb[19].mxu0  ;;  %v3142_v10 = vrot.slane %v7842_v26, 7 }
 0x32f   : > { %v2989_v41 = vrot.slane %v2977_v38, 1  ;;  %v2978_v13 = vmax.f32 %v2958_v39, 0.0 }
 0x331   : > { %v2996_v59 = vsel %vm1301_vm5, %v2988_v47, %v2989_v41  ;;  %v2990_v21 = vrot.slane %v2978_v13, 1 }
 0x332   : > { %v3012_v6 = vmax.f32 %v2976_v4, %v2996_v59  ;;  %v2962_v56 = vpop.f32.mrb[20].mxu0 }
 0x333   : > { %v2995_v28 = vsel %vm1301_vm5, %v2989_v41, %v2990_v21  ;;  %v2963_v45 = vadd.f32 %v2962_v56, %v7804_v52  ;;  %v2964_v33 = vpop.f32.mrb[21].mxu0 }
 0x334   : > { %3024 = vst.msk [vmem:[#allocation3 + $0x38] sm:$0xff] %vm2772_vm15, %v3012_v6  ;;  %v3013_v63 = vmax.f32 %v2977_v38, %v2995_v28  ;;  %v2965_v48 = vpop.f32.mrb[22].mxu0  ;;  %v3143_v38 = vrot.slane %v7857_v5, 7 }
 0x335   : > { %v2979_v9 = vmax.f32 %v2963_v45, 0.0  ;;  %v2966_v15 = vadd.f32 %v2965_v48, %v7804_v52  ;;  %v2967_v22 = vpop.f32.mrb[23].mxu0 }
 0x336   : > { %3025 = vst.msk [vmem:[#allocation3 + $0x40] sm:$0xff] %vm2772_vm15, %v3013_v63  ;;  %v4622_v22 = vld [vmem:[#allocation7 + $0x20] sm:$0xff] }
 0x337   : > { %v2991_v44 = vrot.slane %v2979_v9, 1  ;;  %v2980_v54 = vmax.f32 %v2966_v15, 0.0 }
 0x339   : > { %v2994_v43 = vsel %vm1301_vm5, %v2990_v21, %v2991_v44  ;;  %v2992_v14 = vrot.slane %v2980_v54, 1  ;;  %v6163_v21 = vmov 0.0  }
 0x33a   : > { %v3014_v4 = vmax.f32 %v2978_v13, %v2994_v43 }
 0x33b   : > { %v2993_v46 = vsel %vm1301_vm5, %v2991_v44, %v2992_v14  ;;  %v3004_v52 = vsel %vm1301_vm5, %v2992_v14, %v7808_v19  ;;  %v5909_v19 = vld [vmem:[%s8397_s4 + $0x78] sm:$0xff]   ;;  %v4700_v14 = vld [vmem:[#allocation7 + $0x34] ss:$0 sm:$0xff] }
 0x33c   : > { %3026 = vst.msk [vmem:[#allocation3 + $0x48] sm:$0xff] %vm2772_vm15, %v3014_v4  ;;  %v3015_v47 = vmax.f32 %v2979_v9, %v2993_v46  ;;  %v3016_v42 = vmax.f32 %v2980_v54, %v3004_v52  ;;  %v7936_v8 = vld [vmem:[#allocation3 + $0x30] ss:$2 sm:$0xff]  ;;  %5521 = vmatprep.subr.bf16.mxu1 %v5909_v19  ;;  %v4623_v4 = vld [vmem:[#allocation7 + $0x30] sm:$0xf] }
 0x33d   : > { %v3198_v37 = vrot.slane %v7936_v8, 1  ;;  %5522 = vmatpush3.bf16.msra.mxu1 %v5910_v40  ;;  %v3144_v57 = vrot.slane %v7936_v8, 7 }
 0x33e   : > { %3027 = vst.msk [vmem:[#allocation3 + $0x50] sm:$0xff] %vm2772_vm15, %v3015_v47  ;;  %3028 = vst.msk [vmem:[#allocation3 + $0x58] sm:$0xff] %vm2772_vm15, %v3016_v42  ;;  %5603 = vmatprep.subr.bf16.mxu1 %v6163_v21 }
 0x33f   : > { %v3203_v39 = vsel %vm1301_vm5, %v3197_v53, %v3198_v37  ;;  %v3151_v53 = vsel %vm788_vm1, %v3141_v7, %v3142_v10  ;;  %v3149_v33 = vsel %vm788_vm1, %v3143_v38, %v3144_v57 }
 0x343   : > { %v7949_v32 = vld [vmem:[#allocation3 + $0x40] ss:$2 sm:$0xff] }
 0x344   : > { %v3199_v24 = vrot.slane %v7949_v32, 1  ;;  %v3145_v59 = vrot.slane %v7949_v32, 7 }
 0x345   : > { %v7957_v29 = vld [vmem:[#allocation3 + $0x50] ss:$2 sm:$0xff] }
 0x346   : > { %v3202_v55 = vsel %vm1301_vm5, %v3198_v37, %v3199_v24  ;;  %v3146_v31 = vrot.slane %v7957_v29, 7  ;;  %v3200_v50 = vrot.slane %v7957_v29, 1  ;;  %v3148_v48 = vsel %vm788_vm1, %v3144_v57, %v3145_v59 }
 0x347   : > { %v3246_v17 = vsel %vm3222_vm9, %v3202_v55, 0.0  ;;  %v3193_v54 = vsel %vm3163_vm13, %v3148_v48, 0.0  ;;  %v3092_v3 = vrot.slane %v7957_v29, 6  ;;  %v3088_v37 = vrot.slane %v7842_v26, 6 }
 0x348   : > { %v5865_v41 = vpack.i.bf16 %v3246_v17, %v3203_v39  ;;  %v3152_v13 = vsel %vm788_vm1, %v3146_v31, %v3141_v7  ;;  %v3206_v62 = vsel %vm1301_vm5, %v3200_v50, %v3195_v20  ;;  %v3201_v56 = vsel %vm1301_vm5, %v3199_v24, %v3200_v50 }
 0x349   : > { %v3189_v6 = vsel %vm3159_vm10, %v3152_v13, 0.0  ;;  %v3248_v28 = vsel %vm3224_vm11, %v3206_v62, 0.0  ;;  %v3150_v20 = vsel %vm788_vm1, %v3142_v10, %v3143_v38  ;;  %v3147_v44 = vsel %vm788_vm1, %v3145_v59, %v3146_v31 }
 0x34a   : > { %5866 = vrot.lane.b32.xlu0 %v5865_v41, %s6160_s12  ;;  %v5860_v45 = vpack.i.bf16 %v3151_v53, %v3189_v6  ;;  %v5875_v63 = vpack.i.bf16 %v3248_v28, %v3201_v56  ;;  %v3191_v9 = vsel %vm3161_vm12, %v3150_v20, 0.0  ;;  %v5880_v43 = vpack.i.bf16 %v3147_v44, %v3193_v54 }
 0x34b   : > { %v5870_v15 = vpack.i.bf16 %v3149_v33, %v3191_v9  ;;  %v3098_v12 = vsel %vm446_vm0, %v3092_v3, %v3087_v36  ;;  %v3101_v10 = vadd.s32 4294967294, %v3083_v0  ;;  %v3089_v50 = vrot.slane %v7857_v5, 6  ;;  %v5911_v0 = vld [vmem:[%s8397_s4 + $0x80] sm:$0xff]  }
 0x34c   : > { %5861 = vrot.lane.b32.xlu1 %v5860_v45, %s6160_s12  ;;  %v3097_v1 = vsel %vm446_vm0, %v3087_v36, %v3088_v37  ;;  %v3135_v38 = vsel %vm3105_vm14, %v3098_v12, 0.0  ;;  %v3090_v53 = vrot.slane %v7936_v8, 6  ;;  %v3091_v54 = vrot.slane %v7949_v32, 6 }
 0x34d   : > { %vm3107_vm3 = vcmp.ge.s32.totalorder %v3101_v10, 0  ;;  %v3096_v45 = vsel %vm446_vm0, %v3088_v37, %v3089_v50  ;;  %v3251_v37 = vrot.slane %v7857_v5, 2  ;;  %vm4431_vm9 = vcmask 1041408  }
 0x34e   : > { %5876 = vrot.lane.b32.xlu0 %v5875_v63, %s6160_s12  ;;  %v5912_v63 = vld [vmem:[%s8397_s4 + $0x88] sm:$0xff]   ;;  %v3095_v48 = vsel %vm446_vm0, %v3089_v50, %v3090_v53  ;;  %v3137_v9 = vsel %vm3107_vm3, %v3096_v45, 0.0  ;;  %v3264_v10 = vadd.s32 2, %v3084_v35  ;;  %v3252_v50 = vrot.slane %v7936_v8, 2  ;;  %v5929_v45 = vld [vmem:[#allocation5 + $0x44] ss:$8 sps:$4 sm:$0xff]  }
 0x34f   : > { %v3254_v35 = vrot.slane %v7957_v29, 2  ;;  %vm4427_vm12 = vcmask 31744  }
 0x350   : > { %5871 = vrot.lane.b32.xlu1 %v5870_v15, %s6160_s12  ;;  %v3103_v15 = vadd.s32 4294967294, %v3085_v27  ;;  %vm3276_vm10 = vcmp.lt.s32.totalorder %v3264_v10, 16 }
 0x352   : > { %4626 = vperm.xlu0 %5763, %v4622_v22   ;;  %vm3109_vm6 = vcmp.ge.s32.totalorder %v3103_v15, 0  ;;  %v5936_v15 = vld [vmem:[#allocation5 + $0x70] ss:$8 sps:$4 sm:$0xff]  }
 0x354   : > { %5881 = vrot.lane.b32.xlu1 %v5880_v43, %s6160_s12 }
 0x356   : > { %4703 = vperm.xlu0 %5763, %v4700_v14  }
 0x358   : > { %4631 = vperm.xlu1 %5764, %v4623_v4  }
 0x395   : > { %v5857_v46 = vpop.permute.xlu0 %5856 }
 0x396   : > { %v5859_v52 = vunpack.i.h.bf16 %v5857_v46  ;;  %v5858_v47 = vunpack.i.l.bf16 %v5857_v46  ;;  %v5913_v46 = vld [vmem:[%s8397_s4 + $0x90] sm:$0xff]  }
 0x398   : > { %v3357_v42 = vsel %vm2772_vm15, %v7846_v51, %v5858_v47  ;;  %v3358_v60 = vsel %vm2772_vm15, %v7842_v26, %v5859_v52 }
 0x399   : > { %v3364_v19 = vpack.c.bf16 %v3358_v60, %v3357_v42  ;;  %v3094_v42 = vsel %vm446_vm0, %v3090_v53, %v3091_v54  ;;  %v5914_v60 = vld [vmem:[%s8397_s4 + $0x98] sm:$0xff]  }
 0x39a   : > { %v3139_v25 = vsel %vm3109_vm6, %v3094_v42, 0.0  ;;  %v5923_v53 = vld [vmem:[#allocation5 + $0x24] ss:$8 sps:$4 sm:$0xff]   ;;  %v5954_v42 = vld [vmem:[#allocation5 + $0xd0] ss:$8 sps:$4 sm:$0xff]  }
 0x39b   : > { %3533 = vmatprep.mubr.bf16.mxu1 %v3364_v19  ;;  %v3093_v19 = vsel %vm446_vm0, %v3091_v54, %v3092_v3  ;;  %v5944_v54 = vld [vmem:[#allocation5 + $0x94] ss:$8 sps:$4 sm:$0xff]  }
 0x3bc   : > { %v5867_v40 = vpop.permute.xlu0 %5866 }
 0x3bd   : > { %v5869_v24 = vunpack.i.h.bf16 %v5867_v40  ;;  %v5868_v18 = vunpack.i.l.bf16 %v5867_v40 }
 0x3be   : > { %v5862_v7 = vpop.permute.xlu1 %5861 }
 0x3bf   : > { %v5864_v55 = vunpack.i.h.bf16 %v5862_v7  ;;  %v5863_v31 = vunpack.i.l.bf16 %v5862_v7  ;;  %v3359_v39 = vsel %vm2772_vm15, %v7857_v5, %v5868_v18  ;;  %v3360_v17 = vsel %vm2772_vm15, %v7936_v8, %v5869_v24 }
 0x3c0   : > { %v5877_v57 = vpop.permute.xlu0 %5876  ;;  %v3367_v28 = vpack.c.bf16 %v3360_v17, %v3359_v39  ;;  %v3262_v24 = vadd.s32 2, %v3082_v49  ;;  %v3250_v18 = vrot.slane %v7842_v26, 2  ;;  %v3249_v5 = vrot.slane %v7846_v51, 2  ;;  %v4424_v49 = vld [vmem:[%s8399_s6] sm:$0x3] }
 0x3c1   : > { %v3351_v41 = vsel %vm2772_vm15, %v3135_v38, %v5863_v31  ;;  %v3352_v13 = vsel %vm2772_vm15, %v3097_v1, %v5864_v55  ;;  %v5879_v20 = vunpack.i.h.bf16 %v5877_v57  ;;  %v5878_v33 = vunpack.i.l.bf16 %v5877_v57 }
 0x3c2   : > { %v5872_v62 = vpop.permute.xlu1 %5871  ;;  %v3363_v59 = vpack.c.bf16 %v3352_v13, %v3351_v41  ;;  %v3258_v3 = vsel %vm1642_vm4, %v3250_v18, %v3251_v37  ;;  %vm3274_vm7 = vcmp.lt.s32.totalorder %v3262_v24, 16  ;;  %v3253_v26 = vrot.slane %v7949_v32, 2  ;;  %v5915_v41 = vld [vmem:[#allocation5] ss:$8 sps:$4 sm:$0xff]   ;;  %v5917_v13 = vld [vmem:[#allocation5 + $0x4] ss:$8 sps:$4 sm:$0xff]  }
 0x3c3   : > { %v5874_v6 = vunpack.i.h.bf16 %v5872_v62  ;;  %v5873_v56 = vunpack.i.l.bf16 %v5872_v62  ;;  %v3361_v14 = vsel %vm2772_vm15, %v7949_v32, %v5878_v33  ;;  %v3362_v4 = vsel %vm2772_vm15, %v7957_v29, %v5879_v20  ;;  %4264 = vmatprep.subr.bf16.mxu0 %v5917_v13  ;;  %v5918_v62 = vld [vmem:[#allocation5 + $0x10] ss:$8 sps:$4 sm:$0xff]   ;;  %v5932_v20 = vld [vmem:[#allocation5 + $0x54] ss:$8 sps:$4 sm:$0xff]  }
 0x3c4   : > { %3534 = vmatmul.mubr.bf16.vlgmr.msra.gmra.mrb[0].mxu1 %v3363_v59  ;;  %v3370_v47 = vpack.c.bf16 %v3362_v4, %v3361_v14  ;;  %v3298_v7 = vsel %vm3274_vm7, %v3258_v3, 0.0  ;;  %v3259_v55 = vsel %vm1642_vm4, %v3249_v5, %v3250_v18  ;;  %v4433_v1 = vsel %vm4431_vm9, %v4424_v49, 0  ;;  %4265 = vmatpush1.bf16.msra.mxu0 %v5915_v41  ;;  %v5921_v59 = vld [vmem:[#allocation5 + $0x20] ss:$8 sps:$4 sm:$0xff]   ;;  %v5930_v33 = vld [vmem:[#allocation5 + $0x50] ss:$8 sps:$4 sm:$0xff]  }
 0x3c5   : > { %3541 = vmatprep.mubr.bf16.mxu1 %v3367_v28  ;;  %5604 = vmatpush3.bf16.msra.mxu1 %v5911_v0  ;;  %v3353_v22 = vsel %vm2772_vm15, %v3137_v9, %v5873_v56  ;;  %v3354_v44 = vsel %vm2772_vm15, %v3095_v48, %v5874_v6  ;;  %v3365_v31 = vpack.c.bf16 %v3298_v7, %v3259_v55  ;;  %v3266_v8 = vadd.s32 2, %v3086_v23  ;;  %v5920_v0 = vld [vmem:[#allocation5 + $0x14] ss:$8 sps:$4 sm:$0xff]   ;;  %v5924_v56 = vld [vmem:[#allocation5 + $0x30] ss:$8 sps:$4 sm:$0xff]  }
 0x3c6   : > { %5605 = vmatprep.subr.bf16.mxu1 %v6163_v21  ;;  %v5882_v43 = vpop.permute.xlu1 %5881  ;;  %v3366_v61 = vpack.c.bf16 %v3354_v44, %v3353_v22  ;;  %v3256_v51 = vsel %vm1642_vm4, %v3252_v50, %v3253_v26  ;;  %v3257_v32 = vsel %vm1642_vm4, %v3251_v37, %v3252_v50  ;;  %v3260_v39 = vsel %vm1642_vm4, %v3254_v35, %v3249_v5  ;;  %v5926_v6 = vld [vmem:[#allocation5 + $0x34] ss:$8 sps:$4 sm:$0xff]   ;;  %v5927_v28 = vld [vmem:[#allocation5 + $0x40] ss:$8 sps:$4 sm:$0xff]   ;;  %v5935_v48 = vld [vmem:[#allocation5 + $0x64] ss:$8 sps:$4 sm:$0xff]  }
 0x3c7   : > { %v5884_v27 = vunpack.i.h.bf16 %v5882_v43  ;;  %v5883_v52 = vunpack.i.l.bf16 %v5882_v43  ;;  %v3300_v58 = vsel %vm3276_vm10, %v3256_v51, 0.0  ;;  %vm3278_vm11 = vcmp.lt.s32.totalorder %v3266_v8, 16  ;;  %4266 = vmatprep.subr.bf16.mxu0 %v5920_v0  ;;  %v5938_v9 = vld [vmem:[#allocation5 + $0x74] ss:$8 sps:$4 sm:$0xff]   ;;  %v5941_v22 = vld [vmem:[#allocation5 + $0x84] ss:$8 sps:$4 sm:$0xff]  }
 0x3c8   : > { %v3368_v38 = vpack.c.bf16 %v3300_v58, %v3257_v32  ;;  %v3255_v17 = vsel %vm1642_vm4, %v3253_v26, %v3254_v35  ;;  %v3302_v29 = vsel %vm3278_vm11, %v3260_v39, 0.0  ;;  %v4425_v23 = vpack.c.bf16 %v4423_v30, %v4423_v30  ;;  %4267 = vmatpush1.bf16.msra.mxu0 %v5918_v62  ;;  %v5939_v44 = vld [vmem:[#allocation5 + $0x80] ss:$8 sps:$4 sm:$0xff]   ;;  %v5942_v43 = vld [vmem:[#allocation5 + $0x90] ss:$8 sps:$4 sm:$0xff]  }
 0x3c9   : > { %5606 = vmatpush3.bf16.msra.mxu1 %v5912_v63  ;;  %v3355_v36 = vsel %vm2772_vm15, %v3139_v25, %v5883_v52  ;;  %v3356_v40 = vsel %vm2772_vm15, %v3093_v19, %v5884_v27  ;;  %v3371_v57 = vpack.c.bf16 %v3302_v29, %v3255_v17  ;;  %4268 = vmatprep.subr.bf16.mxu0 %v5923_v53  ;;  %v5933_v63 = vld [vmem:[#allocation5 + $0x60] ss:$8 sps:$4 sm:$0xff]   ;;  %v5947_v14 = vld [vmem:[#allocation5 + $0xa4] ss:$8 sps:$4 sm:$0xff]   ;;  %v5962_v25 = vld [vmem:[#allocation5 + $0xf4] ss:$8 sps:$4 sm:$0xff]  }
 0x3ca   : > { %5607 = vmatprep.subr.bf16.mxu1 %v6163_v21  ;;  %v3369_v12 = vpack.c.bf16 %v3356_v40, %v3355_v36  ;;  %v5945_v4 = vld [vmem:[#allocation5 + $0xa0] ss:$8 sps:$4 sm:$0xff]   ;;  %v5953_v27 = vld [vmem:[#allocation5 + $0xc4] ss:$8 sps:$4 sm:$0xff]   ;;  %v5960_v36 = vld [vmem:[#allocation5 + $0xf0] ss:$8 sps:$4 sm:$0xff]  }
 0x3cb   : > { %v5951_v52 = vld [vmem:[#allocation5 + $0xc0] ss:$8 sps:$4 sm:$0xff]   ;;  %v5965_v40 = vld [vmem:[#allocation5 + $0x104] ss:$8 sps:$4 sm:$0xff]   ;;  %v6032_v0 = vld [vmem:[%s8399_s6 + $0x8] sm:$0xff]  }
 0x3cc   : > { %3542 = vmatmul.mubr.bf16.gmra.mrb[4].mxu1 %v3366_v61  ;;  %4269 = vmatpush1.bf16.msra.mxu0 %v5921_v59  ;;  %v5948_v61 = vld [vmem:[#allocation5 + $0xb0] ss:$8 sps:$4 sm:$0xff]   ;;  %v5957_v19 = vld [vmem:[#allocation5 + $0xe0] ss:$8 sps:$4 sm:$0xff]  }
 0x3cd   : > { %3549 = vmatprep.mubr.bf16.mxu1 %v3370_v47  ;;  %5608 = vmatpush3.bf16.msra.mxu1 %v5913_v46  ;;  %v5950_v46 = vld [vmem:[#allocation5 + $0xb4] ss:$8 sps:$4 sm:$0xff]   ;;  %v3080_v32 = vld [vmem:[#allocation7 + $0x2] ss:$0 sm:$0xff] }
 0x3ce   : > { %5609 = vmatprep.subr.bf16.mxu1 %v6163_v21  ;;  %4270 = vmatprep.subr.bf16.mxu0 %v5926_v6  ;;  %v5956_v47 = vld [vmem:[#allocation5 + $0xd4] ss:$8 sps:$4 sm:$0xff]  }
 0x3d0   : > { %4271 = vmatpush1.bf16.msra.mxu0 %v5924_v56  ;;  %v6036_v56 = vld [vmem:[%s8399_s6 + $0x10] sm:$0xff]  }
 0x3d1   : > { %5610 = vmatpush3.bf16.msra.mxu1 %v5914_v60  ;;  %4272 = vmatprep.subr.bf16.mxu0 %v5929_v45  ;;  %v5959_v60 = vld [vmem:[#allocation5 + $0xe4] ss:$8 sps:$4 sm:$0xff]  }
 0x3d2   : > { %5623 = vmatprep.subr.bf16.mxu1 %v6163_v21 }
 0x3d4   : > { %3550 = vmatmul.mubr.bf16.gmra.mrb[8].mxu1 %v3369_v12  ;;  %4273 = vmatpush1.bf16.msra.mxu0 %v5927_v28 }
 0x3d5   : > { %5611 = vmatprep.mubr.msk.bf16.mxu1 %vm6164_vm8, %v6163_v21  ;;  %4274 = vmatprep.subr.bf16.mxu0 %v5932_v20 }
 0x3d8   : > { %4275 = vmatpush1.bf16.msra.mxu0 %v5930_v33 }
 0x3d9   : > { %4276 = vmatprep.subr.bf16.mxu0 %v5935_v48 }
 0x3dc   : > { %5612 = vmatmul.mubr.msk.bf16.vlgmr.msra.gmra.mrb[12].mxu1 %vm2772_vm15, %v3365_v31  ;;  %4277 = vmatpush1.bf16.msra.mxu0 %v5933_v63 }
 0x3dd   : > { %5615 = vmatprep.mubr.msk.bf16.mxu1 %vm6164_vm8, %v6163_v21  ;;  %5624 = vmatpush3.bf16.msra.mxu1 %v4433_v1 }
 0x3de   : > { %5629 = vmatprep.subr.bf16.mxu1 %v6163_v21  ;;  %4278 = vmatprep.subr.bf16.mxu0 %v5938_v9 }
 0x3e0   : > { %4279 = vmatpush1.bf16.msra.mxu0 %v5936_v15 }
 0x3e1   : > { %4280 = vmatprep.subr.bf16.mxu0 %v5941_v22 }
 0x3e4   : > { %5616 = vmatmul.mubr.msk.bf16.gmra.mrb[16].mxu1 %vm2772_vm15, %v3368_v38  ;;  %4281 = vmatpush1.bf16.msra.mxu0 %v5939_v44 }
 0x3e5   : > { %5619 = vmatprep.mubr.msk.bf16.mxu1 %vm6164_vm8, %v6163_v21  ;;  %4282 = vmatprep.subr.bf16.mxu0 %v5944_v54 }
 0x3e8   : > { %4283 = vmatpush1.bf16.msra.mxu0 %v5942_v43 }
 0x3e9   : > { %4284 = vmatprep.subr.bf16.mxu0 %v5947_v14 }
 0x3ec   : > { %5620 = vmatmul.mubr.msk.bf16.gmra.mrb[20].mxu1 %vm2772_vm15, %v3371_v57  ;;  %4285 = vmatpush1.bf16.msra.mxu0 %v5945_v4 }
 0x3ed   : > { %5625 = vmatprep.mubr.msk.bf16.mxu1 %vm6164_vm8, %v6163_v21  ;;  %4286 = vmatprep.subr.bf16.mxu0 %v5950_v46 }
 0x3f0   : > { %4287 = vmatpush1.bf16.msra.mxu0 %v5948_v61 }
 0x3f1   : > { %4288 = vmatprep.subr.bf16.mxu0 %v5953_v27 }
 0x3f4   : > { %5626 = vmatmul.mubr.msk.bf16.vlgmr.msra.gmra.mrb[24].mxu1 %vm4427_vm12, %v4425_v23  ;;  %4289 = vmatpush1.bf16.msra.mxu0 %v5951_v52 }
 0x3f5   : > { %5633 = vmatprep.mubr.msk.bf16.mxu1 %vm6164_vm8, %v6163_v21  ;;  %4290 = vmatprep.subr.bf16.mxu0 %v5956_v47 }
 0x3f6   : > { %5630 = vmatpush3.bf16.msra.mxu1 %v6032_v0 }
 0x3f7   : > { %5631 = vmatprep.subr.bf16.mxu1 %v6163_v21 }
 0x3f8   : > { %4291 = vmatpush1.bf16.msra.mxu0 %v5954_v42 }
 0x3f9   : > { %4292 = vmatprep.subr.bf16.mxu0 %v5959_v60 }
 0x3fa   : > { %5632 = vmatpush3.bf16.msra.mxu1 %v6036_v56 }
 0x3fb   : > { %5637 = vmatprep.subr.bf16.mxu1 %v6163_v21 }
 0x3fc   : > { %4293 = vmatpush1.bf16.msra.mxu0 %v5957_v19 }
 0x3fd   : > { %4294 = vmatprep.subr.bf16.mxu0 %v5962_v25 }
 0x400   : > { %4295 = vmatpush1.bf16.msra.mxu0 %v5960_v36 }
 0x401   : > { %4315 = vmatprep.subr.bf16.mxu0 %v5965_v40 }
 0x497   : > { %v5523_v37 = vpop.f32.mrb[0].mxu1 }
 0x498   : > { %v5524_v24 = vpop.f32.mrb[1].mxu1 }
 0x499   : > { %v5525_v18 = vadd.f32 %v5524_v24, %v5523_v37  ;;  %v5526_v12 = vpop.f32.mrb[2].mxu1 }
 0x49a   : > { %v5527_v3 = vpop.f32.mrb[3].mxu1 }
 0x49b   : > { %v5528_v5 = vadd.f32 %v5527_v3, %v5526_v12  ;;  %v3536_v38 = vadd.f32 %v5525_v18, %v3080_v32  ;;  %v4426_v12 = vld [vmem:[#allocation7 + $0x4] ss:$0 sm:$0xff] }
 0x49d   : > { %v3539_v57 = vadd.f32 %v5528_v5, %v3080_v32 }
 0x49f   : > { %v5529_v7 = vpop.f32.mrb[4].mxu1 }
 0x4a0   : > { %v5530_v49 = vpop.f32.mrb[5].mxu1 }
 0x4a1   : > { %v5531_v26 = vadd.f32 %v5530_v49, %v5529_v7  ;;  %v5532_v10 = vpop.f32.mrb[6].mxu1 }
 0x4a2   : > { %v5533_v55 = vpop.f32.mrb[7].mxu1 }
 0x4a3   : > { %v5534_v31 = vadd.f32 %v5533_v55, %v5532_v10  ;;  %v3544_v6 = vadd.f32 %v5531_v26, %v3080_v32 }
 0x4a5   : > { %v3547_v63 = vadd.f32 %v5534_v31, %v3080_v32 }
 0x4a7   : > { %v5535_v50 = vpop.f32.mrb[8].mxu1 }
 0x4a8   : > { %v5536_v1 = vpop.f32.mrb[9].mxu1 }
 0x4a9   : > { %v5537_v51 = vadd.f32 %v5536_v1, %v5535_v50  ;;  %v5538_v58 = vpop.f32.mrb[10].mxu1 }
 0x4aa   : > { %v5539_v35 = vpop.f32.mrb[11].mxu1 }
 0x4ab   : > { %v5540_v8 = vadd.f32 %v5539_v35, %v5538_v58  ;;  %v3552_v46 = vadd.f32 %v5537_v51, %v3080_v32  ;;  %v8122_v51 = vand.u32 7, %v6299_v2  ;;  %v8125_v35 = vand.u32 7, %v7833_v34 }
 0x4ad   : > { %v3555_v60 = vadd.f32 %v5540_v8, %v3080_v32  ;;  %v3742_v34 = vadd.s32 4294967294, %v8125_v35 }
 0x4af   : > { %v3592_v39 = vpop.f32.mrb[12].mxu1  ;;  %vm3745_vm3 = vcmp.ge.s32.totalorder %v3742_v34, 0  ;;  %v5995_v34 = vld [vmem:[#allocation5 + $0x1a4] ss:$8 sps:$4 sm:$0xff]  }
 0x4b0   : > { %v3593_v17 = vadd.f32 %v3592_v39, %v3536_v38  ;;  %v5613_v29 = vpop.f32.mrb[13].mxu1  ;;  %v6037_v38 = vld [vmem:[%s8399_s6 + $0x18] sm:$0xff]   ;;  %v8131_v39 = vand.u32 7, %v7924_v16 }
 0x4b1   : > { %v3595_v30 = vpop.f32.mrb[14].mxu1  ;;  %v3768_v29 = vadd.s32 4294967295, %v8122_v51 }
 0x4b2   : > { %v3615_v23 = vmax.f32 %v3593_v17, 0.0  ;;  %v3596_v41 = vadd.f32 %v3595_v30, %v3539_v57  ;;  %v5614_v13 = vpop.f32.mrb[15].mxu1  ;;  %v3769_v57 = vadd.s32 4294967295, %v8125_v35  ;;  %v3741_v30 = vadd.s32 4294967294, %v8122_v51 }
 0x4b3   : > { %v3770_v13 = vadd.s32 4294967295, %v8131_v39  ;;  %vm3771_vm13 = vcmp.ge.s32.totalorder %v3768_v29, 0  ;;  %v5987_v29 = vld [vmem:[#allocation5 + $0x180] ss:$8 sps:$4 sm:$0xff]  }
 0x4b4   : > { %v3616_v62 = vmax.f32 %v3596_v41, 0.0  ;;  %v3621_v59 = vrot.slane %v3615_v23, 1  ;;  %v6038_v41 = vld [vmem:[%s8399_s6 + $0x20] sm:$0xff]   ;;  %vm3744_vm14 = vcmp.ge.s32.totalorder %v3741_v30, 0 }
 0x4b5   : > { %vm3773_vm6 = vcmp.ge.s32.totalorder %v3770_v13, 0  ;;  %vm5433_vm9 = vmpackc.low %vm3745_vm3, %vm3744_vm14  ;;  %v5990_v30 = vld [vmem:[#allocation5 + $0x190] ss:$8 sps:$4 sm:$0xff]   ;;  %v5998_v13 = vld [vmem:[#allocation5 + $0x1b4] ss:$8 sps:$4 sm:$0xff]  }
 0x4b6   : > { %v3622_v53 = vrot.slane %v3616_v62, 1  ;;  %vm5436_vm10 = vmpackc.low %vm3773_vm6, %vm3773_vm6 }
 0x4b7   : > { %v3600_v28 = vpop.f32.mrb[16].mxu1 }
 0x4b8   : > { %v3631_v45 = vsel %vm1301_vm5, %v3621_v59, %v3622_v53  ;;  %v3601_v20 = vadd.f32 %v3600_v28, %v3544_v6  ;;  %v5617_v33 = vpop.f32.mrb[17].mxu1 }
 0x4b9   : > { %v3633_v48 = vmax.f32 %v3615_v23, %v3631_v45  ;;  %v3603_v9 = vpop.f32.mrb[18].mxu1 }
 0x4ba   : > { %v3617_v15 = vmax.f32 %v3601_v20, 0.0  ;;  %v3604_v22 = vadd.f32 %v3603_v9, %v3547_v63  ;;  %v5618_v44 = vpop.f32.mrb[19].mxu1 }
 0x4bb   : > { %3639 = vst [vmem:[#allocation4] sm:$0xff] %v3633_v48 }
 0x4bc   : > { %v3623_v54 = vrot.slane %v3617_v15, 1  ;;  %v3618_v43 = vmax.f32 %v3604_v22, 0.0 }
 0x4be   : > { %v3630_v14 = vsel %vm1301_vm5, %v3622_v53, %v3623_v54  ;;  %v3624_v4 = vrot.slane %v3618_v43, 1 }
 0x4bf   : > { %v3634_v61 = vmax.f32 %v3616_v62, %v3630_v14  ;;  %v3608_v27 = vpop.f32.mrb[20].mxu1 }
 0x4c0   : > { %v3629_v52 = vsel %vm1301_vm5, %v3623_v54, %v3624_v4  ;;  %v3609_v47 = vadd.f32 %v3608_v27, %v3552_v46  ;;  %v5621_v42 = vpop.f32.mrb[21].mxu1  ;;  %v3743_v46 = vadd.s32 4294967294, %v8131_v39 }
 0x4c1   : > { %3640 = vst [vmem:[#allocation4 + $0x8] sm:$0xff] %v3634_v61  ;;  %v3635_v19 = vmax.f32 %v3617_v15, %v3629_v52  ;;  %v3611_v25 = vpop.f32.mrb[22].mxu1  ;;  %v3795_v61 = vadd.s32 1, %v8122_v51  ;;  %v3796_v42 = vadd.s32 1, %v8125_v35 }
 0x4c2   : > { %v3619_v36 = vmax.f32 %v3609_v47, 0.0  ;;  %v3612_v40 = vadd.f32 %v3611_v25, %v3555_v60  ;;  %v5622_v37 = vpop.f32.mrb[23].mxu1 }
 0x4c3   : > { %3641 = vst [vmem:[#allocation4 + $0x10] sm:$0xff] %v3635_v19  ;;  %vm3801_vm11 = vcmp.lt.s32.totalorder %v3795_v61, 8  ;;  %vm3802_vm12 = vcmp.lt.s32.totalorder %v3796_v42, 8  ;;  %v6022_v61 = vld [vmem:[#allocation5 + $0x234] ss:$8 sps:$4 sm:$0xff]  }
 0x4c4   : > { %v3625_v24 = vrot.slane %v3619_v36, 1  ;;  %v3620_v18 = vmax.f32 %v3612_v40, 0.0  ;;  %v5971_v40 = vld [vmem:[#allocation5 + $0x124] ss:$8 sps:$4 sm:$0xff]   ;;  %v6026_v42 = vld [vmem:[#allocation5 + $0x250] ss:$8 sps:$4 sm:$0xff]  }
 0x4c6   : > { %v3628_v3 = vsel %vm1301_vm5, %v3624_v4, %v3625_v24  ;;  %v3626_v5 = vrot.slane %v3620_v18, 1  ;;  %v5968_v4 = vld [vmem:[#allocation5 + $0x114] ss:$8 sps:$4 sm:$0xff]  }
 0x4c7   : > { %v3636_v7 = vmax.f32 %v3618_v43, %v3628_v3  ;;  %v4469_v49 = vpop.f32.mrb[24].mxu1  ;;  %v5963_v43 = vld [vmem:[#allocation5 + $0x100] ss:$8 sps:$4 sm:$0xff]  }
 0x4c8   : > { %v3627_v26 = vsel %vm1301_vm5, %v3625_v24, %v3626_v5  ;;  %v3632_v10 = vsel %vm1301_vm5, %v3626_v5, %v3621_v59  ;;  %v4470_v55 = vadd.f32 %v4469_v49, %v4426_v12  ;;  %v5627_v31 = vpop.f32.mrb[25].mxu1  ;;  %v8138_v23 = vld [vmem:[#allocation4] ss:$2 sm:$0xff]  ;;  %v5969_v3 = vld [vmem:[#allocation5 + $0x120] ss:$8 sps:$4 sm:$0xff]  }
 0x4c9   : > { %3642 = vst [vmem:[#allocation4 + $0x18] sm:$0xff] %v3636_v7  ;;  %v3637_v50 = vmax.f32 %v3619_v36, %v3627_v26  ;;  %v3638_v1 = vmax.f32 %v3620_v18, %v3632_v10  ;;  %v4472_v58 = vpop.f32.mrb[26].mxu1  ;;  %v3762_v6 = vrot.slane %v8138_v23, 7  ;;  %v3735_v28 = vrot.slane %v8138_v23, 6  ;;  %v5966_v36 = vld [vmem:[#allocation5 + $0x110] ss:$8 sps:$4 sm:$0xff]  }
 0x4ca   : > { %v4475_v8 = vmax.f32 %v4470_v55, 0.0  ;;  %v5628_v32 = vpop.f32.mrb[27].mxu1  ;;  %v3816_v63 = vrot.slane %v8138_v23, 2  ;;  %v3789_v18 = vrot.slane %v8138_v23, 1  ;;  %v5974_v49 = vld [vmem:[#allocation5 + $0x134] ss:$8 sps:$4 sm:$0xff]  }
 0x4cb   : > { %3643 = vst [vmem:[#allocation4 + $0x20] sm:$0xff] %v3637_v50  ;;  %3644 = vst [vmem:[#allocation4 + $0x28] sm:$0xff] %v3638_v1  ;;  %v5972_v10 = vld [vmem:[#allocation5 + $0x130] ss:$8 sps:$4 sm:$0xff]   ;;  %v5977_v55 = vld [vmem:[#allocation5 + $0x144] ss:$8 sps:$4 sm:$0xff]  }
 0x4cc   : > { %v4480_v17 = vpack.c.bf16 %v4475_v8, %v4475_v8  ;;  %v5975_v31 = vld [vmem:[#allocation5 + $0x140] ss:$8 sps:$4 sm:$0xff]   ;;  %v5980_v50 = vld [vmem:[#allocation5 + $0x154] ss:$8 sps:$4 sm:$0xff]   ;;  %v5978_v1 = vld [vmem:[#allocation5 + $0x150] ss:$8 sps:$4 sm:$0xff]  }
 0x4cd   : > { %v5983_v58 = vld [vmem:[#allocation5 + $0x164] ss:$8 sps:$4 sm:$0xff]   ;;  %v5981_v8 = vld [vmem:[#allocation5 + $0x160] ss:$8 sps:$4 sm:$0xff]   ;;  %v5986_v32 = vld [vmem:[#allocation5 + $0x174] ss:$8 sps:$4 sm:$0xff]  }
 0x4ce   : > { %5634 = vmatmul.mubr.msk.bf16.vlgmr.msra.gmra.mrb[28].mxu1 %vm2103_vm2, %v4480_v17  ;;  %vm3772_vm2 = vcmp.ge.s32.totalorder %v3769_v57, 0  ;;  %v5989_v17 = vld [vmem:[#allocation5 + $0x184] ss:$8 sps:$4 sm:$0xff]   ;;  %v5992_v57 = vld [vmem:[#allocation5 + $0x194] ss:$8 sps:$4 sm:$0xff]  }
 0x4cf   : > { %5638 = vmatpush3.bf16.msra.mxu1 %v6037_v38  ;;  %5645 = vmatprep.mubr.msk.bf16.mxu1 %vm6164_vm8, %v6163_v21  ;;  %vm5430_vm7 = vmpackc.low %vm3772_vm2, %vm3771_vm13  ;;  %v5984_v38 = vld [vmem:[#allocation5 + $0x170] ss:$8 sps:$4 sm:$0xff]  }
 0x4d0   : > { %v8145_v16 = vld [vmem:[#allocation4 + $0x10] ss:$2 sm:$0xff]  ;;  %5639 = vmatprep.subr.bf16.mxu1 %v6163_v21 }
 0x4d1   : > { %v3763_v0 = vrot.slane %v8145_v16, 7  ;;  %v3736_v62 = vrot.slane %v8145_v16, 6  ;;  %v3845_v59 = vpack.c.bf16 %v8145_v16, %v8138_v23  ;;  %v3817_v20 = vrot.slane %v8145_v16, 2  ;;  %v6025_v23 = vld [vmem:[#allocation5 + $0x244] ss:$8 sps:$4 sm:$0xff]  }
 0x4d2   : > { %v8153_v53 = vld [vmem:[#allocation4 + $0x20] ss:$2 sm:$0xff]  ;;  %v3790_v37 = vrot.slane %v8145_v16, 1  ;;  %v6023_v16 = vld [vmem:[#allocation5 + $0x240] ss:$8 sps:$4 sm:$0xff]  }
 0x4d3   : > { %v3764_v56 = vrot.slane %v8153_v53, 7  ;;  %v3737_v45 = vrot.slane %v8153_v53, 6  ;;  %5640 = vmatpush3.bf16.msra.mxu1 %v6038_v41  ;;  %v3766_v33 = vsel %vm788_vm1, %v3762_v6, %v3763_v0  ;;  %v3818_v48 = vrot.slane %v8153_v53, 2  ;;  %v5993_v41 = vld [vmem:[#allocation5 + $0x1a0] ss:$8 sps:$4 sm:$0xff]  }
 0x4d4   : > { %5641 = vmatprep.subr.bf16.mxu1 %v6163_v21  ;;  %v3739_v15 = vsel %vm446_vm0, %v3735_v28, %v3736_v62  ;;  %v8184_v52 = vsel %vm1642_vm4, %v3816_v63, %v3817_v20  ;;  %v3791_v25 = vrot.slane %v8153_v53, 1  ;;  %v3793_v7 = vsel %vm1301_vm5, %v3789_v18, %v3790_v37 }
 0x4d5   : > { %v3767_v9 = vsel %vm788_vm1, %v3764_v56, %v3762_v6  ;;  %v3740_v22 = vsel %vm446_vm0, %v3737_v45, %v3735_v28  ;;  %v3765_v44 = vsel %vm788_vm1, %v3763_v0, %v3764_v56  ;;  %v8180_v27 = vsel %vm1642_vm4, %v3817_v20, %v3818_v48  ;;  %v5996_v0 = vld [vmem:[#allocation5 + $0x1b0] ss:$8 sps:$4 sm:$0xff]   ;;  %v5999_v6 = vld [vmem:[#allocation5 + $0x1c0] ss:$8 sps:$4 sm:$0xff]   ;;  %v6004_v56 = vld [vmem:[#allocation5 + $0x1d4] ss:$8 sps:$4 sm:$0xff]  }
 0x4d6   : > { %v5431_v54 = vpack.c.bf16 %v3766_v33, %v3767_v9  ;;  %v5434_v14 = vpack.c.bf16 %v3739_v15, %v3740_v22  ;;  %v5437_v47 = vpack.c.bf16 %v3765_v44, %v3765_v44  ;;  %v5449_v60 = vpack.c.bf16 %v8180_v27, %v8184_v52  ;;  %v6002_v28 = vld [vmem:[#allocation5 + $0x1d0] ss:$8 sps:$4 sm:$0xff]   ;;  %v6005_v20 = vld [vmem:[#allocation5 + $0x1e0] ss:$8 sps:$4 sm:$0xff]   ;;  %v6010_v33 = vld [vmem:[#allocation5 + $0x1f4] ss:$8 sps:$4 sm:$0xff]  }
 0x4d7   : > { %v8191_v19 = vsel %vm1642_vm4, %v3818_v48, %v3816_v63  ;;  %vm3746_vm1 = vcmp.ge.s32.totalorder %v3743_v46, 0  ;;  %v3738_v24 = vsel %vm446_vm0, %v3736_v62, %v3737_v45  ;;  %v3792_v12 = vsel %vm1301_vm5, %v3790_v37, %v3791_v25  ;;  %vm5442_vm0 = vmpackc.low %vm3802_vm12, %vm3801_vm11  ;;  %v6001_v62 = vld [vmem:[#allocation5 + $0x1c4] ss:$8 sps:$4 sm:$0xff]   ;;  %v6008_v48 = vld [vmem:[#allocation5 + $0x1f0] ss:$8 sps:$4 sm:$0xff]  }
 0x4d8   : > { %5432 = vmatprep.mubr.msk.bf16.mxu0 %vm5430_vm7, %v5431_v54  ;;  %vm5439_vm4 = vmpackc.low %vm3746_vm1, %vm3746_vm1  ;;  %v5440_v5 = vpack.c.bf16 %v3738_v24, %v3738_v24  ;;  %v5443_v26 = vpack.c.bf16 %v3792_v12, %v3793_v7  ;;  %v6007_v45 = vld [vmem:[#allocation5 + $0x1e4] ss:$8 sps:$4 sm:$0xff]   ;;  %v3797_v63 = vadd.s32 1, %v8131_v39  ;;  %v3794_v15 = vsel %vm1301_vm5, %v3791_v25, %v3789_v18  ;;  %v6011_v22 = vld [vmem:[#allocation5 + $0x200] ss:$8 sps:$4 sm:$0xff]  }
 0x4d9   : > { %5435 = vmatmul.mubr.msk.bf16.vlgmr.msra.gmra.mrb[24].mxu0 %vm5433_vm9, %v5434_v14  ;;  %v6013_v9 = vld [vmem:[#allocation5 + $0x204] ss:$8 sps:$4 sm:$0xff]   ;;  %v6016_v44 = vld [vmem:[#allocation5 + $0x214] ss:$8 sps:$4 sm:$0xff]   ;;  %v5446_v54 = vpack.c.bf16 %v3794_v15, %v3794_v15  ;;  %v3850_v46 = vpack.c.bf16 %v8153_v53, %v8153_v53  ;;  %v3823_v37 = vadd.s32 2, %v8125_v35  ;;  %v3824_v18 = vadd.s32 2, %v8131_v39 }
 0x4da   : > { %4316 = vmatpush1.bf16.msra.mxu0 %v5963_v43  ;;  %5438 = vmatprep.mubr.msk.bf16.mxu0 %vm5436_vm10, %v5437_v47  ;;  %vm3803_vm13 = vcmp.lt.s32.totalorder %v3797_v63, 8  ;;  %v6014_v43 = vld [vmem:[#allocation5 + $0x210] ss:$8 sps:$4 sm:$0xff]   ;;  %v6019_v14 = vld [vmem:[#allocation5 + $0x224] ss:$8 sps:$4 sm:$0xff]   ;;  %vm4643_vm9 = vcmask 1043456  }
 0x4db   : > { %4317 = vmatprep.subr.bf16.mxu0 %v5968_v4  ;;  %vm5445_vm2 = vmpackc.low %vm3803_vm13, %vm3803_vm13  ;;  %v6017_v4 = vld [vmem:[#allocation5 + $0x220] ss:$8 sps:$4 sm:$0xff]   ;;  %v6020_v47 = vld [vmem:[#allocation5 + $0x230] ss:$8 sps:$4 sm:$0xff]   ;;  %vm3829_vm14 = vcmp.lt.s32.totalorder %v3823_v37, 8  ;;  %vm3830_vm6 = vcmp.lt.s32.totalorder %v3824_v18, 8 }
 0x4dc   : > { %v6031_v25 = vld [vmem:[#allocation5 + $0x264] ss:$8 sps:$4 sm:$0xff]   ;;  %v6035_v53 = vld [vmem:[#allocation5 + $0x274] ss:$8 sps:$4 sm:$0xff]   ;;  %v6033_v24 = vld [vmem:[#allocation5 + $0x270] ss:$8 sps:$4 sm:$0xff]  }
 0x4dd   : > { %vm5451_vm7 = vmpackc.low %vm3830_vm6, %vm3830_vm6  ;;  %v6039_v35 = vld [vmem:[%s8399_s6 + $0x28] sm:$0xff]   ;;  %v6040_v39 = vld [vmem:[%s8399_s6 + $0x30] sm:$0xff]   ;;  %vm4639_vm10 = vcmask 195584   ;;  %vm4710_vm1 = vcmask 1045504   ;;  %vm4706_vm11 = vcmask 97280  }
 0x4de   : > { %4318 = vmatpush1.bf16.msra.mxu0 %v5966_v36  ;;  %v6029_v36 = vld [vmem:[#allocation5 + $0x260] ss:$8 sps:$4 sm:$0xff]   ;;  %5642 = vmatpush3.bf16.msra.mxu1 %v6039_v35  ;;  %v4481_v27 = vld [vmem:[#allocation7 + $0x5] ss:$0 sm:$0xff]  ;;  %v4697_v35 = vld [vmem:[%s8399_s6 + $0x160] sm:$0x1] }
 0x4df   : > { %4319 = vmatprep.subr.bf16.mxu0 %v5971_v40  ;;  %v3822_v40 = vadd.s32 2, %v8122_v51  ;;  %v5452_v51 = vpack.c.bf16 %v8191_v19, %v8191_v19  ;;  %5643 = vmatprep.subr.bf16.mxu1 %v6163_v21  ;;  %v6041_v15 = vld [vmem:[%s8399_s6 + $0x158] sm:$0x3f]  }
 0x4e0   : > { %v6042_v18 = vld [vmem:[%s8399_s6 + $0x78] sm:$0xff]  }
 0x4e1   : > { %5441 = vmatmul.mubr.msk.bf16.gmra.mrb[28].mxu0 %vm5439_vm4, %v5440_v5  ;;  %vm3828_vm5 = vcmp.lt.s32.totalorder %v3822_v40, 8 }
 0x4e2   : > { %4320 = vmatpush1.bf16.msra.mxu0 %v5969_v3  ;;  %5444 = vmatprep.mubr.msk.bf16.mxu0 %vm5442_vm0, %v5443_v26  ;;  %vm5448_vm3 = vmpackc.low %vm3829_vm14, %vm3828_vm5  ;;  %v8457_v26 = vsub.s32 0, %v6299_v2 }
 0x4e3   : > { %4321 = vmatprep.subr.bf16.mxu0 %v5974_v49  ;;  %5644 = vmatpush3.bf16.msra.mxu1 %v6040_v39  ;;  %v3731_v49 = vld [vmem:[#allocation7 + $0x3] ss:$8 sm:$0x3] }
 0x4e4   : > { %v6043_v39 = vld [vmem:[%s8399_s6 + $0x38] sm:$0xff]  }
 0x4e6   : > { %4322 = vmatpush1.bf16.msra.mxu0 %v5972_v10  ;;  %v3857_v10 = vrot.slane %v3731_v49, %v8457_v26  ;;  %v6053_v26 = vld [vmem:[%s8399_s6 + $0x60] sm:$0xff]  }
 0x4e7   : > { %4323 = vmatprep.subr.bf16.mxu0 %v5977_v55  ;;  %v8458_v55 = vsub.s32 1, %v6299_v2 }
 0x4ea   : > { %4324 = vmatpush1.bf16.msra.mxu0 %v5975_v31  ;;  %v3861_v31 = vrot.slane %v3731_v49, %v8458_v55  ;;  %v6052_v49 = vld [vmem:[%s8399_s6 + $0xa0] sm:$0xff]   ;;  %v6055_v55 = vld [vmem:[%s8399_s6 + $0x68] sm:$0xff]  }
 0x4eb   : > { %4325 = vmatprep.subr.bf16.mxu0 %v5980_v50 }
 0x4ee   : > { %4326 = vmatpush1.bf16.msra.mxu0 %v5978_v1 }
 0x4ef   : > { %4327 = vmatprep.subr.bf16.mxu0 %v5983_v58 }
 0x4f2   : > { %4328 = vmatpush1.bf16.msra.mxu0 %v5981_v8 }
 0x4f3   : > { %4329 = vmatprep.subr.bf16.mxu0 %v5986_v32 }
 0x4f6   : > { %4330 = vmatpush1.bf16.msra.mxu0 %v5984_v38 }
 0x4f7   : > { %4331 = vmatprep.subr.bf16.mxu0 %v5989_v17 }
 0x4fa   : > { %4332 = vmatpush1.bf16.msra.mxu0 %v5987_v29 }
 0x4fb   : > { %4333 = vmatprep.subr.bf16.mxu0 %v5992_v57 }
 0x4fe   : > { %4334 = vmatpush1.bf16.msra.mxu0 %v5990_v30 }
 0x4ff   : > { %4335 = vmatprep.subr.bf16.mxu0 %v5995_v34 }
 0x502   : > { %4336 = vmatpush1.bf16.msra.mxu0 %v5993_v41 }
 0x503   : > { %4337 = vmatprep.subr.bf16.mxu0 %v5998_v13 }
 0x506   : > { %4338 = vmatpush1.bf16.msra.mxu0 %v5996_v0 }
 0x507   : > { %4339 = vmatprep.subr.bf16.mxu0 %v6001_v62 }
 0x50a   : > { %4340 = vmatpush1.bf16.msra.mxu0 %v5999_v6 }
 0x50b   : > { %4341 = vmatprep.subr.bf16.mxu0 %v6004_v56 }
 0x50e   : > { %4342 = vmatpush1.bf16.msra.mxu0 %v6002_v28 }
 0x50f   : > { %4343 = vmatprep.subr.bf16.mxu0 %v6007_v45 }
 0x512   : > { %4344 = vmatpush1.bf16.msra.mxu0 %v6005_v20 }
 0x513   : > { %4345 = vmatprep.subr.bf16.mxu0 %v6010_v33 }
 0x516   : > { %4346 = vmatpush1.bf16.msra.mxu0 %v6008_v48 }
 0x517   : > { %4366 = vmatprep.subr.bf16.mxu0 %v6013_v9 }
 0x519   : > { %4348 = vmatmul.mubr.bf16.vlgmr.msra.gmra.mrb[24].mxu0 %v3845_v59  ;;  %v6028_v59 = vld [vmem:[#allocation5 + $0x254] ss:$8 sps:$4 sm:$0xff]  }
 0x51a   : > { %5447 = vmatprep.mubr.msk.bf16.mxu0 %vm5445_vm2, %v5446_v54  ;;  %4367 = vmatpush1.bf16.msra.mxu0 %v6011_v22 }
 0x51b   : > { %4368 = vmatprep.subr.bf16.mxu0 %v6016_v44 }
 0x51e   : > { %4369 = vmatpush1.bf16.msra.mxu0 %v6014_v43 }
 0x51f   : > { %4370 = vmatprep.subr.bf16.mxu0 %v6019_v14  ;;  %v4627_v14 = vpop.permute.xlu0 %4626 }
 0x521   : > { %4358 = vmatmul.mubr.bf16.gmra.mrb[28].mxu0 %v3850_v46 }
 0x522   : > { %4371 = vmatpush1.bf16.msra.mxu0 %v6017_v4  ;;  %4398 = vmatprep.mubr.bf16.mxu0 %v8442_v11 }
 0x523   : > { %4372 = vmatprep.subr.bf16.mxu0 %v6022_v61 }
 0x526   : > { %4373 = vmatpush1.bf16.msra.mxu0 %v6020_v47  ;;  %v4632_v47 = vpop.permute.xlu1 %4631 }
 0x527   : > { %4374 = vmatprep.subr.bf16.mxu0 %v6025_v23 }
 0x52a   : > { %4375 = vmatpush1.bf16.msra.mxu0 %v6023_v16 }
 0x52b   : > { %4376 = vmatprep.subr.bf16.mxu0 %v6028_v59 }
 0x52e   : > { %4377 = vmatpush1.bf16.msra.mxu0 %v6026_v42 }
 0x52f   : > { %4378 = vmatprep.subr.bf16.mxu0 %v6031_v25 }
 0x532   : > { %4379 = vmatpush1.bf16.msra.mxu0 %v6029_v36 }
 0x533   : > { %4380 = vmatprep.subr.bf16.mxu0 %v6035_v53 }
 0x536   : > { %4381 = vmatpush1.bf16.msra.mxu0 %v6033_v24 }
 0x537   : > { %5689 = vmatprep.subr.bf16.mxu0 %v6163_v21 }
 0x539   : > { %5450 = vmatmul.mubr.msk.bf16.vlgmr.msra.gmra.mrb[24].mxu0 %vm5448_vm3, %v5449_v60 }
 0x53a   : > { %4408 = vmatprep.mubr.bf16.mxu0 %v8442_v11 }
 0x541   : > { %5453 = vmatmul.mubr.msk.bf16.gmra.mrb[28].mxu0 %vm5451_vm7, %v5452_v51 }
 0x542   : > { %5697 = vmatprep.mubr.msk.bf16.mxu0 %vm6164_vm8, %v6163_v21 }
 0x5a1   : > { %v4531_v52 = vpop.f32.mrb[28].mxu1 }
 0x5a2   : > { %v4532_v60 = vadd.f32 %v4531_v52, %v4481_v27  ;;  %v5635_v19 = vpop.f32.mrb[29].mxu1  ;;  %v6044_v27 = vld [vmem:[%s8399_s6 + $0x80] sm:$0xff]  }
 0x5a3   : > { %v4534_v12 = vpop.f32.mrb[30].mxu1  ;;  %v6045_v52 = vld [vmem:[%s8399_s6 + $0x40] sm:$0xff]   ;;  %v6047_v19 = vld [vmem:[%s8399_s6 + $0x48] sm:$0xff]  }
 0x5a4   : > { %v4537_v3 = vmax.f32 %v4532_v60, 0.0  ;;  %v5636_v5 = vpop.f32.mrb[31].mxu1  ;;  %v6046_v60 = vld [vmem:[%s8399_s6 + $0x88] sm:$0xff]   ;;  %v6048_v12 = vld [vmem:[%s8399_s6 + $0x90] sm:$0xff]  }
 0x5a5   : > { %v6050_v5 = vld [vmem:[%s8399_s6 + $0x98] sm:$0xff]  }
 0x5a6   : > { %v4546_v7 = vpack.c.bf16 %v4537_v3, %v4537_v3  ;;  %v6049_v3 = vld [vmem:[%s8399_s6 + $0x50] sm:$0xff]  }
 0x5a8   : > { %5646 = vmatmul.mubr.msk.bf16.vlgmr.msra.gmra.mrb[32].mxu1 %vm2772_vm15, %v4546_v7  ;;  %v6051_v7 = vld [vmem:[%s8399_s6 + $0x58] sm:$0xff]  }
 0x5a9   : > { %4682 = vmatprep.mubr.bf16.mxu1 %v8442_v11 }
 0x60c   : > { %v4400_v50 = vpop.f32.mrb[24].mxu0 }
 0x60d   : > { %v5701_v1 = vadd.f32 %v4400_v50, %v3857_v10  ;;  %v4402_v58 = vpop.f32.mrb[25].mxu0  ;;  %v6057_v50 = vld [vmem:[%s8399_s6 + $0x70] sm:$0xff]  }
 0x60e   : > { %v5702_v8 = vadd.f32 %v4402_v58, %v3861_v31  ;;  %v4404_v32 = vpop.f32.mrb[26].mxu0 }
 0x60f   : > { %v5703_v38 = vadd.f32 %v4404_v32, %v3857_v10  ;;  %v4406_v17 = vpop.f32.mrb[27].mxu0  ;;  %v4417_v57 = vmax.f32 %v5701_v1, 0.0  ;;  %v4704_v1 = vpop.permute.xlu0 %4703 }
 0x610   : > { %v5704_v29 = vadd.f32 %v4406_v17, %v3861_v31  ;;  %v4418_v34 = vmax.f32 %v5702_v8, 0.0 }
 0x611   : > { %v4419_v30 = vmax.f32 %v5703_v38, 0.0 }
 0x612   : > { %v4420_v41 = vmax.f32 %v5704_v29, 0.0 }
 0x613   : > { %v4618_v13 = vpack.c.bf16 %v4419_v30, %v4417_v57 }
 0x614   : > { %v4619_v0 = vpack.c.bf16 %v4420_v41, %v4418_v34  ;;  %v4410_v62 = vpop.f32.mrb[28].mxu0  ;;  %v6058_v41 = vld [vmem:[%s8399_s6 + $0xb8] sm:$0xff]  }
 0x615   : > { %v5705_v6 = vadd.f32 %v4410_v62, %v3857_v10  ;;  %v4412_v56 = vpop.f32.mrb[29].mxu0  ;;  %v6054_v10 = vld [vmem:[%s8399_s6 + $0xa8] sm:$0xff]  }
 0x616   : > { %v5706_v28 = vadd.f32 %v4412_v56, %v3861_v31  ;;  %v4414_v2 = vpop.f32.mrb[30].mxu0  ;;  %4650 = vmatprep.subr.bf16.mxu1 %v4619_v0  ;;  %v6056_v31 = vld [vmem:[%s8399_s6 + $0xb0] sm:$0xff]   ;;  %v6059_v0 = vld [vmem:[%s8399_s6 + $0xc0] sm:$0xff]   ;;  %v6060_v62 = vld [vmem:[%s8399_s6 + $0xc8] sm:$0xff]  }
 0x617   : > { %v4421_v45 = vmax.f32 %v5705_v6, 0.0  ;;  %v4415_v20 = vpop.f32.mrb[31].mxu0  ;;  %4651 = vmatpush1.bf16.msra.mxu1 %v4618_v13  ;;  %v6061_v6 = vld [vmem:[%s8399_s6 + $0xd0] sm:$0xff]   ;;  %v6062_v56 = vld [vmem:[%s8399_s6 + $0xd8] sm:$0xff]  }
 0x618   : > { %v4422_v33 = vmax.f32 %v5706_v28, 0.0  ;;  %v6063_v28 = vld [vmem:[%s8399_s6 + $0xe0] sm:$0xff]   ;;  %v4547_v2 = vld [vmem:[#allocation7 + $0x6] ss:$0 sm:$0xff] }
 0x619   : > { %v4620_v63 = vpack.c.bf16 %v4421_v45, %v4421_v45  ;;  %v6064_v45 = vld [vmem:[%s8399_s6 + $0xe8] sm:$0xff]  }
 0x61a   : > { %v4621_v48 = vpack.c.bf16 %v4422_v33, %v4422_v33  ;;  %v6065_v33 = vld [vmem:[%s8399_s6 + $0xf0] sm:$0xff]  }
 0x61b   : > { %v4645_v9 = vsel %vm4643_vm9, %v4620_v63, 0 }
 0x61c   : > { %5464 = vmatprep.subr.msk.bf16.mxu1 %vm4643_vm9, %v4621_v48 }
 0x61d   : > { %4653 = vmatpush1.bf16.msra.mxu1 %v4645_v9  ;;  %v6066_v9 = vld [vmem:[%s8399_s6 + $0xf8] sm:$0xff]  }
 0x620   : > { %5465 = vmatmul.mubr.msk.bf16.vlgmr.msra.gmra.mrb[36].mxu1 %vm4639_vm10, %v6041_v15  ;;  %v6067_v15 = vld [vmem:[%s8399_s6 + $0x100] sm:$0xff]  }
 0x621   : > { %4749 = vmatprep.mubr.bf16.mxu1 %v8442_v11 }
 0x67b   : > { %v8248_v22 = vpop.f32.mrb[32].mxu1 }
 0x67c   : > { %v5647_v44 = vpop.f32.mrb[33].mxu1  ;;  %v4610_v20 = vadd.f32 %v8248_v22, %v4547_v2  ;;  %v6068_v22 = vld [vmem:[%s8399_s6 + $0x108] sm:$0xff]  }
 0x67d   : > { %v4612_v54 = vpop.f32.mrb[34].mxu1  ;;  %v6069_v44 = vld [vmem:[%s8399_s6 + $0x110] sm:$0xff]  }
 0x67e   : > { %v5648_v43 = vpop.f32.mrb[35].mxu1  ;;  %v4615_v63 = vmax.f32 %v4610_v20, 0.0  ;;  %v6070_v54 = vld [vmem:[%s8399_s6 + $0x118] sm:$0xff]  }
 0x67f   : > { %v6071_v43 = vld [vmem:[%s8399_s6 + $0x120] sm:$0xff]  }
 0x680   : > { %v4810_v48 = vpack.c.bf16 %v4615_v63, %v4615_v63 }
 0x6f3   : > { %v4684_v4 = vpop.f32.mrb[36].mxu1 }
 0x6f4   : > { %v4685_v46 = vadd.f32 %v4684_v4, %v4627_v14  ;;  %v4686_v61 = vpop.f32.mrb[37].mxu1  ;;  %v6073_v4 = vld [vmem:[%s8399_s6 + $0x130] sm:$0xff]  }
 0x6f5   : > { %v4687_v23 = vadd.f32 %v4686_v61, %v4627_v14  ;;  %v4688_v16 = vpop.f32.mrb[38].mxu1  ;;  %v6072_v14 = vld [vmem:[%s8399_s6 + $0x128] sm:$0xff]   ;;  %v6075_v61 = vld [vmem:[%s8399_s6 + $0x140] sm:$0xff]  }
 0x6f6   : > { %v4689_v59 = vadd.f32 %v4688_v16, %v4632_v47  ;;  %v4690_v42 = vpop.f32.mrb[39].mxu1  ;;  %v4693_v36 = vmax.f32 %v4685_v46, 0.0  ;;  %v6074_v46 = vld [vmem:[%s8399_s6 + $0x138] sm:$0xff]  }
 0x6f7   : > { %v4691_v25 = vadd.f32 %v4690_v42, %v4632_v47  ;;  %v4694_v40 = vmax.f32 %v4687_v23, 0.0  ;;  %5690 = vmatpush3.bf16.msra.mxu0 %v6074_v46 }
 0x6f8   : > { %v4695_v53 = vmax.f32 %v4689_v59, 0.0  ;;  %5691 = vmatprep.subr.bf16.mxu0 %v6163_v21 }
 0x6f9   : > { %v4696_v37 = vmax.f32 %v4691_v25, 0.0  ;;  %v4811_v25 = vld [vmem:[#allocation7 + $0x7] ss:$0 sm:$0xff] }
 0x6fa   : > { %v4698_v11 = vpack.c.bf16 %v4695_v53, %v4693_v36 }
 0x6fb   : > { %v4699_v24 = vpack.c.bf16 %v4696_v37, %v4694_v40  ;;  %5692 = vmatpush3.bf16.msra.mxu0 %v6075_v61 }
 0x6fc   : > { %v4712_v51 = vsel %vm4710_vm1, %v4698_v11, 0  ;;  %5693 = vmatprep.subr.bf16.mxu0 %v6163_v21 }
 0x6fd   : > { %5466 = vmatprep.subr.msk.bf16.mxu1 %vm4710_vm1, %v4699_v24 }
 0x6fe   : > { %4718 = vmatpush1.bf16.msra.mxu1 %v4712_v51 }
 0x6ff   : > { %5558 = vmatprep.subr.bf16.mxu1 %v6042_v18 }
 0x701   : > { %5467 = vmatmul.mubr.msk.bf16.vlgmr.msra.gmra.mrb[40].mxu1 %vm4706_vm11, %v4697_v35  ;;  %v6076_v35 = vld [vmem:[%s8399_s6 + $0x148] sm:$0xff]  }
 0x702   : > { %5559 = vmatpush3.bf16.msra.mxu1 %v6043_v39  ;;  %5694 = vmatpush3.bf16.msra.mxu0 %v6076_v35  ;;  %v6077_v39 = vld [vmem:[%s8399_s6 + $0x150] sm:$0xff]  }
 0x703   : > { %5560 = vmatprep.subr.bf16.mxu1 %v6044_v27  ;;  %5695 = vmatprep.subr.bf16.mxu0 %v6163_v21  ;;  %v5054_v27 = vld [vmem:[#allocation7 + $0x10] ss:$0 sm:$0xff] }
 0x706   : > { %5561 = vmatpush3.bf16.msra.mxu1 %v6045_v52  ;;  %5696 = vmatpush3.bf16.msra.mxu0 %v6077_v39 }
 0x707   : > { %5562 = vmatprep.subr.bf16.mxu1 %v6046_v60 }
 0x70a   : > { %5563 = vmatpush3.bf16.msra.mxu1 %v6047_v19 }
 0x70b   : > { %5564 = vmatprep.subr.bf16.mxu1 %v6048_v12 }
 0x70e   : > { %5565 = vmatpush3.bf16.msra.mxu1 %v6049_v3 }
 0x70f   : > { %5566 = vmatprep.subr.bf16.mxu1 %v6050_v5 }
 0x712   : > { %5567 = vmatpush3.bf16.msra.mxu1 %v6051_v7 }
 0x713   : > { %5568 = vmatprep.subr.bf16.mxu1 %v6052_v49  ;;  %v5153_v49 = vld [vmem:[#allocation7 + $0x11] ss:$0 sm:$0xff] }
 0x716   : > { %5569 = vmatpush3.bf16.msra.mxu1 %v6053_v26 }
 0x717   : > { %5570 = vmatprep.subr.bf16.mxu1 %v6054_v10 }
 0x71a   : > { %5571 = vmatpush3.bf16.msra.mxu1 %v6055_v55 }
 0x71b   : > { %5572 = vmatprep.subr.bf16.mxu1 %v6056_v31 }
 0x71e   : > { %5573 = vmatpush3.bf16.msra.mxu1 %v6057_v50 }
 0x71f   : > { %5649 = vmatprep.subr.bf16.mxu1 %v6163_v21 }
 0x7d4   : > { %v4751_v58 = vpop.f32.mrb[40].mxu1 }
 0x7d5   : > { %v4752_v8 = vadd.f32 %v4751_v58, %v4704_v1  ;;  %v4753_v32 = vpop.f32.mrb[41].mxu1 }
 0x7d6   : > { %v4754_v38 = vadd.f32 %v4753_v32, %v4704_v1  ;;  %v4755_v17 = vpop.f32.mrb[42].mxu1 }
 0x7d7   : > { %v4758_v29 = vmax.f32 %v4752_v8, 0.0  ;;  %v4756_v57 = vpop.f32.mrb[43].mxu1 }
 0x7d8   : > { %v4759_v30 = vmax.f32 %v4754_v38, 0.0 }
 0x7d9   : > { %v4808_v13 = vpack.c.bf16 %v4758_v29, %v4758_v29 }
 0x7da   : > { %v4809_v34 = vpack.c.bf16 %v4759_v30, %v4759_v30 }
 0x7dc   : > { %4988 = vmatprep.mubr.bf16.mxu1 %v4809_v34 }
 0x7dd   : > { %4989 = vmatmul.mubr.bf16.vlgmr.msra.gmra.mrb[44].mxu1 %v4808_v13 }
 0x7de   : > { %5650 = vmatpush3.bf16.msra.mxu1 %v6058_v41  ;;  %5665 = vmatprep.mubr.msk.bf16.mxu1 %vm6164_vm8, %v6163_v21 }
 0x7df   : > { %5651 = vmatprep.subr.bf16.mxu1 %v6163_v21 }
 0x7e2   : > { %5652 = vmatpush3.bf16.msra.mxu1 %v6059_v0 }
 0x7e3   : > { %5653 = vmatprep.subr.bf16.mxu1 %v6163_v21 }
 0x7e6   : > { %5654 = vmatpush3.bf16.msra.mxu1 %v6060_v62 }
 0x7e7   : > { %5655 = vmatprep.subr.bf16.mxu1 %v6163_v21 }
 0x7ea   : > { %5656 = vmatpush3.bf16.msra.mxu1 %v6061_v6 }
 0x7eb   : > { %5657 = vmatprep.subr.bf16.mxu1 %v6163_v21 }
 0x7ee   : > { %5658 = vmatpush3.bf16.msra.mxu1 %v6062_v56 }
 0x7ef   : > { %5659 = vmatprep.subr.bf16.mxu1 %v6163_v21 }
 0x7f2   : > { %5660 = vmatpush3.bf16.msra.mxu1 %v6063_v28 }
 0x7f3   : > { %5661 = vmatprep.subr.bf16.mxu1 %v6163_v21 }
 0x7f6   : > { %5662 = vmatpush3.bf16.msra.mxu1 %v6064_v45 }
 0x7f7   : > { %5663 = vmatprep.subr.bf16.mxu1 %v6163_v21 }
 0x7fa   : > { %5664 = vmatpush3.bf16.msra.mxu1 %v6065_v33 }
 0x7fb   : > { %5669 = vmatprep.subr.bf16.mxu1 %v6163_v21 }
 0x7fd   : > { %5666 = vmatmul.mubr.bf16.vlgmr.msra.gmra.mrb[48].mxu1 %v4810_v48 }
 0x7fe   : > { %5685 = vmatprep.mubr.msk.bf16.mxu1 %vm6164_vm8, %v6163_v21  ;;  %5670 = vmatpush3.bf16.msra.mxu1 %v6066_v9  ;;  %vm5221_vm8 = vcmask 0  }
 0x7ff   : > { %5671 = vmatprep.subr.bf16.mxu1 %v6163_v21 }
 0x802   : > { %5672 = vmatpush3.bf16.msra.mxu1 %v6067_v15 }
 0x803   : > { %5673 = vmatprep.subr.bf16.mxu1 %v6163_v21 }
 0x806   : > { %5674 = vmatpush3.bf16.msra.mxu1 %v6068_v22 }
 0x807   : > { %5675 = vmatprep.subr.bf16.mxu1 %v6163_v21 }
 0x80a   : > { %5676 = vmatpush3.bf16.msra.mxu1 %v6069_v44 }
 0x80b   : > { %5677 = vmatprep.subr.bf16.mxu1 %v6163_v21 }
 0x80e   : > { %5678 = vmatpush3.bf16.msra.mxu1 %v6070_v54 }
 0x80f   : > { %5679 = vmatprep.subr.bf16.mxu1 %v6163_v21 }
 0x812   : > { %5680 = vmatpush3.bf16.msra.mxu1 %v6071_v43 }
 0x813   : > { %5681 = vmatprep.subr.bf16.mxu1 %v6163_v21 }
 0x816   : > { %5682 = vmatpush3.bf16.msra.mxu1 %v6072_v14 }
 0x817   : > { %5683 = vmatprep.subr.bf16.mxu1 %v6163_v21 }
 0x81a   : > { %5684 = vmatpush3.bf16.msra.mxu1 %v6073_v4 }
 0x8b0   : > { %v5574_v47 = vpop.f32.mrb[44].mxu1 }
 0x8b1   : > { %v5575_v23 = vpop.f32.mrb[45].mxu1 }
 0x8b2   : > { %v5576_v16 = vadd.f32 %v5575_v23, %v5574_v47  ;;  %v5577_v59 = vpop.f32.mrb[46].mxu1 }
 0x8b3   : > { %v5578_v42 = vpop.f32.mrb[47].mxu1 }
 0x8b4   : > { %v4991_v36 = vadd.f32 %v5576_v16, %v4811_v25 }
 0x8d0   : > { %v5030_v53 = vpop.f32.mrb[48].mxu1 }
 0x8d1   : > { %v5031_v40 = vadd.f32 %v5030_v53, %v4991_v36  ;;  %v5667_v37 = vpop.f32.mrb[49].mxu1 }
 0x8d2   : > { %v5033_v11 = vpop.f32.mrb[50].mxu1 }
 0x8d3   : > { %v5036_v24 = vmax.f32 %v5031_v40, 0.0  ;;  %v5668_v18 = vpop.f32.mrb[51].mxu1 }
 0x8d5   : > { %v5053_v51 = vpack.c.bf16 %v5036_v24, %v5036_v24 }
 0x8d7   : > { %5686 = vmatmul.mubr.bf16.vlgmr.msra.gmra.mrb[52].mxu1 %v5053_v51 }
 0x9aa   : > { %v5137_v52 = vpop.f32.mrb[52].mxu1 }
 0x9ab   : > { %v5138_v60 = vadd.f32 %v5137_v52, %v5054_v27  ;;  %v5687_v19 = vpop.f32.mrb[53].mxu1 }
 0x9ac   : > { %v5140_v12 = vpop.f32.mrb[54].mxu1 }
 0x9ad   : > { %v5143_v3 = vmax.f32 %v5138_v60, 0.0  ;;  %v5688_v5 = vpop.f32.mrb[55].mxu1 }
 0x9af   : > { %v5152_v7 = vpack.c.bf16 %v5143_v3, %v5143_v3 }
 0x9b1   : > { %5698 = vmatmul.mubr.msk.bf16.vlgmr.msra.gmra.mrb[32].mxu0 %vm2772_vm15, %v5152_v7 }
 0xa84   : > { %v5215_v26 = vpop.f32.mrb[32].mxu0 }
 0xa85   : > { %v5216_v10 = vadd.f32 %v5215_v26, %v5153_v49  ;;  %v5699_v21 = vpop.f32.mrb[33].mxu0 }
 0xa86   : > { %v5218_v55 = vpop.f32.mrb[34].mxu0 }
 0xa87   : > { %5222 = vst.msk [vmem:[%s345_s22] sm:$0x1] %vm5221_vm8, %v5216_v10  ;;  %v5700_v31 = vpop.f32.mrb[35].mxu0 }
 0xa88 PF: > { %s20_s27 = sadd.s32 1, %s6151_s27  }
 0xa89   : > { %p17_p5 = scmp.ge.s32.totalorder %s20_s27, 4  }
 0xa8b   :  { %19 = sbr.rel (!%p17_p5) target bundleno = 2 (0x2), region = 113 }
 0xa92   :  { %5240 = vsyncpa [#allocation6], 1 }
 0xa93   :  { %5242 = vsyncpa [#allocation6 + $0x1], 1 }
 0xa94   :  { %5243 = vsyncpa [#allocation8], 1 }

</bundles_post_ra>
